<compile_context>
chip_gen: v6e
topology: v6e:2x2x1
jax: 0.10.0
libtpu: 0.0.40
codegen_flags: <defaults>
</compile_context>

<pallas_src>
import numpy as np
import jax
import jax.numpy as jnp
from jax.experimental import pallas as pl
from jax.experimental.pallas import tpu as pltpu

# ----------------------------- configuration -------------------------------
DIM       = 64                 # channels
DIM_HEAD  = 32
NUM_HEADS = DIM // DIM_HEAD    # 2
WIN       = 4                  # window (partition) size
N         = WIN * WIN          # tokens per window
HIDDEN    = int(DIM * 4.0)     # ConvMlp hidden (256)
EPS       = 1e-6
SCALE     = DIM_HEAD ** -0.5
NEG       = -1e30              # finite "minus inf" for the off-window mask


# ------------------------------- kernel -------------------------------------
def make_kernel(t_blk, band):
    """Fused norm1 + windowed MHSA + proj + res1 + norm2 + ConvMlp + res2 for
    one tile of t_blk tokens (whole WIN-row bands, NHWC raster order)."""
    nb = t_blk // band
    half = t_blk // 2
    f32, bf16 = jnp.float32, jnp.bfloat16

    def kernel(x_ref, bm_ref, wqkv_ref, bqkv_ref, wproj_ref, bproj_ref,
               w1_ref, b1_ref, w2_ref, b2_ref, o_ref):
        # ---- un-pair the lane-dense (half, 2C) tile into (t_blk, C) tokens ----
        xp = x_ref[...]                                            # (half, 2C) f32
        x = jnp.concatenate([xp[:, :DIM], xp[:, DIM:]], axis=0)    # (t_blk, C)

        # ---- norm1 (affine + attention scale folded into w_qkv/b_qkv) ----
        mu = jnp.mean(x, axis=-1, keepdims=True)
        var = jnp.mean(jnp.square(x - mu), axis=-1, keepdims=True)
        xn = (x - mu) * jax.lax.rsqrt(var + EPS)

        # ---- qkv 1x1 conv (columns pre-permuted to q|k|v slabs) ----
        qkv = jnp.dot(xn.astype(bf16), wqkv_ref[...],
                      preferred_element_type=f32) + bqkv_ref[...]  # (t_blk, 3C)
        qkv = qkv.astype(bf16)            # single downcast; halves vreg residency
        qkv3 = qkv.reshape(nb, band, 3 * DIM)                      # band-batched

        # ---- windowed MHSA as per-band block-diagonal attention ----
        attn_out = bproj_ref[...]                                  # (1, C) f32
        for h in range(NUM_HEADS):
            q = qkv3[:, :, h * DIM_HEAD:(h + 1) * DIM_HEAD]
            k = qkv3[:, :, DIM + h * DIM_HEAD:DIM + (h + 1) * DIM_HEAD]
            v = qkv3[:, :, 2 * DIM + h * DIM_HEAD:2 * DIM + (h + 1) * DIM_HEAD]

            s = jnp.einsum('bqd,bkd->bqk', q, k,
                           preferred_element_type=f32)             # (nb, band, band)
            s = s + bm_ref[h]        # rel-pos bias in-window, -1e30 off-window
            # scores are bounded (bf16 q/k, folded scale) and masked entries are
            # exactly -1e30 -> exp underflows to 0; max-subtraction skipped.
            p = jnp.exp(s)
            p = p * pl.reciprocal(jnp.sum(p, axis=-1, keepdims=True), approx=True)
            oh = jnp.einsum('bqk,bkd->bqd', p.astype(bf16), v,
                            preferred_element_type=f32)            # (nb, band, dh)
            # per-head slab of the output projection -> no lane-axis concat
            attn_out = attn_out + jnp.dot(
                oh.reshape(t_blk, DIM_HEAD).astype(bf16), wproj_ref[h],
                preferred_element_type=f32)

        x1 = x + attn_out                                          # residual 1

        # ---- norm2 (affine folded into w1/b1) + ConvMlp + residual 2 ----
        mu2 = jnp.mean(x1, axis=-1, keepdims=True)
        var2 = jnp.mean(jnp.square(x1 - mu2), axis=-1, keepdims=True)
        xn2 = (x1 - mu2) * jax.lax.rsqrt(var2 + EPS)

        hdn = jnp.dot(xn2.astype(bf16), w1_ref[...],
                      preferred_element_type=f32) + b1_ref[...]    # (t_blk, HIDDEN)
        # exact-erf GELU keeps parity with nn.GELU(); on v5e a tanh-approx GELU
        # would move the transcendental to the (otherwise idle) EUP slot.
        hdn = 0.5 * hdn * (1.0 + jax.lax.erf(hdn * jnp.float32(0.7071067811865476)))
        y = jnp.dot(hdn.astype(bf16), w2_ref[...],
                    preferred_element_type=f32) + b2_ref[...]      # (t_blk, C)

        out = x1 + y
        # ---- re-pair: two tokens per 128-lane row -> lane-dense output DMA ----
        o_ref[:, :DIM] = out[:half]
        o_ref[:, DIM:] = out[half:]

    return kernel


# --------------------------- host-side helpers -------------------------------
def _gen_relative_position_index(win):
    coords = np.stack(np.meshgrid(np.arange(win), np.arange(win), indexing="ij"))
    flat = coords.reshape(2, -1)
    rel = (flat[:, :, None] - flat[:, None, :]).transpose(1, 2, 0).astype(np.int64)
    rel[:, :, 0] += win - 1
    rel[:, :, 1] += win - 1
    rel[:, :, 0] *= 2 * win - 1
    return rel.sum(-1)                                          # (N, N)


def _build_band_bias_mask(rel_table_np, img_w):
    """(heads, band, band) bf16: rel-pos bias where two tokens of the same
    WIN-row band share a WINxWIN window, -1e30 elsewhere.  Tokens stay in NHWC
    raster order, so window partition/reverse is never materialized."""
    u = np.arange(WIN * img_w)
    r = u // img_w               # row inside the band == row inside the window
    c = u % img_w                # image column
    wc = c // WIN                # window index along the row
    cw = c % WIN                 # column inside the window
    same = wc[:, None] == wc[None, :]
    idx = (r[:, None] - r[None, :] + WIN - 1) * (2 * WIN - 1) \
        + (cw[:, None] - cw[None, :] + WIN - 1)
    bias = np.transpose(np.asarray(rel_table_np, np.float32)[idx], (2, 0, 1))
    return jnp.asarray(np.where(same[None], bias, NEG), jnp.bfloat16)


def prepare_params(p):
    """Fold LayerNorm affines + attention scale into the matmul weights,
    pre-permute qkv columns to q|k|v slabs (heads contiguous), split w_proj by
    head, cast MXU weights to bf16, reshape 1-D params to (1, X)."""
    f32 = np.float32
    perm = np.concatenate([
        np.arange(h * 3 * DIM_HEAD + s * DIM_HEAD,
                  h * 3 * DIM_HEAD + (s + 1) * DIM_HEAD)
        for s in range(3) for h in range(NUM_HEADS)])

    ln1_g = np.asarray(p["ln1_g"], f32); ln1_b = np.asarray(p["ln1_b"], f32)
    ln2_g = np.asarray(p["ln2_g"], f32); ln2_b = np.asarray(p["ln2_b"], f32)
    w_qkv = np.asarray(p["w_qkv"], f32)[:, perm]
    b_qkv = np.asarray(p["b_qkv"], f32)[perm]
    w1 = np.asarray(p["w1"], f32); b1 = np.asarray(p["b1"], f32)

    # (x̂*g + b) @ W + bq  ==  x̂ @ (g[:,None]*W) + (b @ W + bq); scale the q slab.
    qscale = np.ones((3 * DIM,), f32); qscale[:DIM] = SCALE
    w_qkv_f = (ln1_g[:, None] * w_qkv) * qscale[None, :]
    b_qkv_f = (ln1_b @ w_qkv + b_qkv) * qscale
    w1_f = ln2_g[:, None] * w1
    b1_f = ln2_b @ w1 + b1

    return {
        "w_qkv": jnp.asarray(w_qkv_f, jnp.bfloat16),
        "b_qkv": jnp.asarray(b_qkv_f[None, :], jnp.float32),
        "w_proj": jnp.asarray(np.asarray(p["w_proj"], f32)
                              .reshape(NUM_HEADS, DIM_HEAD, DIM), jnp.bfloat16),
        "b_proj": jnp.asarray(np.asarray(p["b_proj"], f32)[None, :], jnp.float32),
        "w1": jnp.asarray(w1_f, jnp.bfloat16),
        "b1": jnp.asarray(b1_f[None, :], jnp.float32),
        "w2": jnp.asarray(np.asarray(p["w2"], f32), jnp.bfloat16),
        "b2": jnp.asarray(np.asarray(p["b2"], f32)[None, :], jnp.float32),
    }


def _pick_tokens_per_block(total_tokens, band, target=512):
    """Tokens per grid step: an EVEN multiple of `band` (so the paired 128-lane
    rows split into whole bands), dividing total_tokens, <= target, keeping the
    grid length >= 2 (and even when possible) so both v7x TensorCores get work."""
    n_bands = total_tokens // band
    cands = [k for k in range(2, n_bands + 1, 2) if n_bands % k == 0]
    assert cands, "need total_tokens to be an even multiple of the band size"
    for need_even_grid, need_two in ((True, True), (False, True), (False, False)):
        ok = [k for k in cands
              if k * band <= target
              and (n_bands // k >= 2 or not need_two)
              and ((n_bands // k) % 2 == 0 or not need_even_grid)]
        if ok:
            return max(ok) * band
    return cands[0] * band


# ------------------------------- wrapper ------------------------------------
def partition_attention_2d(x, kp, rel_table_np, tokens_target=512):
    """Forward of PartitionAttention2d (block partition, auto_pad=False).

    x: (B, C, H, W) float32.  kp: prepare_params(...) output.
    """
    B, C, H, W = x.shape
    assert C == DIM and H % WIN == 0 and W % WIN == 0       # auto_pad=False
    band = WIN * W                       # tokens per row-band (W//WIN windows)
    assert band % 8 == 0
    T = B * H * W
    t_blk = _pick_tokens_per_block(T, band, tokens_target)
    # block-diagonal mask / lane-pairing alignment guards
    assert T % t_blk == 0 and t_blk % band == 0
    assert t_blk % (2 * band) == 0 and (t_blk // 2) % 8 == 0
    G = T // t_blk
    half = t_blk // 2

    bias_mask = _build_band_bias_mask(rel_table_np, W)      # (heads, band, band) bf16

    # NCHW -> token-major, then pair tokens (j, j + t_blk/2) of each block into
    # one 128-lane row so kernel loads/stores are lane-dense (C=64 -> 2 tok/row).
    x_tok = jnp.transpose(x, (0, 2, 3, 1)).reshape(T, C)
    x_pair = (x_tok.reshape(G, 2, half, C)
              .transpose(0, 2, 1, 3)
              .reshape(T // 2, 2 * C))

    bcast2 = lambda i: (0, 0)
    bcast3 = lambda i: (0, 0, 0)

    out_pair = pl.pallas_call(
        make_kernel(t_blk, band),
        out_shape=jax.ShapeDtypeStruct((T // 2, 2 * C), jnp.float32),
        grid=(G,),
        in_specs=[
            pl.BlockSpec((half, 2 * C), lambda i: (i, 0)),            # x (paired)
            pl.BlockSpec((NUM_HEADS, band, band), bcast3),            # bias/mask (bf16)
            pl.BlockSpec((DIM, 3 * DIM), bcast2),                     # w_qkv (bf16, LN1+scale folded)
            pl.BlockSpec((1, 3 * DIM), bcast2),                       # b_qkv
            pl.BlockSpec((NUM_HEADS, DIM_HEAD, DIM), bcast3),         # w_proj per-head (bf16)
            pl.BlockSpec((1, DIM), bcast2),                           # b_proj
            pl.BlockSpec((DIM, HIDDEN), bcast2),                      # w1 (bf16, LN2 folded)
            pl.BlockSpec((1, HIDDEN), bcast2),                        # b1
            pl.BlockSpec((HIDDEN, DIM), bcast2),                      # w2 (bf16)
            pl.BlockSpec((1, DIM), bcast2),                           # b2
        ],
        out_specs=pl.BlockSpec((half, 2 * C), lambda i: (i, 0)),
        compiler_params=pltpu.CompilerParams(
            dimension_semantics=("parallel",),
            vmem_limit_bytes=32 * 1024 * 1024),
    )(x_pair, bias_mask,
      kp["w_qkv"], kp["b_qkv"], kp["w_proj"], kp["b_proj"],
      kp["w1"], kp["b1"], kp["w2"], kp["b2"])

    out_tok = (out_pair.reshape(G, half, 2, C)
               .transpose(0, 2, 1, 3)
               .reshape(T, C))
    return out_tok.reshape(B, H, W, C).transpose(0, 3, 1, 2)    # back to NCHW


# -------------------------- pure-JAX reference -------------------------------
def window_partition_nchw(x, ws):
    B, C, H, W = x.shape
    x = x.reshape(B, C, H // ws, ws, W // ws, ws)
    return x.transpose(0, 2, 4, 1, 3, 5).reshape(-1, C, ws, ws)


def window_reverse_nchw(wins, ws, H, W):
    C = wins.shape[1]
    x = wins.reshape(-1, H // ws, W // ws, C, ws, ws)
    return x.transpose(0, 3, 1, 4, 2, 5).reshape(-1, C, H, W)


def ref_forward(x, p, rel_bias):
    B, C, H, W = x.shape

    def ln_nchw(t, g, b):
        m = t.mean(axis=1, keepdims=True)
        v = ((t - m) ** 2).mean(axis=1, keepdims=True)
        return (t - m) / jnp.sqrt(v + EPS) * g[None, :, None, None] + b[None, :, None, None]

    xn = ln_nchw(x, p["ln1_g"], p["ln1_b"])
    wins = window_partition_nchw(xn, WIN)                       # (nwin, C, ws, ws)
    nwin = wins.shape[0]
    flat = wins.reshape(nwin, C, N)
    qkv = jnp.einsum("oc,bcn->bon", p["w_qkv"].T, flat) + p["b_qkv"][None, :, None]
    qkv = qkv.reshape(nwin, NUM_HEADS, 3 * DIM_HEAD, N)
    q, k, v = jnp.split(qkv, 3, axis=2)                         # (nwin, H, d, N)
    attn = jnp.einsum("bhdn,bhdm->bhnm", q, k) * SCALE + rel_bias[None]
    attn = jax.nn.softmax(attn, axis=-1)
    o = jnp.einsum("bhdn,bhmn->bhdm", v, attn).reshape(nwin, DIM, N)
    o = jnp.einsum("oc,bcn->bon", p["w_proj"].T, o) + p["b_proj"][None, :, None]
    attn_img = window_reverse_nchw(o.reshape(nwin, C, WIN, WIN), WIN, H, W)

    x1 = x + attn_img
    xn2 = ln_nchw(x1, p["ln2_g"], p["ln2_b"])
    h = jnp.einsum("oc,bchw->bohw", p["w1"].T, xn2) + p["b1"][None, :, None, None]
    h = 0.5 * h * (1.0 + jax.lax.erf(h * 0.7071067811865476))
    y = jnp.einsum("oc,bchw->bohw", p["w2"].T, h) + p["b2"][None, :, None, None]
    return x1 + y


# ---------------------------------- main -------------------------------------
if __name__ == "__main__":
    key = jax.random.PRNGKey(0)
    ks = jax.random.split(key, 16)

    # deterministic synthetic parameters (1x1-conv weights stored as (in, out))
    params = {
        "ln1_g": 1.0 + 0.1 * jax.random.normal(ks[0], (DIM,), jnp.float32),
        "ln1_b": 0.1 * jax.random.normal(ks[1], (DIM,), jnp.float32),
        "w_qkv": 0.05 * jax.random.normal(ks[2], (DIM, 3 * DIM), jnp.float32),
        "b_qkv": 0.05 * jax.random.normal(ks[3], (3 * DIM,), jnp.float32),
        "w_proj": 0.05 * jax.random.normal(ks[4], (DIM, DIM), jnp.float32),
        "b_proj": 0.05 * jax.random.normal(ks[5], (DIM,), jnp.float32),
        "ln2_g": 1.0 + 0.1 * jax.random.normal(ks[6], (DIM,), jnp.float32),
        "ln2_b": 0.1 * jax.random.normal(ks[7], (DIM,), jnp.float32),
        "w1": 0.05 * jax.random.normal(ks[8], (DIM, HIDDEN), jnp.float32),
        "b1": 0.05 * jax.random.normal(ks[9], (HIDDEN,), jnp.float32),
        "w2": 0.05 * jax.random.normal(ks[10], (HIDDEN, DIM), jnp.float32),
        "b2": 0.05 * jax.random.normal(ks[11], (DIM,), jnp.float32),
    }

    # relative position bias table (RelPosBias)
    num_rel = (2 * WIN - 1) * (2 * WIN - 1)
    rel_table = 0.02 * jax.random.normal(ks[12], (num_rel, NUM_HEADS), jnp.float32)
    rel_idx = jnp.asarray(_gen_relative_position_index(WIN))            # (N, N)
    rel_bias = jnp.transpose(
        rel_table[rel_idx.reshape(-1)].reshape(N, N, NUM_HEADS), (2, 0, 1))

    # input: NCHW (B=2, C=64, H=W=16), window 4 -> 32 windows of 16 tokens
    x = jax.random.normal(ks[13], (2, DIM, 16, 16), jnp.float32)

    kparams = prepare_params(params)
    out = jax.block_until_ready(
        partition_attention_2d(x, kparams, np.asarray(rel_table)))
    ref = jax.block_until_ready(ref_forward(x, params, rel_bias))

    # bf16 MXU operands -> compare at bf16-appropriate tolerance
    np.testing.assert_allclose(np.asarray(out), np.asarray(ref), rtol=5e-3, atol=5e-3)
    print("KERNEL_OK")
</pallas_src>

<mosaic_0001>
module attributes {stable_mosaic.version = 11 : i64} {
  func.func @kernel(%arg0: i32, %arg1: memref<128x128xf32, #tpu.memory_space<vmem>>, %arg2: memref<2x64x64xbf16, #tpu.memory_space<vmem>>, %arg3: memref<64x192xbf16, #tpu.memory_space<vmem>>, %arg4: memref<1x192xf32, #tpu.memory_space<vmem>>, %arg5: memref<2x32x64xbf16, #tpu.memory_space<vmem>>, %arg6: memref<1x64xf32, #tpu.memory_space<vmem>>, %arg7: memref<64x256xbf16, #tpu.memory_space<vmem>>, %arg8: memref<1x256xf32, #tpu.memory_space<vmem>>, %arg9: memref<256x64xbf16, #tpu.memory_space<vmem>>, %arg10: memref<1x64xf32, #tpu.memory_space<vmem>>, %arg11: memref<128x128xf32, #tpu.memory_space<vmem>>) attributes {dimension_semantics = [#tpu.dimension_semantics<parallel>], iteration_bounds = array<i64: 2>, scalar_prefetch = 0 : i64, scratch_operands = 0 : i64, tpu.core_type = #tpu.core_type<tc>, window_params = [{transform_indices = @transform_0, window_bounds = array<i64: 128, 128>}, {pipeline_mode = #tpu.pipeline_mode<synchronous>, transform_indices = @transform_1, window_bounds = array<i64: 2, 64, 64>}, {pipeline_mode = #tpu.pipeline_mode<synchronous>, transform_indices = @transform_2, window_bounds = array<i64: 64, 192>}, {pipeline_mode = #tpu.pipeline_mode<synchronous>, transform_indices = @transform_3, window_bounds = array<i64: 1, 192>}, {pipeline_mode = #tpu.pipeline_mode<synchronous>, transform_indices = @transform_4, window_bounds = array<i64: 2, 32, 64>}, {pipeline_mode = #tpu.pipeline_mode<synchronous>, transform_indices = @transform_5, window_bounds = array<i64: 1, 64>}, {pipeline_mode = #tpu.pipeline_mode<synchronous>, transform_indices = @transform_6, window_bounds = array<i64: 64, 256>}, {pipeline_mode = #tpu.pipeline_mode<synchronous>, transform_indices = @transform_7, window_bounds = array<i64: 1, 256>}, {pipeline_mode = #tpu.pipeline_mode<synchronous>, transform_indices = @transform_8, window_bounds = array<i64: 256, 64>}, {pipeline_mode = #tpu.pipeline_mode<synchronous>, transform_indices = @transform_9, window_bounds = array<i64: 1, 64>}, {transform_indices = @transform_10, window_bounds = array<i64: 128, 128>}]} {
    %c0 = arith.constant 0 : index
    %c0_0 = arith.constant 0 : index
    %0 = vector.load %arg1[%c0, %c0_0] : memref<128x128xf32, #tpu.memory_space<vmem>>, vector<128x128xf32>
    %1 = vector.extract_strided_slice %0 {offsets = [0, 0], sizes = [128, 64], strides = [1, 1]} : vector<128x128xf32> to vector<128x64xf32>
    %2 = vector.extract_strided_slice %0 {offsets = [0, 64], sizes = [128, 64], strides = [1, 1]} : vector<128x128xf32> to vector<128x64xf32>
    %3 = tpu.concatenate %1, %2 in 0 : vector<128x64xf32>, vector<128x64xf32> -> vector<256x64xf32>
    %cst = arith.constant dense<0.000000e+00> : vector<256xf32>
    %4 = vector.multi_reduction <add>, %3, %cst [1] : vector<256x64xf32> to vector<256xf32>
    %5 = vector.shape_cast %4 : vector<256xf32> to vector<256x1xf32>
    %cst_1 = arith.constant 6.400000e+01 : f32
    %6 = vector.broadcast %cst_1 : f32 to vector<256x1xf32>
    %7 = arith.divf %5, %6 : vector<256x1xf32>
    %8 = vector.broadcast %7 : vector<256x1xf32> to vector<256x64xf32>
    %9 = arith.subf %3, %8 : vector<256x64xf32>
    %10 = arith.mulf %9, %9 : vector<256x64xf32>
    %cst_2 = arith.constant dense<0.000000e+00> : vector<256xf32>
    %11 = vector.multi_reduction <add>, %10, %cst_2 [1] : vector<256x64xf32> to vector<256xf32>
    %12 = vector.shape_cast %11 : vector<256xf32> to vector<256x1xf32>
    %cst_3 = arith.constant 6.400000e+01 : f32
    %13 = vector.broadcast %cst_3 : f32 to vector<256x1xf32>
    %14 = arith.divf %12, %13 : vector<256x1xf32>
    %15 = vector.broadcast %7 : vector<256x1xf32> to vector<256x64xf32>
    %16 = arith.subf %3, %15 : vector<256x64xf32>
    %cst_4 = arith.constant 9.99999997E-7 : f32
    %17 = vector.broadcast %cst_4 : f32 to vector<256x1xf32>
    %18 = arith.addf %14, %17 : vector<256x1xf32>
    %19 = math.rsqrt %18 : vector<256x1xf32>
    %20 = vector.broadcast %19 : vector<256x1xf32> to vector<256x64xf32>
    %21 = arith.mulf %16, %20 : vector<256x64xf32>
    %22 = arith.truncf %21 : vector<256x64xf32> to vector<256x64xbf16>
    %c0_5 = arith.constant 0 : index
    %c0_6 = arith.constant 0 : index
    %23 = vector.load %arg3[%c0_5, %c0_6] : memref<64x192xbf16, #tpu.memory_space<vmem>>, vector<64x192xbf16>
    %cst_7 = arith.constant dense<0.000000e+00> : vector<256x192xf32>
    %24 = tpu.matmul %22, %23, %cst_7 {dimension_numbers = #tpu.dot_dimension_numbers<[1], [0], [0], [1], [0, 0, 1, 1], [], []>} : vector<256x64xbf16>, vector<64x192xbf16>, vector<256x192xf32> -> vector<256x192xf32>
    %c0_8 = arith.constant 0 : index
    %c0_9 = arith.constant 0 : index
    %25 = vector.load %arg4[%c0_8, %c0_9] : memref<1x192xf32, #tpu.memory_space<vmem>>, vector<1x192xf32>
    %26 = vector.broadcast %25 : vector<1x192xf32> to vector<256x192xf32>
    %27 = arith.addf %24, %26 : vector<256x192xf32>
    %28 = arith.truncf %27 : vector<256x192xf32> to vector<256x192xbf16>
    %29 = vector.shape_cast %28 : vector<256x192xbf16> to vector<4x64x192xbf16>
    %c0_10 = arith.constant 0 : index
    %c0_11 = arith.constant 0 : index
    %30 = vector.load %arg6[%c0_10, %c0_11] : memref<1x64xf32, #tpu.memory_space<vmem>>, vector<1x64xf32>
    %31 = vector.extract_strided_slice %29 {offsets = [0, 0, 0], sizes = [4, 64, 32], strides = [1, 1, 1]} : vector<4x64x192xbf16> to vector<4x64x32xbf16>
    %32 = vector.extract_strided_slice %29 {offsets = [0, 0, 64], sizes = [4, 64, 32], strides = [1, 1, 1]} : vector<4x64x192xbf16> to vector<4x64x32xbf16>
    %33 = vector.extract_strided_slice %29 {offsets = [0, 0, 128], sizes = [4, 64, 32], strides = [1, 1, 1]} : vector<4x64x192xbf16> to vector<4x64x32xbf16>
    "tpu.trace_start"() <{level = 10 : i32, message = "bqd,bkd->bqk"}> : () -> ()
    %cst_12 = arith.constant dense<0.000000e+00> : vector<4x64x64xf32>
    %34 = tpu.matmul %31, %32, %cst_12 {dimension_numbers = #tpu.dot_dimension_numbers<[2], [2], [1], [1], [0, 0, 0, 1, 1, 1], [0], [0]>} : vector<4x64x32xbf16>, vector<4x64x32xbf16>, vector<4x64x64xf32> -> vector<4x64x64xf32>
    "tpu.trace_stop"() : () -> ()
    %c0_13 = arith.constant 0 : index
    %c0_14 = arith.constant 0 : index
    %c0_15 = arith.constant 0 : index
    %35 = vector.load %arg2[%c0_13, %c0_14, %c0_15] : memref<2x64x64xbf16, #tpu.memory_space<vmem>>, vector<1x64x64xbf16>
    %36 = vector.shape_cast %35 : vector<1x64x64xbf16> to vector<64x64xbf16>
    %37 = arith.extf %36 : vector<64x64xbf16> to vector<64x64xf32>
    %38 = vector.shape_cast %37 : vector<64x64xf32> to vector<1x64x64xf32>
    %39 = vector.broadcast %38 : vector<1x64x64xf32> to vector<4x64x64xf32>
    %40 = arith.addf %34, %39 : vector<4x64x64xf32>
    %41 = math.exp %40 : vector<4x64x64xf32>
    %cst_16 = arith.constant dense<0.000000e+00> : vector<4x64xf32>
    %42 = vector.multi_reduction <add>, %41, %cst_16 [2] : vector<4x64x64xf32> to vector<4x64xf32>
    %43 = vector.shape_cast %42 : vector<4x64xf32> to vector<4x64x1xf32>
    %44 = tpu.reciprocal %43 {approx = true} : vector<4x64x1xf32> -> vector<4x64x1xf32>
    %45 = vector.broadcast %44 : vector<4x64x1xf32> to vector<4x64x64xf32>
    %46 = arith.mulf %41, %45 : vector<4x64x64xf32>
    %47 = arith.truncf %46 : vector<4x64x64xf32> to vector<4x64x64xbf16>
    "tpu.trace_start"() <{level = 10 : i32, message = "bqk,bkd->bqd"}> : () -> ()
    %cst_17 = arith.constant dense<0.000000e+00> : vector<4x64x32xf32>
    %48 = tpu.matmul %47, %33, %cst_17 {dimension_numbers = #tpu.dot_dimension_numbers<[2], [1], [1], [2], [0, 0, 0, 1, 1, 2], [0], [0]>} : vector<4x64x64xbf16>, vector<4x64x32xbf16>, vector<4x64x32xf32> -> vector<4x64x32xf32>
    "tpu.trace_stop"() : () -> ()
    %49 = vector.shape_cast %48 : vector<4x64x32xf32> to vector<256x32xf32>
    %50 = arith.truncf %49 : vector<256x32xf32> to vector<256x32xbf16>
    %c0_18 = arith.constant 0 : index
    %c0_19 = arith.constant 0 : index
    %c0_20 = arith.constant 0 : index
    %51 = vector.load %arg5[%c0_18, %c0_19, %c0_20] : memref<2x32x64xbf16, #tpu.memory_space<vmem>>, vector<1x32x64xbf16>
    %52 = vector.shape_cast %51 : vector<1x32x64xbf16> to vector<32x64xbf16>
    %cst_21 = arith.constant dense<0.000000e+00> : vector<256x64xf32>
    %53 = tpu.matmul %50, %52, %cst_21 {dimension_numbers = #tpu.dot_dimension_numbers<[1], [0], [0], [1], [0, 0, 1, 1], [], []>} : vector<256x32xbf16>, vector<32x64xbf16>, vector<256x64xf32> -> vector<256x64xf32>
    %54 = vector.broadcast %30 : vector<1x64xf32> to vector<256x64xf32>
    %55 = arith.addf %54, %53 : vector<256x64xf32>
    %56 = vector.extract_strided_slice %29 {offsets = [0, 0, 32], sizes = [4, 64, 32], strides = [1, 1, 1]} : vector<4x64x192xbf16> to vector<4x64x32xbf16>
    %57 = vector.extract_strided_slice %29 {offsets = [0, 0, 96], sizes = [4, 64, 32], strides = [1, 1, 1]} : vector<4x64x192xbf16> to vector<4x64x32xbf16>
    %58 = vector.extract_strided_slice %29 {offsets = [0, 0, 160], sizes = [4, 64, 32], strides = [1, 1, 1]} : vector<4x64x192xbf16> to vector<4x64x32xbf16>
    "tpu.trace_start"() <{level = 10 : i32, message = "bqd,bkd->bqk"}> : () -> ()
    %cst_22 = arith.constant dense<0.000000e+00> : vector<4x64x64xf32>
    %59 = tpu.matmul %56, %57, %cst_22 {dimension_numbers = #tpu.dot_dimension_numbers<[2], [2], [1], [1], [0, 0, 0, 1, 1, 1], [0], [0]>} : vector<4x64x32xbf16>, vector<4x64x32xbf16>, vector<4x64x64xf32> -> vector<4x64x64xf32>
    "tpu.trace_stop"() : () -> ()
    %c1 = arith.constant 1 : index
    %c0_23 = arith.constant 0 : index
    %c0_24 = arith.constant 0 : index
    %60 = vector.load %arg2[%c1, %c0_23, %c0_24] : memref<2x64x64xbf16, #tpu.memory_space<vmem>>, vector<1x64x64xbf16>
    %61 = vector.shape_cast %60 : vector<1x64x64xbf16> to vector<64x64xbf16>
    %62 = arith.extf %61 : vector<64x64xbf16> to vector<64x64xf32>
    %63 = vector.shape_cast %62 : vector<64x64xf32> to vector<1x64x64xf32>
    %64 = vector.broadcast %63 : vector<1x64x64xf32> to vector<4x64x64xf32>
    %65 = arith.addf %59, %64 : vector<4x64x64xf32>
    %66 = math.exp %65 : vector<4x64x64xf32>
    %cst_25 = arith.constant dense<0.000000e+00> : vector<4x64xf32>
    %67 = vector.multi_reduction <add>, %66, %cst_25 [2] : vector<4x64x64xf32> to vector<4x64xf32>
    %68 = vector.shape_cast %67 : vector<4x64xf32> to vector<4x64x1xf32>
    %69 = tpu.reciprocal %68 {approx = true} : vector<4x64x1xf32> -> vector<4x64x1xf32>
    %70 = vector.broadcast %69 : vector<4x64x1xf32> to vector<4x64x64xf32>
    %71 = arith.mulf %66, %70 : vector<4x64x64xf32>
    %72 = arith.truncf %71 : vector<4x64x64xf32> to vector<4x64x64xbf16>
    "tpu.trace_start"() <{level = 10 : i32, message = "bqk,bkd->bqd"}> : () -> ()
    %cst_26 = arith.constant dense<0.000000e+00> : vector<4x64x32xf32>
    %73 = tpu.matmul %72, %58, %cst_26 {dimension_numbers = #tpu.dot_dimension_numbers<[2], [1], [1], [2], [0, 0, 0, 1, 1, 2], [0], [0]>} : vector<4x64x64xbf16>, vector<4x64x32xbf16>, vector<4x64x32xf32> -> vector<4x64x32xf32>
    "tpu.trace_stop"() : () -> ()
    %74 = vector.shape_cast %73 : vector<4x64x32xf32> to vector<256x32xf32>
    %75 = arith.truncf %74 : vector<256x32xf32> to vector<256x32xbf16>
    %c1_27 = arith.constant 1 : index
    %c0_28 = arith.constant 0 : index
    %c0_29 = arith.constant 0 : index
    %76 = vector.load %arg5[%c1_27, %c0_28, %c0_29] : memref<2x32x64xbf16, #tpu.memory_space<vmem>>, vector<1x32x64xbf16>
    %77 = vector.shape_cast %76 : vector<1x32x64xbf16> to vector<32x64xbf16>
    %cst_30 = arith.constant dense<0.000000e+00> : vector<256x64xf32>
    %78 = tpu.matmul %75, %77, %cst_30 {dimension_numbers = #tpu.dot_dimension_numbers<[1], [0], [0], [1], [0, 0, 1, 1], [], []>} : vector<256x32xbf16>, vector<32x64xbf16>, vector<256x64xf32> -> vector<256x64xf32>
    %79 = arith.addf %55, %78 : vector<256x64xf32>
    %80 = arith.addf %3, %79 : vector<256x64xf32>
    %cst_31 = arith.constant dense<0.000000e+00> : vector<256xf32>
    %81 = vector.multi_reduction <add>, %80, %cst_31 [1] : vector<256x64xf32> to vector<256xf32>
    %82 = vector.shape_cast %81 : vector<256xf32> to vector<256x1xf32>
    %cst_32 = arith.constant 6.400000e+01 : f32
    %83 = vector.broadcast %cst_32 : f32 to vector<256x1xf32>
    %84 = arith.divf %82, %83 : vector<256x1xf32>
    %85 = vector.broadcast %84 : vector<256x1xf32> to vector<256x64xf32>
    %86 = arith.subf %80, %85 : vector<256x64xf32>
    %87 = arith.mulf %86, %86 : vector<256x64xf32>
    %cst_33 = arith.constant dense<0.000000e+00> : vector<256xf32>
    %88 = vector.multi_reduction <add>, %87, %cst_33 [1] : vector<256x64xf32> to vector<256xf32>
    %89 = vector.shape_cast %88 : vector<256xf32> to vector<256x1xf32>
    %cst_34 = arith.constant 6.400000e+01 : f32
    %90 = vector.broadcast %cst_34 : f32 to vector<256x1xf32>
    %91 = arith.divf %89, %90 : vector<256x1xf32>
    %92 = vector.broadcast %84 : vector<256x1xf32> to vector<256x64xf32>
    %93 = arith.subf %80, %92 : vector<256x64xf32>
    %cst_35 = arith.constant 9.99999997E-7 : f32
    %94 = vector.broadcast %cst_35 : f32 to vector<256x1xf32>
    %95 = arith.addf %91, %94 : vector<256x1xf32>
    %96 = math.rsqrt %95 : vector<256x1xf32>
    %97 = vector.broadcast %96 : vector<256x1xf32> to vector<256x64xf32>
    %98 = arith.mulf %93, %97 : vector<256x64xf32>
    %99 = arith.truncf %98 : vector<256x64xf32> to vector<256x64xbf16>
    %c0_36 = arith.constant 0 : index
    %c0_37 = arith.constant 0 : index
    %100 = vector.load %arg7[%c0_36, %c0_37] : memref<64x256xbf16, #tpu.memory_space<vmem>>, vector<64x256xbf16>
    %cst_38 = arith.constant dense<0.000000e+00> : vector<256x256xf32>
    %101 = tpu.matmul %99, %100, %cst_38 {dimension_numbers = #tpu.dot_dimension_numbers<[1], [0], [0], [1], [0, 0, 1, 1], [], []>} : vector<256x64xbf16>, vector<64x256xbf16>, vector<256x256xf32> -> vector<256x256xf32>
    %c0_39 = arith.constant 0 : index
    %c0_40 = arith.constant 0 : index
    %102 = vector.load %arg8[%c0_39, %c0_40] : memref<1x256xf32, #tpu.memory_space<vmem>>, vector<1x256xf32>
    %103 = vector.broadcast %102 : vector<1x256xf32> to vector<256x256xf32>
    %104 = arith.addf %101, %103 : vector<256x256xf32>
    %cst_41 = arith.constant 5.000000e-01 : f32
    %105 = vector.broadcast %cst_41 : f32 to vector<256x256xf32>
    %106 = arith.mulf %105, %104 : vector<256x256xf32>
    %cst_42 = arith.constant 0.707106769 : f32
    %107 = vector.broadcast %cst_42 : f32 to vector<256x256xf32>
    %108 = arith.mulf %104, %107 : vector<256x256xf32>
    %109 = math.erf %108 : vector<256x256xf32>
    %cst_43 = arith.constant 1.000000e+00 : f32
    %110 = vector.broadcast %cst_43 : f32 to vector<256x256xf32>
    %111 = arith.addf %110, %109 : vector<256x256xf32>
    %112 = arith.mulf %106, %111 : vector<256x256xf32>
    %113 = arith.truncf %112 : vector<256x256xf32> to vector<256x256xbf16>
    %c0_44 = arith.constant 0 : index
    %c0_45 = arith.constant 0 : index
    %114 = vector.load %arg9[%c0_44, %c0_45] : memref<256x64xbf16, #tpu.memory_space<vmem>>, vector<256x64xbf16>
    %cst_46 = arith.constant dense<0.000000e+00> : vector<256x64xf32>
    %115 = tpu.matmul %113, %114, %cst_46 {dimension_numbers = #tpu.dot_dimension_numbers<[1], [0], [0], [1], [0, 0, 1, 1], [], []>} : vector<256x256xbf16>, vector<256x64xbf16>, vector<256x64xf32> -> vector<256x64xf32>
    %c0_47 = arith.constant 0 : index
    %c0_48 = arith.constant 0 : index
    %116 = vector.load %arg10[%c0_47, %c0_48] : memref<1x64xf32, #tpu.memory_space<vmem>>, vector<1x64xf32>
    %117 = vector.broadcast %116 : vector<1x64xf32> to vector<256x64xf32>
    %118 = arith.addf %115, %117 : vector<256x64xf32>
    %119 = arith.addf %80, %118 : vector<256x64xf32>
    %120 = vector.extract_strided_slice %119 {offsets = [0, 0], sizes = [128, 64], strides = [1, 1]} : vector<256x64xf32> to vector<128x64xf32>
    %c0_49 = arith.constant 0 : index
    %c0_50 = arith.constant 0 : index
    %121 = vector.load %arg11[%c0_49, %c0_50] : memref<128x128xf32, #tpu.memory_space<vmem>>, vector<128x64xf32>
    tpu.vector_store %arg11[%c0_49, %c0_50], %120 {strides = array<i32>} : memref<128x128xf32, #tpu.memory_space<vmem>>, vector<128x64xf32>,
    %122 = vector.extract_strided_slice %119 {offsets = [128, 0], sizes = [128, 64], strides = [1, 1]} : vector<256x64xf32> to vector<128x64xf32>
    %c0_51 = arith.constant 0 : index
    %c64 = arith.constant 64 : index
    %123 = vector.load %arg11[%c0_51, %c64] : memref<128x128xf32, #tpu.memory_space<vmem>>, vector<128x64xf32>
    tpu.vector_store %arg11[%c0_51, %c64], %122 {strides = array<i32>} : memref<128x128xf32, #tpu.memory_space<vmem>>, vector<128x64xf32>,
    return
  }
  func.func @transform_0(%arg0: i32) -> (i32, i32) {
    %c0_i32 = arith.constant 0 : i32
    %c0_i32_0 = arith.constant 0 : i32
    return %arg0, %c0_i32 : i32, i32
  }
  func.func @transform_1(%arg0: i32) -> (i32, i32, i32) {
    %c0_i32 = arith.constant 0 : i32
    %c0_i32_0 = arith.constant 0 : i32
    %c0_i32_1 = arith.constant 0 : i32
    %c0_i32_2 = arith.constant 0 : i32
    return %c0_i32, %c0_i32_0, %c0_i32_1 : i32, i32, i32
  }
  func.func @transform_2(%arg0: i32) -> (i32, i32) {
    %c0_i32 = arith.constant 0 : i32
    %c0_i32_0 = arith.constant 0 : i32
    %c0_i32_1 = arith.constant 0 : i32
    return %c0_i32, %c0_i32_0 : i32, i32
  }
  func.func @transform_3(%arg0: i32) -> (i32, i32) {
    %c0_i32 = arith.constant 0 : i32
    %c0_i32_0 = arith.constant 0 : i32
    %c0_i32_1 = arith.constant 0 : i32
    return %c0_i32, %c0_i32_0 : i32, i32
  }
  func.func @transform_4(%arg0: i32) -> (i32, i32, i32) {
    %c0_i32 = arith.constant 0 : i32
    %c0_i32_0 = arith.constant 0 : i32
    %c0_i32_1 = arith.constant 0 : i32
    %c0_i32_2 = arith.constant 0 : i32
    return %c0_i32, %c0_i32_0, %c0_i32_1 : i32, i32, i32
  }
  func.func @transform_5(%arg0: i32) -> (i32, i32) {
    %c0_i32 = arith.constant 0 : i32
    %c0_i32_0 = arith.constant 0 : i32
    %c0_i32_1 = arith.constant 0 : i32
    return %c0_i32, %c0_i32_0 : i32, i32
  }
  func.func @transform_6(%arg0: i32) -> (i32, i32) {
    %c0_i32 = arith.constant 0 : i32
    %c0_i32_0 = arith.constant 0 : i32
    %c0_i32_1 = arith.constant 0 : i32
    return %c0_i32, %c0_i32_0 : i32, i32
  }
  func.func @transform_7(%arg0: i32) -> (i32, i32) {
    %c0_i32 = arith.constant 0 : i32
    %c0_i32_0 = arith.constant 0 : i32
    %c0_i32_1 = arith.constant 0 : i32
    return %c0_i32, %c0_i32_0 : i32, i32
  }
  func.func @transform_8(%arg0: i32) -> (i32, i32) {
    %c0_i32 = arith.constant 0 : i32
    %c0_i32_0 = arith.constant 0 : i32
    %c0_i32_1 = arith.constant 0 : i32
    return %c0_i32, %c0_i32_0 : i32, i32
  }
  func.func @transform_9(%arg0: i32) -> (i32, i32) {
    %c0_i32 = arith.constant 0 : i32
    %c0_i32_0 = arith.constant 0 : i32
    %c0_i32_1 = arith.constant 0 : i32
    return %c0_i32, %c0_i32_0 : i32, i32
  }
  func.func @transform_10(%arg0: i32) -> (i32, i32) {
    %c0_i32 = arith.constant 0 : i32
    %c0_i32_0 = arith.constant 0 : i32
    return %arg0, %c0_i32 : i32, i32
  }
}

</mosaic_0001>

<bundles_post_ra>
// kernel: tpu_custom_call.1
= control target key start
LH: loop header
LB: loop body
LE: loop exit
PB: predicated region body
PF: predicated region fallthrough
CT: control target
= control target key end

     0   :  { %s9880_s0 = inlined_call_operand.hbm [shape: f32[256,128], index: 0, kind: input, shape index: {}]   ;;  %s9881_s1 = inlined_call_operand.vmem [shape: bf16[2,64,64], index: 1, kind: input, shape index: {}]   ;;  %s9882_s2 = inlined_call_operand.vmem [shape: bf16[64,192], index: 2, kind: input, shape index: {}]   ;;  %s9883_s3 = inlined_call_operand.vmem [shape: f32[1,192], index: 3, kind: input, shape index: {}]   ;;  %s9884_s4 = inlined_call_operand.hbm [shape: bf16[2,32,64], index: 4, kind: input, shape index: {}]   ;;  %s9885_s5 = inlined_call_operand.vmem [shape: f32[1,64], index: 5, kind: input, shape index: {}]   ;;  %s9886_s6 = inlined_call_operand.vmem [shape: bf16[64,256], index: 6, kind: input, shape index: {}]   ;;  %s9887_s7 = inlined_call_operand.vmem [shape: f32[1,256], index: 7, kind: input, shape index: {}]   ;;  %s9888_s8 = inlined_call_operand.vmem [shape: bf16[256,64], index: 8, kind: input, shape index: {}]   ;;  %s9889_s9 = inlined_call_operand.vmem [shape: f32[1,64], index: 9, kind: input, shape index: {}]   ;;  %s9890_s10 = inlined_call_operand.hbm [shape: f32[256,128], index: 10, kind: output, shape index: {}]  }
   0x1   :  { %9960 = sst [smem:[#allocation53_spill]] %s9884_s4 }
   0x2   :  { %15 = vsyncpa [#allocation3], 0 }
   0x3   :  { %17 = vsyncpa [#allocation3 + $0x1], 0 }
   0x4   :  { %18 = vsyncpa [#allocation6], 0 }
   0x5   :  { %19 = vsyncpa [#allocation4], 0 }
   0x6   :  { %21 = vsyncpa [#allocation4 + $0x1], 0  ;;  %s7152_s13 = smov 0   ;;  %s7154_s14 = smov 0  }
   0x7   :  { %s7156_s15 = smov 0   ;;  %s7158_s16 = smov 0  }
   0x8 LB: > { %9961 = sst [smem:[#allocation11_spill]] %s7070_s13  ;;  %s7173_s17 = sadd.s32 4294967295, %s7082_s16   ;;  %s7082_s16 = sphi %s7158_s16, %s10124_s16   ;;  %s7078_s15 = sphi %s7156_s15, %s10127_s15   ;;  %s7074_s14 = sphi %s7154_s14, %s10126_s14   ;;  %s7070_s13 = sphi %s7152_s13, %s10125_s13  }
   0x9   : > { %s5454_s18 = sadd.s32 4294967294, %s7082_s16   ;;  %p47_p0 = scmp.ne.s32.totalorder %s7074_s14, %s7070_s13 }
   0xa   : > { %p9895_p1 = scmp.eq.s32.totalorder %s7173_s17, 0  ;;  %p266_p3 = scmp.eq.s32.totalorder %s5454_s18, 1 }
   0xb   : > { %p5455_p5 = scmp.ge.s32.totalorder %s7082_s16, 1  ;;  %p273_p7 = scmp.lt.s32.totalorder %s7082_s16, 3 }
   0xc   : > { %p7182_p4 = por %p9895_p1, %p47_p0  ;;  %p7187_p6 = por %p266_p3, %p47_p0 }
   0xd   : > { %p7192_p8 = pnand %p5455_p5, %p273_p7  ;;  %s7084_s22 = smov [#allocation5]  }
   0xe   : > { %s9962_s19 = scalar_select %p7182_p4, 1, 0 }
   0xf   : > { %s9963_s20 = scalar_select %p7187_p6, 1, 0 }
  0x10   : > { %s9965_s21 = scalar_select %p7192_p8, 1, 0 }
  0x11   : > { %9964 = sst [smem:[#allocation12_spill]] %s9963_s20  ;;  %s294_s23 = sshll.u32 %s7084_s22, 4  ;;  %s295_s23 = int_to_ptr.vmem [resolvable:$true] %s294_s23 }
  0x12   : > { %p6329_p9 = pneg %p7192_p8  ;;  %s7206_s25 = sadd.s32 1, %s7082_s16  }
  0x13   : > { %9967 = sst [smem:[#allocation13_spill]] %s7206_s25  ;;  %s34_s26 = sadd.s32 1, %s7078_s15 }
  0x14   : > { %p7201_p11 = pnand %p6329_p9, %p9895_p1  ;;  %s31_s27 = ssub.s32 %s7082_s16, %s7206_s25 }
  0x15   : > { %s6971_s28 = scalar_lea.vmem %s295_s23, 512  ;;  %p6979_p5 = scmp.lt.s32.totalorder %s295_s23, %s295_s23 }
  0x16   : > { %p6962_p12 = pneg %p7201_p11  ;;  %p6972_p13 = scmp.ne.s32.totalorder %s295_s23, %s6971_s28 }
  0x17   : > { %p6980_p7 = scmp.lt.s32.totalorder %s6971_s28, %s6971_s28 }
  0x18   : > { %p6974_p0 = pnand %p6972_p13, %p6962_p12 }
  0x19   : > { %p6981_p10 = por %p6980_p7, %p6979_p5 }
  0x1a   : > { %p6975_p3 = pneg %p6974_p0 }
  0x1c   : > { %p6982_p2 = pnand %p6981_p10, %p6975_p3 }
  0x1e   : > { %6985 = shalt.err (!%p6982_p2)
}
  0x1f   : > { %s7085_s29 = smov 64   ;;  %s7086_s30 = smov 4  }
  0x20   : > { %s9968_s4 = sld [smem:[#allocation53_spill]]  ;;  %p32_p9 = scmp.eq.s32.totalorder %s31_s27, 0 }
  0x21   : > { %p41_p12 = scmp.ne.s32.totalorder %s7078_s15, %s7074_s14  ;;  %p42_p10 = scmp.eq.s32.totalorder %s7082_s16, 0 }
  0x22   : > { %p6342_p2 = scmp.lt.s32.totalorder %s7082_s16, 2  ;;  %p9969_p0 = scmp.eq.s32.totalorder %s7173_s17, 1 }
  0x23   : > { %s7223_s18 = scalar_select %p32_p9, %s7078_s15, %s34_s26  }
  0x24   : > { %p43_p13 = por %p42_p10, %p41_p12  ;;  %p7227_p3 = por %p9969_p0, %p41_p12 }
  0x25   : > { %s323_s28 = sand.u32 1, %s7078_s15   ;;  %s5644_s25 = sshll.u32 %s7082_s16, 11 }
  0x26   : > { %6332 = dma.hbm_to_vmem [thread:$0]  (!%p7201_p11), %s9968_s4, 512, %s295_s23, [#allocation6], %s7085_s29, %s7085_s29, %s7086_s30  }
  0x27   : > { %s9970_s22 = scalar_select %p7227_p3, 1, 0 }
  0x28   : > { %s5458_s20 = sshll.u32 %s323_s28, 7  ;;  %s7236_s11 = scalar_lea.hbm %s9880_s0, %s5644_s25 }
  0x29   : > { %s327_s23 = scalar_lea.vmem [#allocation2], %s5458_s20  ;;  %p7238_p11 = pnand %p6342_p2, %p43_p13 }
  0x2a   : > { %s334_s26 = sshll.u32 %s327_s23, 4  ;;  %s7244_s29 = scalar_lea.sflag [#allocation3], %s323_s28  ;;  %s7242_s26 = int_to_ptr.vmem [resolvable:$true] %s334_s26 }
  0x2b   : > { %s6986_s30 = scalar_lea.hbm %s7236_s11, 2048  ;;  %p6988_p7 = pneg %p7238_p11 }
  0x2c   : > { %p6987_p5 = scmp.ne.s32.totalorder %s7236_s11, %s6986_s30  ;;  %s6991_s20 = scalar_lea.hbm %s9880_s0, 4096 }
  0x2d   : > { %p6992_p10 = scmp.lt.s32.totalorder %s7236_s11, %s9880_s0  ;;  %p6993_p2 = scmp.lt.s32.totalorder %s6991_s20, %s6986_s30 }
  0x2e   : > { %p6989_p9 = pnand %p6988_p7, %p6987_p5 }
  0x2f   : > { %p6994_p13 = por %p6993_p2, %p6992_p10 }
  0x30   : > { %p6990_p12 = pneg %p6989_p9 }
  0x32   : > { %p6995_p0 = pnand %p6994_p13, %p6990_p12 }
  0x34   : > { %6998 = shalt.err (!%p6995_p0)
}
  0x35   : > { %s6999_s28 = scalar_lea.vmem %s7242_s26, 2048  ;;  %s7087_s23 = smov [#allocation2]  }
  0x36   : > { %p7000_p1 = scmp.ne.s32.totalorder %s7242_s26, %s6999_s28  ;;  %s7004_s4 = sshll.u32 %s7087_s23, 4  ;;  %s7005_s4 = int_to_ptr.vmem [resolvable:$false] %s7004_s4 }
  0x37   : > { %s7006_s13 = scalar_lea.vmem %s7005_s4, 4096  ;;  %p7007_p9 = scmp.lt.s32.totalorder %s7242_s26, %s7005_s4 }
  0x38   : > { %p7002_p6 = pnand %p7000_p1, %p6988_p7  ;;  %p7008_p3 = scmp.lt.s32.totalorder %s7006_s13, %s6999_s28 }
  0x3a   : > { %p7003_p5 = pneg %p7002_p6  ;;  %p7009_p4 = por %p7008_p3, %p7007_p9 }
  0x3c   : > { %p7010_p8 = pnand %p7009_p4, %p7003_p5 }
  0x3e   : > { %7013 = shalt.err (!%p7010_p8)
}
  0x3f   : > { %s7088_s30 = smov 128   ;;  %s7089_s25 = smov 8  }
  0x40   : > { %6336 = dma.hbm_to_vmem [thread:$0]  (!%p7238_p11), %s7236_s11, 2048, %s7242_s26, %s7244_s29, %s7088_s30, %s7088_s30, %s7089_s25  }
  0x41   : > { %p9972_p1 = scmp.ne.s32.totalorder %s9965_s21, 0 }
  0x43   : > { %346 = sbr.rel (%p9972_p1) target bundleno = 3400 (0xd48), region = 60 }
  0x48   : > { %s7268_s20 = sand.u32 1, %s7074_s14   ;;  %p9973_p4 = scmp.ne.s32.totalorder %s9962_s19, 0 }
  0x49   : > { %s5462_s4 = sshll.u32 %s7268_s20, 7  ;;  %s349_s12 = scalar_lea.sflag [#allocation3], %s7268_s20 }
  0x4a   : > { %s7274_s24 = scalar_lea.vmem [#allocation2], %s5462_s4 }
  0x4b   : > { %7057 = dma.done.wait (%p9973_p4), %s349_s12, 2048  }
  0x4c   : > { %7059 = vsyncadd (%p9973_p4), %s349_s12, 4294965248  ;;  %p9974_p6 = scmp.eq.s32.totalorder %s7173_s17, 0 }
  0x4e   : > { %7061 = dma.done.wait (%p9974_p6), [#allocation6], 512   ;;  %p9975_p8 = pmov %p9974_p6 }
  0x4f   : > { %vm476_vm0 = vcmask 523264   ;;  %v7285_v0 = vld [vmem:[%s7274_s24] sm:$0xff]  ;;  %v7288_v1 = vld [vmem:[%s7274_s24 + $0x8] sm:$0xff]  ;;  %s7090_s21 = smov 64   ;;  %v7297_v4 = vld [vmem:[%s7274_s24 + $0x10] sm:$0xff]  ;;  %vm1272_vm1 = vcmask 261120  }
  0x50   : > { %7063 = vsyncadd (%p9975_p8), [#allocation6], 4294966784  ;;  %428 = vrot.lane.b32.xlu1 %v7285_v0, %s7090_s21  ;;  %v477_v2 = vsel %vm476_vm0, %v7285_v0, 0.0  ;;  %v480_v3 = vsel %vm476_vm0, %v7288_v1, 0.0  ;;  %v483_v5 = vsel %vm476_vm0, %v7297_v4, 0.0  ;;  %v7306_v6 = vld [vmem:[%s7274_s24 + $0x18] sm:$0xff] }
  0x51   : > { %478 = vadd.xlane.f32.xlu0 %v477_v2  ;;  %v486_v7 = vsel %vm476_vm0, %v7306_v6, 0.0  ;;  %v7313_v8 = vld [vmem:[%s7274_s24 + $0x28] sm:$0xff]  ;;  %v7318_v10 = vld [vmem:[%s7274_s24 + $0x20] sm:$0xff]  ;;  %v7325_v12 = vld [vmem:[%s7274_s24 + $0x30] sm:$0xff]  ;;  %s7092_s29 = smov 32   ;;  %s7093_s28 = smov 96  }
  0x52   : > { %v492_v9 = vsel %vm476_vm0, %v7313_v8, 0.0  ;;  %v489_v11 = vsel %vm476_vm0, %v7318_v10, 0.0  ;;  %v495_v13 = vsel %vm476_vm0, %v7325_v12, 0.0  ;;  %v7334_v14 = vld [vmem:[%s7274_s24 + $0x38] sm:$0xff]  ;;  %v7341_v16 = vld [vmem:[%s7274_s24 + $0x48] sm:$0xff]  ;;  %v7346_v18 = vld [vmem:[%s7274_s24 + $0x40] sm:$0xff] }
  0x53   : > { %v498_v15 = vsel %vm476_vm0, %v7334_v14, 0.0  ;;  %v504_v17 = vsel %vm476_vm0, %v7341_v16, 0.0  ;;  %v501_v19 = vsel %vm476_vm0, %v7346_v18, 0.0  ;;  %v7353_v20 = vld [vmem:[%s7274_s24 + $0x50] sm:$0xff]  ;;  %v7362_v22 = vld [vmem:[%s7274_s24 + $0x58] sm:$0xff]  ;;  %v7369_v24 = vld [vmem:[%s7274_s24 + $0x68] sm:$0xff] }
  0x54   : > { %430 = vrot.lane.b32.xlu1 %v7288_v1, %s7090_s21  ;;  %v507_v21 = vsel %vm476_vm0, %v7353_v20, 0.0  ;;  %v510_v23 = vsel %vm476_vm0, %v7362_v22, 0.0  ;;  %v516_v25 = vsel %vm476_vm0, %v7369_v24, 0.0  ;;  %v7374_v26 = vld [vmem:[%s7274_s24 + $0x60] sm:$0xff]  ;;  %v7381_v28 = vld [vmem:[%s7274_s24 + $0x70] sm:$0xff]  ;;  %v7392_v33 = vld [vmem:[%s7274_s24 + $0x78] sm:$0xff] }
  0x55   : > { %481 = vadd.xlane.f32.xlu0 %v480_v3  ;;  %v513_v27 = vsel %vm476_vm0, %v7374_v26, 0.0  ;;  %v519_v29 = vsel %vm476_vm0, %v7381_v28, 0.0  ;;  %v522_v36 = vsel %vm476_vm0, %v7392_v33, 0.0  ;;  %s9679_s30 = scalar_lea.vmem [#allocation7], %s5462_s4  ;;  %vm5340_vm2 = vcmask 1048064   ;;  %s5645_s4 = sshll.u32 %s7173_s17, 11 }
  0x56   : > { %s9833_s19 = scalar_lea.hbm %s9890_s10, %s5645_s4  ;;  %s5358_s11 = scalar_lea.sflag [#allocation4], %s7268_s20 }
  0x57   : > { %p10119_p11 = scmp.ne.s32.totalorder %s9970_s22, 0  ;;  %s7094_s17 = smov [#allocation7]  }
  0x58   : > { %s7018_s27 = sshll.u32 %s7094_s17, 4  ;;  %s7019_s27 = int_to_ptr.vmem [resolvable:$false] %s7018_s27 }
  0x59   : > { %484 = vadd.xlane.f32.xlu0 %v483_v5 }
  0x6f   : > { %432 = vrot.lane.b32.xlu0 %v7297_v4, %s7090_s21 }
  0x73   : > { %434 = vrot.lane.b32.xlu0 %v7306_v6, %s7090_s21 }
  0x78   : > { %487 = vadd.xlane.f32.xlu1 %v486_v7 }
  0x7c   : > { %493 = vadd.xlane.f32.xlu1 %v492_v9 }
  0x8d   : > { %436 = vrot.lane.b32.xlu1 %v7318_v10, %s7090_s21 }
  0x91   : > { %438 = vrot.lane.b32.xlu1 %v7313_v8, %s7090_s21 }
  0x92   : > { %490 = vadd.xlane.f32.xlu0 %v489_v11 }
  0x96   : > { %496 = vadd.xlane.f32.xlu0 %v495_v13 }
  0xac   : > { %440 = vrot.lane.b32.xlu0 %v7325_v12, %s7090_s21 }
  0xb0   : > { %442 = vrot.lane.b32.xlu0 %v7334_v14, %s7090_s21 }
  0xb5   : > { %499 = vadd.xlane.f32.xlu1 %v498_v15 }
  0xb9   : > { %505 = vadd.xlane.f32.xlu1 %v504_v17 }
  0xc2   : > { %v7387_v31 = vpop.permute.xlu1 %428 }
  0xc3   : > { %9976 = vst [vmem:[#allocation14_spill] sm:$0xff] %v7387_v31  ;;  %v525_v63 = vsel %vm476_vm0, %v7387_v31, 0.0 }
  0xc6   : > { %v7396_v34 = vpop.permute.xlu1 %430 }
  0xc7   : > { %9977 = vst [vmem:[#allocation15_spill] sm:$0xff] %v7396_v34  ;;  %v528_v40 = vsel %vm476_vm0, %v7396_v34, 0.0 }
  0xca   : > { %444 = vrot.lane.b32.xlu1 %v7346_v18, %s7090_s21 }
  0xce   : > { %446 = vrot.lane.b32.xlu1 %v7341_v16, %s7090_s21 }
  0xcf   : > { %502 = vadd.xlane.f32.xlu0 %v501_v19 }
  0xd3   : > { %508 = vadd.xlane.f32.xlu0 %v507_v21 }
  0xda   : > { %v479_v30 = vpop.xlane.xlu0 %478 }
  0xdb   : > { %v574_v39 = vmul.f32 0.015625, %v479_v30 }
  0xdd   : > { %v7405_v42 = vsub.f32 %v7285_v0, %v574_v39 }
  0xde   : > { %v482_v32 = vpop.xlane.xlu0 %481 }
  0xdf   : > { %v575_v43 = vmul.f32 0.015625, %v482_v32  ;;  %v638_v48 = vmul.f32 %v7405_v42, %v7405_v42  ;;  %v6391_v32 = vld [vmem:[%s9882_s2 + $0x24] ss:$8 sps:$4 sm:$0xff]  }
  0xe1   : > { %v7412_v46 = vsub.f32 %v7288_v1, %v575_v43  ;;  %v670_v51 = vsel %vm476_vm0, %v638_v48, 0.0  ;;  %v6394_v43 = vld [vmem:[%s9882_s2 + $0x14] ss:$8 sps:$4 sm:$0xff]   ;;  %v6396_v48 = vld [vmem:[%s9882_s2 + $0x10] ss:$8 sps:$4 sm:$0xff]  }
  0xe2   : > { %v485_v35 = vpop.xlane.xlu0 %484 }
  0xe3   : > { %v639_v52 = vmul.f32 %v7412_v46, %v7412_v46  ;;  %v576_v53 = vmul.f32 0.015625, %v485_v35 }
  0xe5   : > { %v673_v56 = vsel %vm476_vm0, %v639_v52, 0.0  ;;  %v7427_v58 = vsub.f32 %v7297_v4, %v576_v53 }
  0xe6   : > { %v7400_v38 = vpop.permute.xlu0 %432 }
  0xe7   : > { %9978 = vst [vmem:[#allocation16_spill] sm:$0xff] %v7400_v38  ;;  %v531_v44 = vsel %vm476_vm0, %v7400_v38, 0.0  ;;  %v640_v0 = vmul.f32 %v7427_v58, %v7427_v58 }
  0xe9   : > { %448 = vrot.lane.b32.xlu0 %v7353_v20, %s7090_s21  ;;  %v676_v7 = vsel %vm476_vm0, %v640_v0, 0.0 }
  0xea   : > { %v7409_v45 = vpop.permute.xlu0 %434 }
  0xeb   : > { %9979 = vst [vmem:[#allocation17_spill] sm:$0xff] %v7409_v45  ;;  %v534_v47 = vsel %vm476_vm0, %v7409_v45, 0.0 }
  0xed   : > { %450 = vrot.lane.b32.xlu0 %v7362_v22, %s7090_s21 }
  0xf2   : > { %511 = vadd.xlane.f32.xlu1 %v510_v23 }
  0xf6   : > { %517 = vadd.xlane.f32.xlu1 %v516_v25 }
 0x101   : > { %v488_v37 = vpop.xlane.xlu1 %487 }
 0x102   : > { %v577_v55 = vmul.f32 0.015625, %v488_v37  ;;  %v6393_v37 = vld [vmem:[%s9882_s2 + $0x20] ss:$8 sps:$4 sm:$0xff]  }
 0x104   : > { %v7430_v60 = vsub.f32 %v7306_v6, %v577_v55  ;;  %v6397_v55 = vld [vmem:[%s9882_s2 + $0x4] ss:$8 sps:$4 sm:$0xff]  }
 0x105   : > { %v494_v41 = vpop.xlane.xlu1 %493 }
 0x106   : > { %v579_v2 = vmul.f32 0.015625, %v494_v41  ;;  %v641_v4 = vmul.f32 %v7430_v60, %v7430_v60 }
 0x107   : > { %452 = vrot.lane.b32.xlu1 %v7374_v26, %s7090_s21 }
 0x108   : > { %v7449_v9 = vsub.f32 %v7313_v8, %v579_v2  ;;  %v679_v11 = vsel %vm476_vm0, %v641_v4, 0.0  ;;  %v6388_v8 = vld [vmem:[%s9882_s2 + $0x34] ss:$8 sps:$4 sm:$0xff]  }
 0x109   : > { %v7418_v49 = vpop.permute.xlu1 %436  ;;  %1026 = vmatprep.subr.bf16.mxu0 %v6388_v8 }
 0x10a   : > { %9980 = vst [vmem:[#allocation18_spill] sm:$0xff] %v7418_v49  ;;  %v537_v61 = vsel %vm476_vm0, %v7418_v49, 0.0  ;;  %v643_v25 = vmul.f32 %v7449_v9, %v7449_v9 }
 0x10b   : > { %454 = vrot.lane.b32.xlu1 %v7369_v24, %s7090_s21 }
 0x10c   : > { %514 = vadd.xlane.f32.xlu0 %v513_v27  ;;  %v6390_v27 = vld [vmem:[%s9882_s2 + $0x30] ss:$8 sps:$4 sm:$0xff]  }
 0x10d   : > { %v7423_v54 = vpop.permute.xlu1 %438  ;;  %1027 = vmatpush1.bf16.msra.mxu0 %v6390_v27 }
 0x10e   : > { %9981 = vst [vmem:[#allocation19_spill] sm:$0xff] %v7423_v54  ;;  %v540_v3 = vsel %vm476_vm0, %v7423_v54, 0.0  ;;  %1028 = vmatprep.subr.bf16.mxu0 %v6391_v32 }
 0x110   : > { %520 = vadd.xlane.f32.xlu0 %v519_v29 }
 0x111   : > { %1029 = vmatpush1.bf16.msra.mxu0 %v6393_v37 }
 0x112   : > { %1030 = vmatprep.subr.bf16.mxu0 %v6394_v43 }
 0x115   : > { %1031 = vmatpush1.bf16.msra.mxu0 %v6396_v48 }
 0x116   : > { %1032 = vmatprep.subr.bf16.mxu0 %v6397_v55 }
 0x11b   : > { %v491_v50 = vpop.xlane.xlu0 %490 }
 0x11c   : > { %v578_v62 = vmul.f32 0.015625, %v491_v50 }
 0x11e   : > { %v7445_v6 = vsub.f32 %v7318_v10, %v578_v62 }
 0x11f   : > { %v497_v57 = vpop.xlane.xlu0 %496 }
 0x120   : > { %v580_v15 = vmul.f32 0.015625, %v497_v57  ;;  %v642_v19 = vmul.f32 %v7445_v6, %v7445_v6  ;;  %v6399_v57 = vld [vmem:[%s9882_s2] ss:$8 sps:$4 sm:$0xff]  }
 0x121   : > { %1033 = vmatpush1.bf16.msra.mxu0 %v6399_v57 }
 0x122   : > { %v7471_v29 = vsub.f32 %v7325_v12, %v580_v15  ;;  %v682_v30 = vsel %vm476_vm0, %v642_v19, 0.0 }
 0x123   : > { %v7438_v1 = vpop.permute.xlu0 %440 }
 0x124   : > { %9982 = vst [vmem:[#allocation20_spill] sm:$0xff] %v7438_v1  ;;  %v543_v17 = vsel %vm476_vm0, %v7438_v1, 0.0  ;;  %v644_v41 = vmul.f32 %v7471_v29, %v7471_v29 }
 0x126   : > { %456 = vrot.lane.b32.xlu0 %v7381_v28, %s7090_s21 }
 0x127   : > { %v7452_v13 = vpop.permute.xlu0 %442 }
 0x128   : > { %9983 = vst [vmem:[#allocation21_spill] sm:$0xff] %v7452_v13  ;;  %v546_v23 = vsel %vm476_vm0, %v7452_v13, 0.0 }
 0x12a   : > { %458 = vrot.lane.b32.xlu0 %v7392_v33, %s7090_s21 }
 0x12f   : > { %523 = vadd.xlane.f32.xlu1 %v522_v36  ;;  %v685_v36 = vsel %vm476_vm0, %v643_v25, 0.0 }
 0x133   : > { %529 = vadd.xlane.f32.xlu1 %v528_v40 }
 0x137   : > { %532 = vadd.xlane.f32.xlu1 %v531_v44 }
 0x13b   : > { %535 = vadd.xlane.f32.xlu1 %v534_v47 }
 0x13e   : > { %v500_v59 = vpop.xlane.xlu1 %499 }
 0x13f   : > { %671 = vadd.xlane.f32.xlu1 %v670_v51  ;;  %v581_v21 = vmul.f32 0.015625, %v500_v59  ;;  %v688_v51 = vsel %vm476_vm0, %v644_v41, 0.0 }
 0x141   : > { %v7478_v35 = vsub.f32 %v7334_v14, %v581_v21 }
 0x142   : > { %v506_v5 = vpop.xlane.xlu1 %505 }
 0x143   : > { %674 = vadd.xlane.f32.xlu1 %v673_v56  ;;  %v645_v47 = vmul.f32 %v7478_v35, %v7478_v35  ;;  %v583_v52 = vmul.f32 0.015625, %v506_v5 }
 0x145   : > { %v691_v56 = vsel %vm476_vm0, %v645_v47, 0.0 }
 0x146   : > { %v7458_v10 = vpop.permute.xlu1 %444 }
 0x147   : > { %538 = vadd.xlane.f32.xlu1 %v537_v61  ;;  %9984 = vst [vmem:[#allocation22_spill] sm:$0xff] %v7458_v10  ;;  %v549_v40 = vsel %vm476_vm0, %v7458_v10, 0.0  ;;  %v7514_v61 = vsub.f32 %v7341_v16, %v583_v52 }
 0x149   : > { %526 = vadd.xlane.f32.xlu0 %v525_v63  ;;  %v9900_v63 = vmov 0   ;;  %v647_v16 = vmul.f32 %v7514_v61, %v7514_v61 }
 0x14a   : > { %v7484_v39 = vpop.permute.xlu1 %446  ;;  %1050 = vmatprep.mubr.bf16.mxu0 %v9900_v63 }
 0x14b   : > { %541 = vadd.xlane.f32.xlu1 %v540_v3  ;;  %9985 = vst [vmem:[#allocation23_spill] sm:$0xff] %v7484_v39  ;;  %v552_v44 = vsel %vm476_vm0, %v7484_v39, 0.0  ;;  %v697_v4 = vsel %vm476_vm0, %v647_v16, 0.0 }
 0x14d   : > { %677 = vadd.xlane.f32.xlu0 %v676_v7 }
 0x14f   : > { %680 = vadd.xlane.f32.xlu1 %v679_v11 }
 0x151   : > { %544 = vadd.xlane.f32.xlu0 %v543_v17 }
 0x153   : > { %547 = vadd.xlane.f32.xlu1 %v546_v23 }
 0x155   : > { %683 = vadd.xlane.f32.xlu0 %v682_v30 }
 0x157   : > { %686 = vadd.xlane.f32.xlu1 %v685_v36 }
 0x158   : > { %v503_v12 = vpop.xlane.xlu0 %502 }
 0x159   : > { %v582_v14 = vmul.f32 0.015625, %v503_v12  ;;  %550 = vadd.xlane.f32.xlu0 %v549_v40 }
 0x15b   : > { %553 = vadd.xlane.f32.xlu1 %v552_v44  ;;  %v7502_v53 = vsub.f32 %v7346_v18, %v582_v14 }
 0x15c   : > { %v509_v50 = vpop.xlane.xlu0 %508 }
 0x15d   : > { %689 = vadd.xlane.f32.xlu0 %v688_v51  ;;  %v646_v62 = vmul.f32 %v7502_v53, %v7502_v53  ;;  %v584_v7 = vmul.f32 0.015625, %v509_v50 }
 0x15f   : > { %692 = vadd.xlane.f32.xlu1 %v691_v56  ;;  %v694_v2 = vsel %vm476_vm0, %v646_v62, 0.0  ;;  %v7530_v17 = vsub.f32 %v7353_v20, %v584_v7 }
 0x160   : > { %v7511_v59 = vpop.permute.xlu0 %448 }
 0x161   : > { %9986 = vst [vmem:[#allocation24_spill] sm:$0xff] %v7511_v59  ;;  %v555_v18 = vsel %vm476_vm0, %v7511_v59, 0.0  ;;  %v648_v23 = vmul.f32 %v7530_v17, %v7530_v17 }
 0x162   : > { %556 = vadd.xlane.f32.xlu0 %v555_v18 }
 0x163   : > { %v700_v20 = vsel %vm476_vm0, %v648_v23, 0.0 }
 0x164   : > { %v7521_v0 = vpop.permute.xlu0 %450 }
 0x165   : > { %9987 = vst [vmem:[#allocation25_spill] sm:$0xff] %v7521_v0  ;;  %v558_v3 = vsel %vm476_vm0, %v7521_v0, 0.0 }
 0x166   : > { %695 = vadd.xlane.f32.xlu0 %v694_v2  ;;  %559 = vadd.xlane.f32.xlu1 %v558_v3 }
 0x16a   : > { %698 = vadd.xlane.f32.xlu1 %v697_v4 }
 0x17b   : > { %v512_v5 = vpop.xlane.xlu1 %511 }
 0x17c   : > { %v585_v11 = vmul.f32 0.015625, %v512_v5 }
 0x17e   : > { %v7533_v19 = vsub.f32 %v7362_v22, %v585_v11 }
 0x17f   : > { %v518_v15 = vpop.xlane.xlu1 %517 }
 0x180   : > { %v649_v25 = vmul.f32 %v7533_v19, %v7533_v19  ;;  %v587_v12 = vmul.f32 0.015625, %v518_v15 }
 0x182   : > { %v703_v30 = vsel %vm476_vm0, %v649_v25, 0.0  ;;  %v7555_v43 = vsub.f32 %v7369_v24, %v587_v12 }
 0x183   : > { %v7535_v8 = vpop.permute.xlu1 %452 }
 0x184   : > { %9988 = vst [vmem:[#allocation26_spill] sm:$0xff] %v7535_v8  ;;  %v561_v21 = vsel %vm476_vm0, %v7535_v8, 0.0 }
 0x185   : > { %562 = vadd.xlane.f32.xlu0 %v561_v21 }
 0x187   : > { %v7543_v27 = vpop.permute.xlu1 %454 }
 0x188   : > { %9989 = vst [vmem:[#allocation27_spill] sm:$0xff] %v7543_v27  ;;  %v564_v22 = vsel %vm476_vm0, %v7543_v27, 0.0 }
 0x189   : > { %701 = vadd.xlane.f32.xlu0 %v700_v20  ;;  %565 = vadd.xlane.f32.xlu1 %v564_v22 }
 0x18d   : > { %704 = vadd.xlane.f32.xlu1 %v703_v30 }
 0x195   : > { %v515_v32 = vpop.xlane.xlu0 %514 }
 0x196   : > { %v586_v36 = vmul.f32 0.015625, %v515_v32 }
 0x198   : > { %v7550_v40 = vsub.f32 %v7374_v26, %v586_v36 }
 0x199   : > { %v521_v37 = vpop.xlane.xlu0 %520 }
 0x19a   : > { %v588_v41 = vmul.f32 0.015625, %v521_v37  ;;  %v650_v48 = vmul.f32 %v7550_v40, %v7550_v40 }
 0x19c   : > { %v7558_v44 = vsub.f32 %v7381_v28, %v588_v41  ;;  %v706_v26 = vsel %vm476_vm0, %v650_v48, 0.0  ;;  %v651_v28 = vmul.f32 %v7555_v43, %v7555_v43 }
 0x19d   : > { %v7552_v14 = vpop.permute.xlu0 %456 }
 0x19e   : > { %9990 = vst [vmem:[#allocation28_spill] sm:$0xff] %v7552_v14  ;;  %v567_v47 = vsel %vm476_vm0, %v7552_v14, 0.0  ;;  %v652_v24 = vmul.f32 %v7558_v44, %v7558_v44  ;;  %v709_v55 = vsel %vm476_vm0, %v651_v28, 0.0 }
 0x19f   : > { %568 = vadd.xlane.f32.xlu0 %v567_v47 }
 0x1a0   : > { %v712_v52 = vsel %vm476_vm0, %v652_v24, 0.0 }
 0x1a1   : > { %v7564_v50 = vpop.permute.xlu0 %458 }
 0x1a2   : > { %9991 = vst [vmem:[#allocation29_spill] sm:$0xff] %v7564_v50  ;;  %v570_v51 = vsel %vm476_vm0, %v7564_v50, 0.0 }
 0x1a3   : > { %707 = vadd.xlane.f32.xlu0 %v706_v26  ;;  %571 = vadd.xlane.f32.xlu1 %v570_v51 }
 0x1a7   : > { %713 = vadd.xlane.f32.xlu0 %v712_v52  ;;  %710 = vadd.xlane.f32.xlu1 %v709_v55 }
 0x1b8   : > { %v524_v56 = vpop.xlane.xlu1 %523 }
 0x1b9   : > { %v589_v57 = vmul.f32 0.015625, %v524_v56 }
 0x1bb   : > { %v7576_v18 = vsub.f32 %v7392_v33, %v589_v57 }
 0x1bc   : > { %v530_v62 = vpop.xlane.xlu1 %529 }
 0x1bd   : > { %v591_v2 = vmul.f32 0.015625, %v530_v62  ;;  %v653_v3 = vmul.f32 %v7576_v18, %v7576_v18 }
 0x1bf   : > { %v7581_v16 = vsub.f32 %v7396_v34, %v591_v2  ;;  %v715_v4 = vsel %vm476_vm0, %v653_v3, 0.0 }
 0x1c0   : > { %v533_v5 = vpop.xlane.xlu1 %532  ;;  %716 = vadd.xlane.f32.xlu1 %v715_v4 }
 0x1c1   : > { %v655_v7 = vmul.f32 %v7581_v16, %v7581_v16  ;;  %v592_v12 = vmul.f32 0.015625, %v533_v5 }
 0x1c3   : > { %v721_v11 = vsel %vm476_vm0, %v655_v7, 0.0  ;;  %v7594_v26 = vsub.f32 %v7400_v38, %v592_v12 }
 0x1c4   : > { %v536_v15 = vpop.xlane.xlu1 %535  ;;  %722 = vadd.xlane.f32.xlu1 %v721_v11 }
 0x1c5   : > { %v593_v33 = vmul.f32 0.015625, %v536_v15  ;;  %v656_v4 = vmul.f32 %v7594_v26, %v7594_v26 }
 0x1c7   : > { %v7588_v21 = vsub.f32 %v7409_v45, %v593_v33  ;;  %v724_v12 = vsel %vm476_vm0, %v656_v4, 0.0 }
 0x1c8   : > { %v672_v23 = vpop.xlane.xlu1 %671 }
 0x1c9   : > { %v766_v25 = vmul.f32 0.015625, %v672_v23  ;;  %v657_v20 = vmul.f32 %v7588_v21, %v7588_v21 }
 0x1cb   : > { %v798_v22 = vadd.f32 1e-06, %v766_v25  ;;  %v727_v30 = vsel %vm476_vm0, %v657_v20, 0.0 }
 0x1cc   : > { %v675_v32 = vpop.xlane.xlu1 %674  ;;  %728 = vadd.xlane.f32.xlu1 %v727_v30 }
 0x1cd   : > { %v767_v36 = vmul.f32 0.015625, %v675_v32  ;;  %6432 = vrsqrt.f32 %v798_v22 }
 0x1cf   : > { %v799_v37 = vadd.f32 1e-06, %v767_v36 }
 0x1d0   : > { %v539_v41 = vpop.xlane.xlu1 %538 }
 0x1d1   : > { %6434 = vrsqrt.f32 %v799_v37  ;;  %v594_v51 = vmul.f32 0.015625, %v539_v41 }
 0x1d2   : > { %v527_v47 = vpop.xlane.xlu0 %526 }
 0x1d3   : > { %v590_v48 = vmul.f32 0.015625, %v527_v47  ;;  %v7605_v2 = vsub.f32 %v7418_v49, %v594_v51 }
 0x1d4   : > { %v542_v24 = vpop.xlane.xlu1 %541 }
 0x1d5   : > { %v7597_v28 = vsub.f32 %v7387_v31, %v590_v48  ;;  %v595_v52 = vmul.f32 0.015625, %v542_v24  ;;  %v658_v32 = vmul.f32 %v7605_v2, %v7605_v2 }
 0x1d6   : > { %v678_v55 = vpop.xlane.xlu0 %677 }
 0x1d7   : > { %v7600_v56 = vsub.f32 %v7423_v54, %v595_v52  ;;  %v768_v57 = vmul.f32 0.015625, %v678_v55  ;;  %v654_v62 = vmul.f32 %v7597_v28, %v7597_v28 }
 0x1d8   : > { %v681_v3 = vpop.xlane.xlu1 %680 }
 0x1d9   : > { %v800_v5 = vadd.f32 1e-06, %v768_v57  ;;  %v769_v7 = vmul.f32 0.015625, %v681_v3  ;;  %v718_v11 = vsel %vm476_vm0, %v654_v62, 0.0  ;;  %v659_v15 = vmul.f32 %v7600_v56, %v7600_v56 }
 0x1da   : > { %719 = vadd.xlane.f32.xlu0 %v718_v11  ;;  %v545_v33 = vpop.xlane.xlu0 %544  ;;  %v6433_v22 = vpop.eup %6432  ;;  %v730_v57 = vsel %vm476_vm0, %v658_v32, 0.0 }
 0x1db   : > { %6436 = vrsqrt.f32 %v800_v5  ;;  %v801_v23 = vadd.f32 1e-06, %v769_v7  ;;  %v596_v25 = vmul.f32 0.015625, %v545_v33  ;;  %v733_v20 = vsel %vm476_vm0, %v659_v15, 0.0 }
 0x1dc   : > { %v548_v30 = vpop.xlane.xlu1 %547  ;;  %734 = vadd.xlane.f32.xlu1 %v733_v20  ;;  %v862_v24 = vmul.f32 %v6433_v22, %v7405_v42 }
 0x1dd   : > { %6438 = vrsqrt.f32 %v801_v23  ;;  %v7616_v36 = vsub.f32 %v7438_v1, %v596_v25  ;;  %v597_v37 = vmul.f32 0.015625, %v548_v30 }
 0x1de   : > { %v6435_v41 = vpop.eup %6434  ;;  %725 = vadd.xlane.f32.xlu0 %v724_v12  ;;  %v684_v47 = vpop.xlane.xlu0 %683 }
 0x1df   : > { %v7620_v48 = vsub.f32 %v7452_v13, %v597_v37  ;;  %v770_v51 = vmul.f32 0.015625, %v684_v47  ;;  %v863_v52 = vmul.f32 %v6435_v41, %v7412_v46  ;;  %v660_v62 = vmul.f32 %v7616_v36, %v7616_v36 }
 0x1e0   : > { %v687_v55 = vpop.xlane.xlu1 %686 }
 0x1e1   : > { %v802_v3 = vadd.f32 1e-06, %v770_v51  ;;  %v771_v5 = vmul.f32 0.015625, %v687_v55  ;;  %v894_v4 = vpack.c.bf16 %v863_v52, %v862_v24  ;;  %v661_v7 = vmul.f32 %v7620_v48, %v7620_v48 }
 0x1e2   : > { %731 = vadd.xlane.f32.xlu0 %v730_v57  ;;  %v551_v11 = vpop.xlane.xlu0 %550  ;;  %v736_v20 = vsel %vm476_vm0, %v660_v62, 0.0 }
 0x1e3   : > { %6440 = vrsqrt.f32 %v802_v3  ;;  %v803_v15 = vadd.f32 1e-06, %v771_v5  ;;  %v598_v33 = vmul.f32 0.015625, %v551_v11  ;;  %5473 = vmatmul.mubr.msk.bf16.vlgmr.msra.gmra.mxu0 %vm476_vm0, %v894_v4  ;;  %v739_v42 = vsel %vm476_vm0, %v661_v7, 0.0 }
 0x1e4   : > { %v554_v46 = vpop.xlane.xlu1 %553  ;;  %740 = vadd.xlane.f32.xlu1 %v739_v42  ;;  %1060 = vmatprep.mubr.bf16.mxu0 %v9900_v63 }
 0x1e5   : > { %6442 = vrsqrt.f32 %v803_v15  ;;  %v7633_v23 = vsub.f32 %v7458_v10, %v598_v33  ;;  %v599_v25 = vmul.f32 0.015625, %v554_v46 }
 0x1e6   : > { %737 = vadd.xlane.f32.xlu0 %v736_v20  ;;  %v690_v22 = vpop.xlane.xlu0 %689 }
 0x1e7   : > { %v7637_v30 = vsub.f32 %v7484_v39, %v599_v25  ;;  %v772_v32 = vmul.f32 0.015625, %v690_v22  ;;  %v662_v37 = vmul.f32 %v7633_v23, %v7633_v23 }
 0x1e8   : > { %v6437_v12 = vpop.eup %6436  ;;  %v693_v41 = vpop.xlane.xlu1 %692 }
 0x1e9   : > { %v804_v47 = vadd.f32 1e-06, %v772_v32  ;;  %v773_v51 = vmul.f32 0.015625, %v693_v41  ;;  %v742_v24 = vsel %vm476_vm0, %v662_v37, 0.0  ;;  %v663_v52 = vmul.f32 %v7637_v30, %v7637_v30 }
 0x1ea   : > { %v6439_v55 = vpop.eup %6438  ;;  %743 = vadd.xlane.f32.xlu0 %v742_v24  ;;  %v864_v57 = vmul.f32 %v6437_v12, %v7427_v58 }
 0x1eb   : > { %6444 = vrsqrt.f32 %v804_v47  ;;  %v805_v62 = vadd.f32 1e-06, %v773_v51  ;;  %v557_v3 = vpop.xlane.xlu0 %556  ;;  %v745_v5 = vsel %vm476_vm0, %v663_v52, 0.0  ;;  %v865_v4 = vmul.f32 %v6439_v55, %v7430_v60 }
 0x1ec   : > { %v600_v7 = vmul.f32 0.015625, %v557_v3  ;;  %746 = vadd.xlane.f32.xlu1 %v745_v5 }
 0x1ed   : > { %6446 = vrsqrt.f32 %v805_v62  ;;  %v895_v11 = vpack.c.bf16 %v865_v4, %v864_v57 }
 0x1ee   : > { %v7648_v15 = vsub.f32 %v7511_v59, %v600_v7 }
 0x1ef   : > { %v560_v33 = vpop.xlane.xlu1 %559  ;;  %5474 = vmatmul.mubr.msk.bf16.gmra.mxu0 %vm476_vm0, %v895_v11  ;;  %v696_v42 = vpop.xlane.xlu0 %695 }
 0x1f0   : > { %v6441_v46 = vpop.eup %6440  ;;  %v601_v58 = vmul.f32 0.015625, %v560_v33  ;;  %v774_v25 = vmul.f32 0.015625, %v696_v42  ;;  %v664_v20 = vmul.f32 %v7648_v15, %v7648_v15  ;;  %1070 = vmatprep.mubr.bf16.mxu0 %v9900_v63 }
 0x1f1   : > { %v866_v41 = vmul.f32 %v6441_v46, %v7445_v6 }
 0x1f2   : > { %v6443_v60 = vpop.eup %6442  ;;  %v7655_v22 = vsub.f32 %v7521_v0, %v601_v58  ;;  %v806_v32 = vadd.f32 1e-06, %v774_v25  ;;  %v748_v37 = vsel %vm476_vm0, %v664_v20, 0.0 }
 0x1f3   : > { %v699_v12 = vpop.xlane.xlu1 %698  ;;  %749 = vadd.xlane.f32.xlu0 %v748_v37  ;;  %v867_v47 = vmul.f32 %v6443_v60, %v7449_v9 }
 0x1f4   : > { %v775_v51 = vmul.f32 0.015625, %v699_v12  ;;  %v665_v24 = vmul.f32 %v7655_v22, %v7655_v22  ;;  %6448 = vrsqrt.f32 %v806_v32 }
 0x1f5   : > { %v896_v52 = vpack.c.bf16 %v867_v47, %v866_v41 }
 0x1f6   : > { %v807_v55 = vadd.f32 1e-06, %v775_v51  ;;  %v751_v57 = vsel %vm476_vm0, %v665_v24, 0.0 }
 0x1f7   : > { %752 = vadd.xlane.f32.xlu1 %v751_v57  ;;  %5475 = vmatmul.mubr.msk.bf16.gmra.mxu0 %vm476_vm0, %v896_v52 }
 0x1f8   : > { %v6445_v62 = vpop.eup %6444  ;;  %6450 = vrsqrt.f32 %v807_v55  ;;  %1080 = vmatprep.mubr.bf16.mxu0 %v9900_v63 }
 0x1f9   : > { %v868_v6 = vmul.f32 %v6445_v62, %v7471_v29 }
 0x1fa   : > { %v6447_v3 = vpop.eup %6446 }
 0x1fb   : > { %v869_v9 = vmul.f32 %v6447_v3, %v7478_v35 }
 0x1fd   : > { %v897_v5 = vpack.c.bf16 %v869_v9, %v868_v6 }
 0x1ff   : > { %5476 = vmatmul.mubr.msk.bf16.gmra.mxu0 %vm476_vm0, %v897_v5 }
 0x200   : > { %1090 = vmatprep.mubr.bf16.mxu0 %v9900_v63 }
 0x201   : > { %v6449_v4 = vpop.eup %6448 }
 0x202   : > { %v870_v11 = vmul.f32 %v6449_v4, %v7502_v53 }
 0x205   : > { %v6451_v7 = vpop.eup %6450 }
 0x206   : > { %v871_v33 = vmul.f32 %v6451_v7, %v7514_v61 }
 0x208   : > { %v898_v42 = vpack.c.bf16 %v871_v33, %v870_v11 }
 0x20a   : > { %5477 = vmatmul.mubr.msk.bf16.gmra.mxu0 %vm476_vm0, %v898_v42 }
 0x20b   : > { %1100 = vmatprep.mubr.bf16.mxu0 %v9900_v63 }
 0x20e   : > { %v563_v46 = vpop.xlane.xlu0 %562 }
 0x20f   : > { %v602_v29 = vmul.f32 0.015625, %v563_v46 }
 0x211   : > { %v7674_v35 = vsub.f32 %v7535_v8, %v602_v29 }
 0x212   : > { %v566_v58 = vpop.xlane.xlu1 %565  ;;  %v702_v25 = vpop.xlane.xlu0 %701 }
 0x213   : > { %v603_v20 = vmul.f32 0.015625, %v566_v58  ;;  %v776_v60 = vmul.f32 0.015625, %v702_v25  ;;  %v666_v32 = vmul.f32 %v7674_v35, %v7674_v35 }
 0x215   : > { %v7679_v53 = vsub.f32 %v7543_v27, %v603_v20  ;;  %v808_v61 = vadd.f32 1e-06, %v776_v60  ;;  %v754_v37 = vsel %vm476_vm0, %v666_v32, 0.0 }
 0x216   : > { %v705_v12 = vpop.xlane.xlu1 %704  ;;  %755 = vadd.xlane.f32.xlu0 %v754_v37 }
 0x217   : > { %v777_v41 = vmul.f32 0.015625, %v705_v12  ;;  %v667_v47 = vmul.f32 %v7679_v53, %v7679_v53  ;;  %6452 = vrsqrt.f32 %v808_v61 }
 0x219   : > { %v809_v51 = vadd.f32 1e-06, %v777_v41  ;;  %v757_v24 = vsel %vm476_vm0, %v667_v47, 0.0 }
 0x21a   : > { %758 = vadd.xlane.f32.xlu1 %v757_v24 }
 0x21b   : > { %6454 = vrsqrt.f32 %v809_v51 }
 0x224   : > { %v6453_v52 = vpop.eup %6452 }
 0x225   : > { %v872_v3 = vmul.f32 %v6453_v52, %v7530_v17 }
 0x228   : > { %v6455_v55 = vpop.eup %6454  ;;  %v569_v57 = vpop.xlane.xlu0 %568 }
 0x229   : > { %v604_v62 = vmul.f32 0.015625, %v569_v57  ;;  %v873_v6 = vmul.f32 %v6455_v55, %v7533_v19 }
 0x22b   : > { %v7688_v9 = vsub.f32 %v7552_v14, %v604_v62  ;;  %v899_v5 = vpack.c.bf16 %v873_v6, %v872_v3 }
 0x22c   : > { %v572_v4 = vpop.xlane.xlu1 %571  ;;  %v708_v7 = vpop.xlane.xlu0 %707 }
 0x22d   : > { %v605_v11 = vmul.f32 0.015625, %v572_v4  ;;  %v778_v33 = vmul.f32 0.015625, %v708_v7  ;;  %5478 = vmatmul.mubr.msk.bf16.gmra.mxu0 %vm476_vm0, %v899_v5  ;;  %v668_v42 = vmul.f32 %v7688_v9, %v7688_v9 }
 0x22e   : > { %1110 = vmatprep.mubr.bf16.mxu0 %v9900_v63 }
 0x22f   : > { %v7695_v46 = vsub.f32 %v7564_v50, %v605_v11  ;;  %v810_v17 = vadd.f32 1e-06, %v778_v33  ;;  %v760_v19 = vsel %vm476_vm0, %v668_v42, 0.0 }
 0x230   : > { %v711_v29 = vpop.xlane.xlu1 %710  ;;  %761 = vadd.xlane.f32.xlu0 %v760_v19  ;;  %v714_v61 = vpop.xlane.xlu0 %713 }
 0x231   : > { %v779_v58 = vmul.f32 0.015625, %v711_v29  ;;  %v669_v25 = vmul.f32 %v7695_v46, %v7695_v46  ;;  %6456 = vrsqrt.f32 %v810_v17  ;;  %v780_v47 = vmul.f32 0.015625, %v714_v61 }
 0x233   : > { %v811_v20 = vadd.f32 1e-06, %v779_v58  ;;  %v763_v60 = vsel %vm476_vm0, %v669_v25, 0.0  ;;  %v812_v24 = vadd.f32 1e-06, %v780_v47 }
 0x234   : > { %764 = vadd.xlane.f32.xlu1 %v763_v60 }
 0x235   : > { %6458 = vrsqrt.f32 %v811_v20 }
 0x236   : > { %6460 = vrsqrt.f32 %v812_v24 }
 0x23e   : > { %v6457_v32 = vpop.eup %6456 }
 0x23f   : > { %v874_v12 = vmul.f32 %v6457_v32, %v7550_v40 }
 0x242   : > { %v6459_v37 = vpop.eup %6458 }
 0x243   : > { %v875_v41 = vmul.f32 %v6459_v37, %v7555_v43  ;;  %v6461_v62 = vpop.eup %6460 }
 0x244   : > { %v876_v5 = vmul.f32 %v6461_v62, %v7558_v44 }
 0x245   : > { %v900_v51 = vpack.c.bf16 %v875_v41, %v874_v12 }
 0x247   : > { %5479 = vmatmul.mubr.msk.bf16.gmra.mxu0 %vm476_vm0, %v900_v51 }
 0x248   : > { %1120 = vmatprep.mubr.bf16.mxu0 %v9900_v63 }
 0x249   : > { %v717_v52 = vpop.xlane.xlu1 %716 }
 0x24a   : > { %v781_v55 = vmul.f32 0.015625, %v717_v52 }
 0x24c   : > { %v813_v57 = vadd.f32 1e-06, %v781_v55 }
 0x24d   : > { %v723_v6 = vpop.xlane.xlu1 %722 }
 0x24e   : > { %6462 = vrsqrt.f32 %v813_v57  ;;  %v783_v43 = vmul.f32 0.015625, %v723_v6 }
 0x250   : > { %v815_v7 = vadd.f32 1e-06, %v783_v43 }
 0x252   : > { %6464 = vrsqrt.f32 %v815_v7 }
 0x255   : > { %v729_v11 = vpop.xlane.xlu1 %728 }
 0x256   : > { %v785_v17 = vmul.f32 0.015625, %v729_v11 }
 0x258   : > { %v817_v25 = vadd.f32 1e-06, %v785_v17 }
 0x25b   : > { %v6463_v3 = vpop.eup %6462 }
 0x25c   : > { %v877_v40 = vmul.f32 %v6463_v3, %v7576_v18 }
 0x25e   : > { %v901_v4 = vpack.c.bf16 %v877_v40, %v876_v5 }
 0x25f   : > { %v6465_v41 = vpop.eup %6464 }
 0x260   : > { %5480 = vmatmul.mubr.msk.bf16.gmra.mxu0 %vm476_vm0, %v901_v4  ;;  %v879_v57 = vmul.f32 %v6465_v41, %v7581_v16 }
 0x261   : > { %1130 = vmatprep.mubr.bf16.mxu0 %v9900_v63 }
 0x263   : > { %v720_v33 = vpop.xlane.xlu0 %719 }
 0x264   : > { %v782_v42 = vmul.f32 0.015625, %v720_v33 }
 0x265   : > { %v735_v20 = vpop.xlane.xlu1 %734 }
 0x266   : > { %v814_v19 = vadd.f32 1e-06, %v782_v42  ;;  %v787_v32 = vmul.f32 0.015625, %v735_v20 }
 0x267   : > { %v726_v29 = vpop.xlane.xlu0 %725 }
 0x268   : > { %6466 = vrsqrt.f32 %v814_v19  ;;  %v784_v58 = vmul.f32 0.015625, %v726_v29  ;;  %v819_v12 = vadd.f32 1e-06, %v787_v32 }
 0x26a   : > { %v816_v44 = vadd.f32 1e-06, %v784_v58 }
 0x26b   : > { %v732_v18 = vpop.xlane.xlu0 %731 }
 0x26c   : > { %6468 = vrsqrt.f32 %v816_v44  ;;  %v786_v60 = vmul.f32 0.015625, %v732_v18 }
 0x26d   : > { %6470 = vrsqrt.f32 %v817_v25  ;;  %v741_v47 = vpop.xlane.xlu1 %740 }
 0x26e   : > { %v818_v61 = vadd.f32 1e-06, %v786_v60  ;;  %v789_v52 = vmul.f32 0.015625, %v741_v47 }
 0x26f   : > { %v738_v37 = vpop.xlane.xlu0 %737 }
 0x270   : > { %6472 = vrsqrt.f32 %v818_v61  ;;  %v788_v51 = vmul.f32 0.015625, %v738_v37  ;;  %v821_v40 = vadd.f32 1e-06, %v789_v52 }
 0x271   : > { %6474 = vrsqrt.f32 %v819_v12 }
 0x272   : > { %v820_v62 = vadd.f32 1e-06, %v788_v51 }
 0x273   : > { %v744_v4 = vpop.xlane.xlu0 %743 }
 0x274   : > { %6476 = vrsqrt.f32 %v820_v62  ;;  %v790_v33 = vmul.f32 0.015625, %v744_v4  ;;  %v920_v4 = vlaneseq }
 0x275   : > { %v6467_v24 = vpop.eup %6466  ;;  %v747_v5 = vpop.xlane.xlu1 %746  ;;  %6478 = vrsqrt.f32 %v821_v40 }
 0x276   : > { %v878_v55 = vmul.f32 %v6467_v24, %v7597_v28  ;;  %v791_v7 = vmul.f32 0.015625, %v747_v5  ;;  %v822_v29 = vadd.f32 1e-06, %v790_v33 }
 0x278   : > { %v902_v3 = vpack.c.bf16 %v879_v57, %v878_v55  ;;  %v823_v16 = vadd.f32 1e-06, %v791_v7 }
 0x279   : > { %v6469_v6 = vpop.eup %6468 }
 0x27a   : > { %5481 = vmatmul.mubr.msk.bf16.gmra.mxu0 %vm476_vm0, %v902_v3  ;;  %v6471_v43 = vpop.eup %6470  ;;  %v880_v11 = vmul.f32 %v6469_v6, %v7594_v26  ;;  %6480 = vrsqrt.f32 %v823_v16 }
 0x27b   : > { %1140 = vmatprep.mubr.bf16.mxu0 %v9900_v63  ;;  %v881_v28 = vmul.f32 %v6471_v43, %v7588_v21  ;;  %6482 = vrsqrt.f32 %v822_v29 }
 0x27c   : > { %v750_v25 = vpop.xlane.xlu0 %749 }
 0x27d   : > { %v903_v42 = vpack.c.bf16 %v881_v28, %v880_v11  ;;  %v6473_v17 = vpop.eup %6472  ;;  %v792_v26 = vmul.f32 0.015625, %v750_v25  ;;  %v7735_v11 = vshrl.u32 %v920_v4, 7  ;;  %v7743_v28 = vld [vmem:[%s9883_s3] sm:$0x3] }
 0x27e   : > { %v6475_v58 = vpop.eup %6474  ;;  %v882_v20 = vmul.f32 %v6473_v17, %v7605_v2 }
 0x27f   : > { %v883_v18 = vmul.f32 %v6475_v58, %v7600_v56  ;;  %v824_v61 = vadd.f32 1e-06, %v792_v26  ;;  %9992 = vst [vmem:[#allocation30_spill] sm:$0xff] %v7735_v11  ;;  %v9899_v33 = vsub.s32 0, %v7735_v11 }
 0x280   : > { %v753_v19 = vpop.xlane.xlu1 %752 }
 0x281   : > { %v793_v44 = vmul.f32 0.015625, %v753_v19  ;;  %v904_v60 = vpack.c.bf16 %v883_v18, %v882_v20  ;;  %v6477_v32 = vpop.eup %6476  ;;  %v7750_v17 = vrot.slane %v7743_v28, %v9899_v33 }
 0x282   : > { %5482 = vmatmul.mubr.msk.bf16.gmra.mxu0 %vm476_vm0, %v903_v42  ;;  %v6479_v37 = vpop.eup %6478  ;;  %v884_v12 = vmul.f32 %v6477_v32, %v7616_v36 }
 0x283   : > { %1150 = vmatprep.mubr.bf16.mxu0 %v9900_v63  ;;  %v825_v21 = vadd.f32 1e-06, %v793_v44  ;;  %v885_v41 = vmul.f32 %v6479_v37, %v7620_v48 }
 0x285   : > { %6484 = vrsqrt.f32 %v825_v21  ;;  %v905_v2 = vpack.c.bf16 %v885_v41, %v884_v12 }
 0x286   : > { %6486 = vrsqrt.f32 %v824_v61 }
 0x287   : > { %v6481_v47 = vpop.eup %6480 }
 0x288   : > { %v6483_v56 = vpop.eup %6482  ;;  %v887_v51 = vmul.f32 %v6481_v47, %v7637_v30 }
 0x289   : > { %v886_v24 = vmul.f32 %v6483_v56, %v7633_v23 }
 0x28a   : > { %5483 = vmatmul.mubr.msk.bf16.gmra.mxu0 %vm476_vm0, %v904_v60 }
 0x28b   : > { %1160 = vmatprep.mubr.bf16.mxu0 %v9900_v63  ;;  %v906_v52 = vpack.c.bf16 %v887_v51, %v886_v24 }
 0x292   : > { %5484 = vmatmul.mubr.msk.bf16.gmra.mxu0 %vm476_vm0, %v905_v2  ;;  %v6485_v55 = vpop.eup %6484 }
 0x293   : > { %1170 = vmatprep.mubr.bf16.mxu0 %v9900_v63  ;;  %v6487_v57 = vpop.eup %6486  ;;  %v889_v36 = vmul.f32 %v6485_v55, %v7655_v22 }
 0x294   : > { %v888_v48 = vmul.f32 %v6487_v57, %v7648_v15 }
 0x296   : > { %v907_v6 = vpack.c.bf16 %v889_v36, %v888_v48 }
 0x29a   : > { %5485 = vmatmul.mubr.msk.bf16.gmra.mxu0 %vm476_vm0, %v906_v52 }
 0x29b   : > { %1180 = vmatprep.mubr.bf16.mxu0 %v9900_v63 }
 0x29f   : > { %v756_v62 = vpop.xlane.xlu0 %755 }
 0x2a0   : > { %v794_v3 = vmul.f32 0.015625, %v756_v62 }
 0x2a2   : > { %v826_v5 = vadd.f32 1e-06, %v794_v3  ;;  %5486 = vmatmul.mubr.msk.bf16.gmra.mxu0 %vm476_vm0, %v907_v6 }
 0x2a3   : > { %v1052_v30 = vpop.f32.mrf.mxu0  ;;  %v759_v40 = vpop.xlane.xlu1 %758  ;;  %1190 = vmatprep.mubr.bf16.mxu0 %v9900_v63 }
 0x2a4   : > { %v795_v23 = vmul.f32 0.015625, %v759_v40  ;;  %6488 = vrsqrt.f32 %v826_v5 }
 0x2a5   : > { %v7733_v43 = vpop.f32.mrf.mxu0 }
 0x2a6   : > { %v827_v7 = vadd.f32 1e-06, %v795_v23 }
 0x2a7   : > { %v1056_v22 = vpop.f32.mrf.mxu0 }
 0x2a8   : > { %6490 = vrsqrt.f32 %v827_v7 }
 0x2a9   : > { %v7737_v15 = vpop.f32.mrf.mxu0 }
 0x2af   : > { %v1062_v16 = vpop.f32.mrf.mxu0 }
 0x2b0   : > { %v1063_v58 = vadd.f32 %v1062_v16, %v7750_v17  ;;  %v1057_v16 = vadd.f32 %v1056_v22, %v7750_v17 }
 0x2b1   : > { %v7745_v42 = vpop.f32.mrf.mxu0  ;;  %v6489_v19 = vpop.eup %6488 }
 0x2b2   : > { %v890_v18 = vmul.f32 %v6489_v19, %v7674_v35 }
 0x2b3   : > { %v1066_v29 = vpop.f32.mrf.mxu0 }
 0x2b4   : > { %v1067_v25 = vadd.f32 %v1066_v29, %v7750_v17 }
 0x2b5   : > { %v6491_v44 = vpop.eup %6490  ;;  %v7754_v20 = vpop.f32.mrf.mxu0 }
 0x2b6   : > { %v7756_v26 = vpack.c.bf16 %v1067_v25, %v1063_v58  ;;  %v891_v21 = vmul.f32 %v6491_v44, %v7679_v53  ;;  %v1053_v44 = vadd.f32 %v1052_v30, %v7750_v17 }
 0x2b7   : > { %v1072_v60 = vpop.f32.mrf.mxu0 }
 0x2b8   : > { %v908_v32 = vpack.c.bf16 %v891_v21, %v890_v18  ;;  %v1073_v2 = vadd.f32 %v1072_v60, %v7750_v17  ;;  %v7788_v60 = vpack.c.bf16 %v1057_v16, %v1053_v44 }
 0x2b9   : > { %v7760_v61 = vpop.f32.mrf.mxu0  ;;  %v762_v37 = vpop.xlane.xlu0 %761 }
 0x2ba   : > { %v796_v12 = vmul.f32 0.015625, %v762_v37  ;;  %5487 = vmatmul.mubr.msk.bf16.gmra.mxu0 %vm476_vm0, %v908_v32 }
 0x2bb   : > { %v1076_v41 = vpop.f32.mrf.mxu0  ;;  %1200 = vmatprep.mubr.bf16.mxu0 %v9900_v63 }
 0x2bc   : > { %v828_v47 = vadd.f32 1e-06, %v796_v12  ;;  %v1077_v56 = vadd.f32 %v1076_v41, %v7750_v17 }
 0x2bd   : > { %v765_v51 = vpop.xlane.xlu1 %764  ;;  %v7766_v35 = vpop.f32.mrf.mxu0 }
 0x2be   : > { %v7768_v53 = vpack.c.bf16 %v1077_v56, %v1073_v2  ;;  %v797_v24 = vmul.f32 0.015625, %v765_v51  ;;  %6492 = vrsqrt.f32 %v828_v47 }
 0x2bf   : > { %v1082_v52 = vpop.f32.mrf.mxu0 }
 0x2c0   : > { %v829_v55 = vadd.f32 1e-06, %v797_v24  ;;  %v1083_v48 = vadd.f32 %v1082_v52, %v7750_v17 }
 0x2c1   : > { %v7770_v57 = vpop.f32.mrf.mxu0 }
 0x2c2   : > { %6494 = vrsqrt.f32 %v829_v55 }
 0x2c3   : > { %v1086_v36 = vpop.f32.mrf.mxu0 }
 0x2c4   : > { %v1087_v62 = vadd.f32 %v1086_v36, %v7750_v17 }
 0x2c5   : > { %v7776_v6 = vpop.f32.mrf.mxu0 }
 0x2c6   : > { %v7774_v3 = vpack.c.bf16 %v1087_v62, %v1083_v48 }
 0x2ca   : > { %v1092_v5 = vpop.f32.mrf.mxu0 }
 0x2cb   : > { %v6493_v23 = vpop.eup %6492  ;;  %v1093_v19 = vadd.f32 %v1092_v5, %v7750_v17 }
 0x2cc   : > { %v7778_v40 = vpop.f32.mrf.mxu0  ;;  %v892_v58 = vmul.f32 %v6493_v23, %v7688_v9 }
 0x2ce   : > { %v1096_v4 = vpop.f32.mrf.mxu0 }
 0x2cf   : > { %v6495_v7 = vpop.eup %6494  ;;  %v1097_v29 = vadd.f32 %v1096_v4, %v7750_v17 }
 0x2d0   : > { %v893_v25 = vmul.f32 %v6495_v7, %v7695_v46  ;;  %v7795_v22 = vpop.f32.mrf.mxu0 }
 0x2d1   : > { %v7786_v18 = vpack.c.bf16 %v1097_v29, %v1093_v19 }
 0x2d2   : > { %v909_v21 = vpack.c.bf16 %v893_v25, %v892_v58 }
 0x2d3   : > { %5985 = vmatprep.mubr.msk.bf16.mxu1 %vm1272_vm1, %v7786_v18 }
 0x2d4   : > { %5488 = vmatmul.mubr.msk.bf16.gmra.mxu0 %vm476_vm0, %v909_v21 }
 0x2d5   : > { %5969 = vmatprep.mubr.msk.bf16.mxu0 %vm1272_vm1, %v7788_v60 }
 0x2ed   : > { %v1102_v9 = vpop.f32.mrf.mxu0 }
 0x2ee   : > { %v1103_v23 = vadd.f32 %v1102_v9, %v7750_v17 }
 0x2ef   : > { %v7797_v32 = vpop.f32.mrf.mxu0 }
 0x2f1   : > { %v1106_v46 = vpop.f32.mrf.mxu0 }
 0x2f2   : > { %v1107_v62 = vadd.f32 %v1106_v46, %v7750_v17 }
 0x2f3   : > { %v7799_v30 = vpop.f32.mrf.mxu0 }
 0x2f4   : > { %v7829_v4 = vpack.c.bf16 %v1107_v62, %v1103_v23 }
 0x307   : > { %v1112_v37 = vpop.f32.mrf.mxu0 }
 0x308   : > { %v1113_v2 = vadd.f32 %v1112_v37, %v7750_v17 }
 0x309   : > { %v7801_v12 = vpop.f32.mrf.mxu0 }
 0x30b   : > { %v1116_v41 = vpop.f32.mrf.mxu0 }
 0x30c   : > { %v1117_v47 = vadd.f32 %v1116_v41, %v7750_v17 }
 0x30d   : > { %v7815_v51 = vpop.f32.mrf.mxu0 }
 0x30e   : > { %v7805_v56 = vpack.c.bf16 %v1117_v47, %v1113_v2 }
 0x310   : > { %1370 = vrot.lane.b32.xlu1 %v7805_v56, %s7090_s21 }
 0x314   : > { %1270 = vrot.lane.b32.xlu1 %v7774_v3, %s7090_s21 }
 0x318   : > { %1268 = vrot.lane.b32.xlu1 %v7768_v53, %s7090_s21 }
 0x31c   : > { %1266 = vrot.lane.b32.xlu1 %v7756_v26, %s7090_s21 }
 0x320   : > { %1264 = vrot.lane.b32.xlu1 %v7788_v60, %s7090_s21  ;;  %v1122_v24 = vpop.f32.mrf.mxu0 }
 0x321   : > { %v1123_v36 = vadd.f32 %v1122_v24, %v7750_v17 }
 0x322   : > { %v7819_v52 = vpop.f32.mrf.mxu0 }
 0x324   : > { %v1126_v55 = vpop.f32.mrf.mxu0 }
 0x325   : > { %v1127_v48 = vadd.f32 %v1126_v55, %v7750_v17 }
 0x326   : > { %v7835_v7 = vpop.f32.mrf.mxu0 }
 0x327   : > { %v7824_v5 = vpack.c.bf16 %v1127_v48, %v1123_v36 }
 0x329   : > { %1372 = vrot.lane.b32.xlu0 %v7824_v5, %s7090_s21 }
 0x32d   : > { %1368 = vrot.lane.b32.xlu0 %v7829_v4, %s7090_s21 }
 0x331   : > { %1366 = vrot.lane.b32.xlu0 %v7786_v18, %s7090_s21 }
 0x33a   : > { %v1132_v16 = vpop.f32.mrf.mxu0 }
 0x33c   : > { %v7837_v19 = vpop.f32.mrf.mxu0 }
 0x33e   : > { %v1136_v29 = vpop.f32.mrf.mxu0 }
 0x33f   : > { %v1137_v50 = vadd.f32 %v1136_v29, %v7750_v17 }
 0x340   : > { %v7839_v58 = vpop.f32.mrf.mxu0 }
 0x342   : > { %v1142_v25 = vpop.f32.mrf.mxu0 }
 0x343   : > { %v1143_v9 = vadd.f32 %v1142_v25, %v7750_v17 }
 0x344   : > { %v7841_v44 = vpop.f32.mrf.mxu0 }
 0x346   : > { %v1146_v21 = vpop.f32.mrf.mxu0 }
 0x347   : > { %v1147_v46 = vadd.f32 %v1146_v21, %v7750_v17 }
 0x348   : > { %v7845_v37 = vpop.f32.mrf.mxu0 }
 0x349   : > { %v7847_v41 = vpack.c.bf16 %v1147_v46, %v1143_v9 }
 0x34a   : > { %v1152_v2 = vpop.f32.mrf.mxu0 }
 0x34b   : > { %9993 = vst [vmem:[#allocation31_spill] sm:$0xff] %v7847_v41  ;;  %1469 = vrot.lane.b32.xlu1 %v7847_v41, %s7090_s21  ;;  %v1153_v33 = vadd.f32 %v1152_v2, %v7750_v17 }
 0x34c   : > { %v7851_v47 = vpop.f32.mrf.mxu0 }
 0x34e   : > { %v1156_v24 = vpop.f32.mrf.mxu0 }
 0x34f   : > { %v1157_v9 = vadd.f32 %v1156_v24, %v7750_v17 }
 0x350   : > { %v7853_v55 = vpop.f32.mrf.mxu0 }
 0x351   : > { %v7868_v14 = vpack.c.bf16 %v1157_v9, %v1153_v33 }
 0x352   : > { %v1162_v36 = vpop.f32.mrf.mxu0 }
 0x353   : > { %v1163_v23 = vadd.f32 %v1162_v36, %v7750_v17  ;;  %9994 = vst [vmem:[#allocation32_spill] sm:$0xff] %v7868_v14  ;;  %v1133_v36 = vadd.f32 %v1132_v16, %v7750_v17 }
 0x354   : > { %v7855_v48 = vpop.f32.mrf.mxu0 }
 0x355   : > { %v7875_v24 = vpack.c.bf16 %v1137_v50, %v1133_v36 }
 0x356   : > { %v1166_v62 = vpop.f32.mrf.mxu0 }
 0x357   : > { %v1167_v25 = vadd.f32 %v1166_v62, %v7750_v17  ;;  %9995 = vst [vmem:[#allocation33_spill] sm:$0xff] %v7875_v24 }
 0x358   : > { %v7859_v21 = vpop.f32.mrf.mxu0 }
 0x359   : > { %v7862_v46 = vpack.c.bf16 %v1167_v25, %v1163_v23 }
 0x35a   : > { %v1172_v63 = vpop.f32.mrf.mxu0 }
 0x35b   : > { %1473 = vrot.lane.b32.xlu0 %v7862_v46, %s7090_s21  ;;  %v1173_v10 = vadd.f32 %v1172_v63, %v7750_v17 }
 0x35c   : > { %v7873_v62 = vpop.f32.mrf.mxu0 }
 0x35e   : > { %v1176_v2 = vpop.f32.mrf.mxu0 }
 0x35f   : > { %1471 = vrot.lane.b32.xlu0 %v7868_v14, %s7090_s21  ;;  %v1177_v36 = vadd.f32 %v1176_v2, %v7750_v17 }
 0x360   : > { %v7879_v23 = vpop.f32.mrf.mxu0 }
 0x361   : > { %v7895_v13 = vpack.c.bf16 %v1177_v36, %v1173_v10 }
 0x362   : > { %v1182_v25 = vpop.f32.mrf.mxu0 }
 0x363   : > { %1467 = vrot.lane.b32.xlu0 %v7875_v24, %s7090_s21  ;;  %9997 = vst [vmem:[#allocation35_spill] sm:$0xff] %v7895_v13 }
 0x364   : > { %v7881_v27 = vpop.f32.mrf.mxu0 }
 0x366   : > { %v1186_v33 = vpop.f32.mrf.mxu0 }
 0x367   : > { %v1187_v34 = vadd.f32 %v1186_v33, %v7750_v17 }
 0x368   : > { %v7883_v29 = vpop.f32.mrf.mxu0 }
 0x37a   : > { %v1192_v16 = vpop.f32.mrf.mxu0 }
 0x37b   : > { %v1193_v0 = vadd.f32 %v1192_v16, %v7750_v17 }
 0x37c   : > { %v7885_v9 = vpop.f32.mrf.mxu0 }
 0x37e   : > { %v1196_v8 = vpop.f32.mrf.mxu0 }
 0x37f   : > { %v1197_v50 = vadd.f32 %v1196_v8, %v7750_v17 }
 0x380   : > { %v7904_v10 = vpop.f32.mrf.mxu0 }
 0x381   : > { %v7890_v59 = vpack.c.bf16 %v1197_v50, %v1193_v0  ;;  %v9917_v50 = vsub.s32 1, %v7735_v11 }
 0x382   : > { %v1371_v39 = vpop.permute.xlu1 %1370 }
 0x383   : > { %9996 = vst [vmem:[#allocation34_spill] sm:$0xff] %v7890_v59  ;;  %1572 = vrot.lane.b32.xlu0 %v7890_v59, %s7090_s21 }
 0x386   : > { %v1271_v1 = vpop.permute.xlu1 %1270 }
 0x387   : > { %6289 = vmatprep.subr.msk.bf16.mxu0 %vm1272_vm1, %v1271_v1  ;;  %1568 = vrot.lane.b32.xlu0 %v7895_v13, %s7090_s21  ;;  %v1295_v8 = vsel %vm1272_vm1, %v1271_v1, 0 }
 0x388   : > { %5962 = vmatpush3.bf16.xpose.msra.mxu0 %v1295_v8 }
 0x38a   : > { %v1269_v2 = vpop.permute.xlu1 %1268 }
 0x38b   : > { %6290 = vmatprep.subr.msk.bf16.mxu0 %vm1272_vm1, %v1269_v2  ;;  %v1292_v0 = vsel %vm1272_vm1, %v1269_v2, 0  ;;  %v7913_v2 = vrot.slane %v7743_v28, %v9917_v50 }
 0x38d   : > { %v1089_v45 = vadd.f32 %v7776_v6, %v7913_v2  ;;  %v1085_v28 = vadd.f32 %v7770_v57, %v7913_v2  ;;  %v1075_v57 = vadd.f32 %v7760_v61, %v7913_v2  ;;  %v1059_v61 = vadd.f32 %v7737_v15, %v7913_v2 }
 0x38e   : > { %v1267_v63 = vpop.permute.xlu1 %1266  ;;  %v1169_v15 = vadd.f32 %v7859_v21, %v7913_v2 }
 0x38f   : > { %v1289_v54 = vsel %vm1272_vm1, %v1267_v63, 0  ;;  %v7931_v6 = vpack.c.bf16 %v1089_v45, %v1085_v28 }
 0x390   : > { %5964 = vmatpush3.bf16.xpose.msra.mxu0 %v1292_v0 }
 0x391   : > { %6291 = vmatprep.subr.msk.bf16.mxu0 %vm1272_vm1, %v1267_v63  ;;  %9999 = vst [vmem:[#allocation37_spill] sm:$0xff] %v7931_v6 }
 0x392   : > { %v1265_v1 = vpop.permute.xlu1 %1264 }
 0x393   : > { %v1286_v33 = vsel %vm1272_vm1, %v1265_v1, 0 }
 0x394   : > { %v1202_v16 = vpop.f32.mrf.mxu0 }
 0x395   : > { %v1203_v0 = vadd.f32 %v1202_v16, %v7750_v17  ;;  %v1183_v16 = vadd.f32 %v1182_v25, %v7750_v17 }
 0x396   : > { %v7907_v36 = vpop.f32.mrf.mxu0 }
 0x398   : > { %v1206_v8 = vpop.f32.mrf.mxu0  ;;  %5966 = vmatpush3.bf16.xpose.msra.mxu0 %v1289_v54 }
 0x399   : > { %v1207_v49 = vadd.f32 %v1206_v8, %v7750_v17  ;;  %6292 = vmatprep.subr.msk.bf16.mxu0 %vm1272_vm1, %v1265_v1  ;;  %v1393_v17 = vsel %vm1272_vm1, %v1371_v39, 0  ;;  %v1055_v1 = vadd.f32 %v7733_v43, %v7913_v2 }
 0x39b   : > { %v7921_v63 = vpack.c.bf16 %v1207_v49, %v1203_v0  ;;  %v1373_v38 = vpop.permute.xlu0 %1372  ;;  %v7933_v49 = vpack.c.bf16 %v1187_v34, %v1183_v16  ;;  %v1069_v34 = vadd.f32 %v7754_v20, %v7913_v2  ;;  %v1165_v0 = vadd.f32 %v7855_v48, %v7913_v2 }
 0x39c   : > { %6293 = vmatprep.subr.msk.bf16.mxu1 %vm1272_vm1, %v1373_v38  ;;  %v1396_v54 = vsel %vm1272_vm1, %v1373_v38, 0  ;;  %v1079_v38 = vadd.f32 %v7766_v35, %v7913_v2 }
 0x39d   : > { %9998 = vst [vmem:[#allocation36_spill] sm:$0xff] %v7921_v63  ;;  %1574 = vrot.lane.b32.xlu1 %v7921_v63, %s7090_s21  ;;  %5978 = vmatpush3.bf16.xpose.msra.mxu1 %v1396_v54  ;;  %10000 = vst [vmem:[#allocation38_spill] sm:$0xff] %v7933_v49  ;;  %v7977_v43 = vpack.c.bf16 %v1169_v15, %v1165_v0  ;;  %v1129_v15 = vadd.f32 %v7835_v7, %v7913_v2 }
 0x39e   : > { %6294 = vmatprep.subr.msk.bf16.mxu1 %vm1272_vm1, %v1371_v39  ;;  %v7947_v25 = vpack.c.bf16 %v1079_v38, %v1075_v57  ;;  %v1065_v39 = vadd.f32 %v7745_v42, %v7913_v2  ;;  %v7967_v42 = vpack.c.bf16 %v1059_v61, %v1055_v1  ;;  %v1125_v0 = vadd.f32 %v7819_v52, %v7913_v2 }
 0x39f   : > { %v1369_v45 = vpop.permute.xlu0 %1368  ;;  %v1105_v52 = vadd.f32 %v7797_v32, %v7913_v2 }
 0x3a0   : > { %5968 = vmatpush3.bf16.xpose.msra.mxu0 %v1286_v33  ;;  %10001 = vst [vmem:[#allocation39_spill] sm:$0xff] %v7947_v25  ;;  %v7959_v35 = vpack.c.bf16 %v1069_v34, %v1065_v39  ;;  %v1390_v20 = vsel %vm1272_vm1, %v1369_v45, 0  ;;  %10003 = vst [vmem:[#allocation41_spill] sm:$0xff] %v7967_v42 }
 0x3a1   : > { %6025 = vmatprep.subr.bf16.mxu0 %v7931_v6  ;;  %1570 = vrot.lane.b32.xlu1 %v7933_v49, %s7090_s21 }
 0x3a2   : > { %10002 = vst [vmem:[#allocation40_spill] sm:$0xff] %v7959_v35 }
 0x3a3   : > { %v1367_v8 = vpop.permute.xlu0 %1366 }
 0x3a4   : > { %v1387_v54 = vsel %vm1272_vm1, %v1367_v8, 0 }
 0x3a5   : > { %5980 = vmatpush3.bf16.xpose.msra.mxu1 %v1393_v17 }
 0x3a6   : > { %6295 = vmatprep.subr.msk.bf16.mxu1 %vm1272_vm1, %v1369_v45 }
 0x3a7   : > { %5970 = vmatmul.mubr.msk.bf16.vlgmr.msra.gmra.mxu0 %vm1272_vm1, %v7756_v26 }
 0x3a8   : > { %5973 = vmatprep.mubr.msk.bf16.mxu0 %vm1272_vm1, %v7768_v53  ;;  %6026 = vmatpush3.bf16.msra.mxu0 %v7931_v6 }
 0x3a9   : > { %6027 = vmatprep.subr.bf16.mxu0 %v7947_v25 }
 0x3ac   : > { %6028 = vmatpush3.bf16.msra.mxu0 %v7947_v25 }
 0x3ad   : > { %5982 = vmatpush3.bf16.xpose.msra.mxu1 %v1390_v20  ;;  %6029 = vmatprep.subr.bf16.mxu0 %v7959_v35 }
 0x3ae   : > { %6296 = vmatprep.subr.msk.bf16.mxu1 %vm1272_vm1, %v1367_v8 }
 0x3af   : > { %5974 = vmatmul.mubr.msk.bf16.gmra.mxu0 %vm1272_vm1, %v7774_v3 }
 0x3b0   : > { %6030 = vmatpush3.bf16.msra.mxu0 %v7959_v35 }
 0x3b1   : > { %6031 = vmatprep.subr.bf16.mxu0 %v7967_v42 }
 0x3b4   : > { %6032 = vmatpush3.bf16.msra.mxu0 %v7967_v42 }
 0x3b5   : > { %5984 = vmatpush3.bf16.xpose.msra.mxu1 %v1387_v54  ;;  %6057 = vmatprep.subr.bf16.mxu0 %v7977_v43  ;;  %v8017_v54 = vpack.c.bf16 %v1129_v15, %v1125_v0  ;;  %v5679_v15 = vld [vmem:[%s9881_s1 + $0x10] sm:$0xff]  }
 0x3b7   : > { %10004 = vst [vmem:[#allocation42_spill] sm:$0xff] %v8017_v54 }
 0x3bc   : > { %5986 = vmatmul.mubr.msk.bf16.vlgmr.msra.gmra.mxu1 %vm1272_vm1, %v7829_v4 }
 0x3bd   : > { %5989 = vmatprep.mubr.msk.bf16.mxu1 %vm1272_vm1, %v7805_v56  ;;  %v1470_v33 = vpop.permute.xlu1 %1469 }
 0x3be   : > { %v1491_v38 = vsel %vm1272_vm1, %v1470_v33, 0 }
 0x3c4   : > { %5990 = vmatmul.mubr.msk.bf16.gmra.mxu1 %vm1272_vm1, %v7824_v5 }
 0x3c5   : > { %6001 = vmatprep.mubr.msk.bf16.mxu1 %vm1272_vm1, %v7875_v24 }
 0x3cd   : > { %v1474_v48 = vpop.permute.xlu0 %1473 }
 0x3ce   : > { %6297 = vmatprep.subr.msk.bf16.mxu1 %vm1272_vm1, %v1474_v48  ;;  %v1497_v21 = vsel %vm1272_vm1, %v1474_v48, 0 }
 0x3cf   : > { %5994 = vmatpush3.bf16.xpose.msra.mxu1 %v1497_v21  ;;  %v1119_v21 = vadd.f32 %v7815_v51, %v7913_v2 }
 0x3d1   : > { %v1472_v28 = vpop.permute.xlu0 %1471 }
 0x3d2   : > { %6298 = vmatprep.subr.msk.bf16.mxu1 %vm1272_vm1, %v1472_v28  ;;  %v1494_v16 = vsel %vm1272_vm1, %v1472_v28, 0  ;;  %v1115_v28 = vadd.f32 %v7801_v12, %v7913_v2  ;;  %v1099_v12 = vadd.f32 %v7795_v22, %v7913_v2  ;;  %v1205_v22 = vadd.f32 %v7907_v36, %v7913_v2 }
 0x3d4   : > { %v8027_v7 = vpack.c.bf16 %v1119_v21, %v1115_v28  ;;  %v5680_v28 = vld [vmem:[%s9881_s1 + $0x18] sm:$0xff]  }
 0x3d5   : > { %v1468_v17 = vpop.permute.xlu0 %1467 }
 0x3d6   : > { %v1488_v57 = vsel %vm1272_vm1, %v1468_v17, 0  ;;  %10005 = vst [vmem:[#allocation43_spill] sm:$0xff] %v8027_v7 }
 0x3d7   : > { %5996 = vmatpush3.bf16.xpose.msra.mxu1 %v1494_v16  ;;  %v1109_v16 = vadd.f32 %v7799_v30, %v7913_v2  ;;  %v1208_v30 = vpop.f32.mrf.mxu0 }
 0x3d8   : > { %6299 = vmatprep.subr.msk.bf16.mxu1 %vm1272_vm1, %v1470_v33  ;;  %v1095_v33 = vadd.f32 %v7778_v40, %v7913_v2  ;;  %v5647_v40 = vld [vmem:[%s9881_s1] sm:$0xff]  }
 0x3d9   : > { %v8039_v51 = vpack.c.bf16 %v1109_v16, %v1105_v52 }
 0x3db   : > { %10006 = vst [vmem:[#allocation44_spill] sm:$0xff] %v8039_v51 }
 0x3df   : > { %5998 = vmatpush3.bf16.xpose.msra.mxu1 %v1491_v38  ;;  %v8045_v38 = vpack.c.bf16 %v1099_v12, %v1095_v33  ;;  %v8084_v33 = vunpack.c.l.bf16 %v5680_v28 }
 0x3e0   : > { %6300 = vmatprep.subr.msk.bf16.mxu1 %vm1272_vm1, %v1468_v17  ;;  %v1209_v17 = vadd.f32 %v1208_v30, %v7913_v2  ;;  %v8082_v30 = vunpack.c.l.bf16 %v5679_v15 }
 0x3e1   : > { %10007 = vst [vmem:[#allocation45_spill] sm:$0xff] %v8045_v38 }
 0x3e2   : > { %v8054_v32 = vpack.c.bf16 %v1209_v17, %v1205_v22 }
 0x3e7   : > { %6000 = vmatpush3.bf16.xpose.msra.mxu1 %v1488_v57  ;;  %v5678_v57 = vld [vmem:[%s9881_s1 + $0x8] sm:$0xff]  }
 0x3e8   : > { %v8066_v36 = vunpack.c.l.bf16 %v5678_v57 }
 0x3ee   : > { %6002 = vmatmul.mubr.msk.bf16.vlgmr.msra.gmra.mxu1 %vm1272_vm1, %v7847_v41 }
 0x3ef   : > { %6005 = vmatprep.mubr.msk.bf16.mxu1 %vm1272_vm1, %v7868_v14 }
 0x3f5   : > { %v1573_v39 = vpop.permute.xlu0 %1572 }
 0x3f6   : > { %6006 = vmatmul.mubr.msk.bf16.gmra.mxu1 %vm1272_vm1, %v7862_v46  ;;  %v1595_v61 = vsel %vm1272_vm1, %v1573_v39, 0 }
 0x3f7   : > { %6017 = vmatprep.mubr.msk.bf16.mxu1 %vm1272_vm1, %v7895_v13 }
 0x3f9   : > { %v1569_v8 = vpop.permute.xlu0 %1568 }
 0x3fa   : > { %v1589_v48 = vsel %vm1272_vm1, %v1569_v8, 0 }
 0x40f   : > { %v1575_v45 = vpop.permute.xlu1 %1574 }
 0x410   : > { %6301 = vmatprep.subr.msk.bf16.mxu1 %vm1272_vm1, %v1575_v45  ;;  %v1598_v34 = vsel %vm1272_vm1, %v1575_v45, 0  ;;  %v8064_v45 = vunpack.c.l.bf16 %v5647_v40 }
 0x411   : > { %6010 = vmatpush3.bf16.xpose.msra.mxu1 %v1598_v34 }
 0x412   : > { %6302 = vmatprep.subr.msk.bf16.mxu1 %vm1272_vm1, %v1573_v39  ;;  %v8068_v39 = vunpack.c.h.bf16 %v5678_v57  ;;  %v8086_v57 = vunpack.c.h.bf16 %v5680_v28 }
 0x413   : > { %v1571_v20 = vpop.permute.xlu1 %1570 }
 0x414   : > { %v1592_v1 = vsel %vm1272_vm1, %v1571_v20, 0 }
 0x419   : > { %6012 = vmatpush3.bf16.xpose.msra.mxu1 %v1595_v61 }
 0x41a   : > { %6303 = vmatprep.subr.msk.bf16.mxu1 %vm1272_vm1, %v1571_v20 }
 0x421   : > { %6014 = vmatpush3.bf16.xpose.msra.mxu1 %v1592_v1  ;;  %v8071_v1 = vunpack.c.h.bf16 %v5647_v40 }
 0x422   : > { %6304 = vmatprep.subr.msk.bf16.mxu1 %vm1272_vm1, %v1569_v8 }
 0x429   : > { %6016 = vmatpush3.bf16.xpose.msra.mxu1 %v1589_v48 }
 0x42a   : > { %6041 = vmatprep.subr.bf16.mxu1 %v8017_v54 }
 0x430   : > { %6018 = vmatmul.mubr.msk.bf16.vlgmr.msra.gmra.mxu1 %vm1272_vm1, %v7933_v49 }
 0x431   : > { %6021 = vmatprep.mubr.msk.bf16.mxu1 %vm1272_vm1, %v7890_v59  ;;  %6042 = vmatpush3.bf16.msra.mxu1 %v8017_v54 }
 0x432   : > { %6043 = vmatprep.subr.bf16.mxu1 %v8027_v7 }
 0x435   : > { %6044 = vmatpush3.bf16.msra.mxu1 %v8027_v7 }
 0x436   : > { %6045 = vmatprep.subr.bf16.mxu1 %v8039_v51 }
 0x438   : > { %6022 = vmatmul.mubr.msk.bf16.gmra.mxu1 %vm1272_vm1, %v7921_v63 }
 0x439   : > { %6046 = vmatpush3.bf16.msra.mxu1 %v8039_v51 }
 0x43a   : > { %6047 = vmatprep.subr.bf16.mxu1 %v8045_v38 }
 0x43d   : > { %6048 = vmatpush3.bf16.msra.mxu1 %v8045_v38 }
 0x43e   : > { %6073 = vmatprep.subr.bf16.mxu1 %v8054_v32 }
 0x467   : > { %v5971_v34 = vpop.f32.mrf.mxu0 }
 0x468   : > { %v1340_v0 = vadd.f32 %v5971_v34, %v8066_v36 }
 0x469   : > { %v1331_v61 = vpop.f32.mrf.mxu0 }
 0x46a   : > { %v1332_v20 = vadd.f32 %v8064_v45, %v1331_v61  ;;  %v1669_v22 = vmul.f32 1.442695, %v1340_v0 }
 0x46b   : > { %v5972_v8 = vpop.f32.mrf.mxu0 }
 0x46c   : > { %v1665_v48 = vmul.f32 1.442695, %v1332_v20  ;;  %v1343_v21 = vadd.f32 %v5972_v8, %v8068_v39  ;;  %v8089_v20 = vunpack.c.h.bf16 %v5679_v15 }
 0x46d   : > { %v1334_v16 = vpop.f32.mrf.mxu0 }
 0x46e   : > { %6496 = vpow2.f32 %v1665_v48  ;;  %v1671_v52 = vmul.f32 1.442695, %v1343_v21  ;;  %v1335_v12 = vadd.f32 %v8071_v1, %v1334_v16 }
 0x46f   : > { %v5975_v17 = vpop.f32.mrf.mxu0 }
 0x470   : > { %6498 = vpow2.f32 %v1671_v52  ;;  %v1667_v40 = vmul.f32 1.442695, %v1335_v12  ;;  %v1356_v8 = vadd.f32 %v5975_v17, %v8084_v33 }
 0x471   : > { %v1347_v34 = vpop.f32.mrf.mxu0 }
 0x472   : > { %6500 = vpow2.f32 %v1667_v40  ;;  %v1348_v61 = vadd.f32 %v8082_v30, %v1347_v34  ;;  %v1677_v52 = vmul.f32 1.442695, %v1356_v8 }
 0x473   : > { %v5976_v48 = vpop.f32.mrf.mxu0  ;;  %6502 = vpow2.f32 %v1669_v22 }
 0x474   : > { %v1673_v21 = vmul.f32 1.442695, %v1348_v61  ;;  %v1359_v16 = vadd.f32 %v5976_v48, %v8086_v57 }
 0x475   : > { %v1350_v50 = vpop.f32.mrf.mxu0 }
 0x476   : > { %v1351_v0 = vadd.f32 %v8089_v20, %v1350_v50  ;;  %6504 = vpow2.f32 %v1673_v21  ;;  %v1679_v28 = vmul.f32 1.442695, %v1359_v16 }
 0x478   : > { %v1675_v12 = vmul.f32 1.442695, %v1351_v0 }
 0x47a   : > { %6506 = vpow2.f32 %v1675_v12 }
 0x47b   : > { %v8094_v40 = vpop.eup %6496  ;;  %6508 = vpow2.f32 %v1677_v52 }
 0x47c   : > { %6510 = vpow2.f32 %v1679_v28  ;;  %v5987_v15 = vpop.f32.mrf.mxu1  ;;  %v1729_v17 = vsel %vm476_vm0, %v8094_v40, 0.0 }
 0x47d   : > { %v8098_v22 = vpop.eup %6498  ;;  %v1441_v34 = vadd.f32 %v5987_v15, %v8066_v36  ;;  %1730 = vadd.xlane.f32.xlu1 %v1729_v17 }
 0x47e   : > { %v1432_v61 = vpop.f32.mrf.mxu1  ;;  %v1738_v16 = vsel %vm476_vm0, %v8098_v22, 0.0 }
 0x47f   : > { %v8101_v50 = vpop.eup %6500  ;;  %v1433_v8 = vadd.f32 %v8064_v45, %v1432_v61  ;;  %v1685_v52 = vmul.f32 1.442695, %v1441_v34 }
 0x480   : > { %v5988_v48 = vpop.f32.mrf.mxu1  ;;  %v1732_v21 = vsel %vm476_vm0, %v8101_v50, 0.0  ;;  %v8108_v0 = vpop.eup %6502 }
 0x481   : > { %v1681_v28 = vmul.f32 1.442695, %v1433_v8  ;;  %v1444_v12 = vadd.f32 %v5988_v48, %v8068_v39  ;;  %1733 = vadd.xlane.f32.xlu0 %v1732_v21  ;;  %1739 = vadd.xlane.f32.xlu1 %v1738_v16  ;;  %v1735_v11 = vsel %vm476_vm0, %v8108_v0, 0.0 }
 0x482   : > { %v1435_v15 = vpop.f32.mrf.mxu1 }
 0x483   : > { %6512 = vpow2.f32 %v1681_v28  ;;  %v1436_v17 = vadd.f32 %v8071_v1, %v1435_v15  ;;  %v8114_v31 = vpop.eup %6504  ;;  %v1687_v38 = vmul.f32 1.442695, %v1444_v12 }
 0x484   : > { %v5991_v61 = vpop.f32.mrf.mxu1  ;;  %6514 = vpow2.f32 %v1685_v52  ;;  %v1741_v15 = vsel %vm476_vm0, %v8114_v31, 0.0 }
 0x485   : > { %v1683_v51 = vmul.f32 1.442695, %v1436_v17  ;;  %v1457_v34 = vadd.f32 %v5991_v61, %v8084_v33  ;;  %1736 = vadd.xlane.f32.xlu0 %v1735_v11 }
 0x486   : > { %v1448_v8 = vpop.f32.mrf.mxu1 }
 0x487   : > { %v8117_v48 = vpop.eup %6506  ;;  %6516 = vpow2.f32 %v1683_v51  ;;  %v1449_v21 = vadd.f32 %v8082_v30, %v1448_v8  ;;  %v1693_v17 = vmul.f32 1.442695, %v1457_v34 }
 0x488   : > { %v8120_v16 = vpop.eup %6508  ;;  %v5992_v28 = vpop.f32.mrf.mxu1  ;;  %v1744_v52 = vsel %vm476_vm0, %v8117_v48, 0.0  ;;  %6518 = vpow2.f32 %v1687_v38 }
 0x489   : > { %v8126_v12 = vpop.eup %6510  ;;  %v1689_v11 = vmul.f32 1.442695, %v1449_v21  ;;  %v1460_v61 = vadd.f32 %v5992_v28, %v8086_v57  ;;  %1742 = vadd.xlane.f32.xlu0 %v1741_v15  ;;  %1745 = vadd.xlane.f32.xlu1 %v1744_v52  ;;  %v1747_v54 = vsel %vm476_vm0, %v8120_v16, 0.0 }
 0x48a   : > { %v1451_v51 = vpop.f32.mrf.mxu1  ;;  %v1750_v42 = vsel %vm476_vm0, %v8126_v12, 0.0 }
 0x48b   : > { %6520 = vpow2.f32 %v1689_v11  ;;  %v1452_v8 = vadd.f32 %v8089_v20, %v1451_v51  ;;  %v1695_v35 = vmul.f32 1.442695, %v1460_v61 }
 0x48c   : > { %6522 = vpow2.f32 %v1693_v17 }
 0x48d   : > { %v1691_v7 = vmul.f32 1.442695, %v1452_v8  ;;  %1748 = vadd.xlane.f32.xlu0 %v1747_v54  ;;  %1751 = vadd.xlane.f32.xlu1 %v1750_v42 }
 0x48f   : > { %6524 = vpow2.f32 %v1691_v7 }
 0x490   : > { %v8134_v38 = vpop.eup %6512  ;;  %6526 = vpow2.f32 %v1695_v35 }
 0x491   : > { %v1753_v34 = vsel %vm476_vm0, %v8134_v38, 0.0  ;;  %v8138_v21 = vpop.eup %6514 }
 0x492   : > { %1754 = vadd.xlane.f32.xlu0 %v1753_v34  ;;  %v1759_v52 = vsel %vm476_vm0, %v8138_v21, 0.0 }
 0x494   : > { %v8140_v28 = vpop.eup %6516 }
 0x495   : > { %v1756_v15 = vsel %vm476_vm0, %v8140_v28, 0.0  ;;  %v8146_v54 = vpop.eup %6518 }
 0x496   : > { %1757 = vadd.xlane.f32.xlu1 %v1756_v15  ;;  %1760 = vadd.xlane.f32.xlu0 %v1759_v52  ;;  %v1762_v35 = vsel %vm476_vm0, %v8146_v54, 0.0 }
 0x498   : > { %v8148_v42 = vpop.eup %6520 }
 0x499   : > { %v1765_v7 = vsel %vm476_vm0, %v8148_v42, 0.0  ;;  %v8154_v17 = vpop.eup %6522 }
 0x49a   : > { %1763 = vadd.xlane.f32.xlu1 %v1762_v35  ;;  %1766 = vadd.xlane.f32.xlu0 %v1765_v7  ;;  %v1771_v51 = vsel %vm476_vm0, %v8154_v17, 0.0 }
 0x49c   : > { %v8156_v11 = vpop.eup %6524 }
 0x49d   : > { %v1768_v61 = vsel %vm476_vm0, %v8156_v11, 0.0  ;;  %v8162_v8 = vpop.eup %6526 }
 0x49e   : > { %1769 = vadd.xlane.f32.xlu1 %v1768_v61  ;;  %1772 = vadd.xlane.f32.xlu0 %v1771_v51  ;;  %v1774_v34 = vsel %vm476_vm0, %v8162_v8, 0.0 }
 0x4a2   : > { %1775 = vadd.xlane.f32.xlu1 %v1774_v34 }
 0x4ae   : > { %v6003_v15 = vpop.f32.mrf.mxu1 }
 0x4af   : > { %v1542_v52 = vadd.f32 %v6003_v15, %v8066_v36 }
 0x4b0   : > { %v1533_v35 = vpop.f32.mrf.mxu1 }
 0x4b1   : > { %v1534_v7 = vadd.f32 %v8064_v45, %v1533_v35  ;;  %v1701_v25 = vmul.f32 1.442695, %v1542_v52 }
 0x4b2   : > { %v6004_v6 = vpop.f32.mrf.mxu1 }
 0x4b3   : > { %v1697_v13 = vmul.f32 1.442695, %v1534_v7  ;;  %v1545_v49 = vadd.f32 %v6004_v6, %v8068_v39 }
 0x4b4   : > { %v1536_v59 = vpop.f32.mrf.mxu1 }
 0x4b5   : > { %6528 = vpow2.f32 %v1697_v13  ;;  %v1537_v61 = vadd.f32 %v8071_v1, %v1536_v59  ;;  %v1703_v63 = vmul.f32 1.442695, %v1545_v49 }
 0x4b6   : > { %v6007_v51 = vpop.f32.mrf.mxu1  ;;  %6530 = vpow2.f32 %v1701_v25 }
 0x4b7   : > { %v1699_v24 = vmul.f32 1.442695, %v1537_v61  ;;  %v1558_v34 = vadd.f32 %v6007_v51, %v8084_v33 }
 0x4b8   : > { %v1549_v41 = vpop.f32.mrf.mxu1 }
 0x4b9   : > { %6532 = vpow2.f32 %v1699_v24  ;;  %v1550_v15 = vadd.f32 %v8082_v30, %v1549_v41  ;;  %v1709_v52 = vmul.f32 1.442695, %v1558_v34 }
 0x4ba   : > { %v6008_v35 = vpop.f32.mrf.mxu1  ;;  %6534 = vpow2.f32 %v1703_v63 }
 0x4bb   : > { %v1705_v7 = vmul.f32 1.442695, %v1550_v15  ;;  %v1561_v6 = vadd.f32 %v6008_v35, %v8086_v57 }
 0x4bc   : > { %v1552_v14 = vpop.f32.mrf.mxu1 }
 0x4bd   : > { %6536 = vpow2.f32 %v1705_v7  ;;  %v1553_v13 = vadd.f32 %v8089_v20, %v1552_v14  ;;  %v1711_v59 = vmul.f32 1.442695, %v1561_v6 }
 0x4be   : > { %6538 = vpow2.f32 %v1709_v52 }
 0x4bf   : > { %v1707_v49 = vmul.f32 1.442695, %v1553_v13 }
 0x4c1   : > { %6540 = vpow2.f32 %v1707_v49 }
 0x4c2   : > { %v8174_v25 = vpop.eup %6528  ;;  %6542 = vpow2.f32 %v1711_v59 }
 0x4c3   : > { %v1777_v41 = vsel %vm476_vm0, %v8174_v25, 0.0  ;;  %v8178_v24 = vpop.eup %6530 }
 0x4c4   : > { %10008 = vst [vmem:[#allocation46_spill] sm:$0xff] %v8178_v24  ;;  %1778 = vadd.xlane.f32.xlu0 %v1777_v41  ;;  %v1783_v14 = vsel %vm476_vm0, %v8178_v24, 0.0 }
 0x4c6   : > { %v8180_v63 = vpop.eup %6532 }
 0x4c7   : > { %10009 = vst [vmem:[#allocation47_spill] sm:$0xff] %v8180_v63  ;;  %v1780_v61 = vsel %vm476_vm0, %v8180_v63, 0.0  ;;  %v8186_v51 = vpop.eup %6534 }
 0x4c8   : > { %10010 = vst [vmem:[#allocation48_spill] sm:$0xff] %v8186_v51  ;;  %1781 = vadd.xlane.f32.xlu1 %v1780_v61  ;;  %1784 = vadd.xlane.f32.xlu0 %v1783_v14  ;;  %v1786_v15 = vsel %vm476_vm0, %v8186_v51, 0.0 }
 0x4ca   : > { %v8188_v34 = vpop.eup %6536 }
 0x4cb   : > { %10011 = vst [vmem:[#allocation49_spill] sm:$0xff] %v8188_v34  ;;  %v1789_v35 = vsel %vm476_vm0, %v8188_v34, 0.0  ;;  %v8194_v52 = vpop.eup %6538 }
 0x4cc   : > { %10012 = vst [vmem:[#allocation50_spill] sm:$0xff] %v8194_v52  ;;  %1787 = vadd.xlane.f32.xlu1 %v1786_v15  ;;  %1790 = vadd.xlane.f32.xlu0 %v1789_v35  ;;  %v1795_v13 = vsel %vm476_vm0, %v8194_v52, 0.0 }
 0x4ce   : > { %v8196_v7 = vpop.eup %6540 }
 0x4cf   : > { %10013 = vst [vmem:[#allocation51_spill] sm:$0xff] %v8196_v7  ;;  %v1792_v6 = vsel %vm476_vm0, %v8196_v7, 0.0  ;;  %v8202_v59 = vpop.eup %6542 }
 0x4d0   : > { %10014 = vst [vmem:[#allocation52_spill] sm:$0xff] %v8202_v59  ;;  %1793 = vadd.xlane.f32.xlu1 %v1792_v6  ;;  %1796 = vadd.xlane.f32.xlu0 %v1795_v13  ;;  %v1798_v49 = vsel %vm476_vm0, %v8202_v59, 0.0 }
 0x4d4   : > { %1799 = vadd.xlane.f32.xlu1 %v1798_v49 }
 0x4f0   : > { %v6019_v41 = vpop.f32.mrf.mxu1 }
 0x4f1   : > { %v1643_v61 = vadd.f32 %v6019_v41, %v8066_v36 }
 0x4f2   : > { %v1634_v14 = vpop.f32.mrf.mxu1 }
 0x4f3   : > { %v1635_v15 = vadd.f32 %v8064_v45, %v1634_v14  ;;  %v1717_v34 = vmul.f32 1.442695, %v1643_v61 }
 0x4f4   : > { %v6020_v35 = vpop.f32.mrf.mxu1 }
 0x4f5   : > { %v1713_v7 = vmul.f32 1.442695, %v1635_v15  ;;  %v1646_v51 = vadd.f32 %v6020_v35, %v8068_v39 }
 0x4f6   : > { %v1637_v52 = vpop.f32.mrf.mxu1 }
 0x4f7   : > { %6544 = vpow2.f32 %v1713_v7  ;;  %v1638_v6 = vadd.f32 %v8071_v1, %v1637_v52  ;;  %v1719_v24 = vmul.f32 1.442695, %v1646_v51 }
 0x4f8   : > { %v6023_v13 = vpop.f32.mrf.mxu1  ;;  %6546 = vpow2.f32 %v1717_v34 }
 0x4f9   : > { %v1715_v59 = vmul.f32 1.442695, %v1638_v6  ;;  %v1659_v49 = vadd.f32 %v6023_v13, %v8084_v33 }
 0x4fa   : > { %v1650_v63 = vpop.f32.mrf.mxu1 }
 0x4fb   : > { %6548 = vpow2.f32 %v1715_v59  ;;  %v1651_v36 = vadd.f32 %v8082_v30, %v1650_v63  ;;  %v1725_v41 = vmul.f32 1.442695, %v1659_v49 }
 0x4fc   : > { %v6024_v45 = vpop.f32.mrf.mxu1  ;;  %6550 = vpow2.f32 %v1719_v24 }
 0x4fd   : > { %v1721_v61 = vmul.f32 1.442695, %v1651_v36  ;;  %v1662_v39 = vadd.f32 %v6024_v45, %v8086_v57 }
 0x4fe   : > { %v1653_v14 = vpop.f32.mrf.mxu1 }
 0x4ff   : > { %6552 = vpow2.f32 %v1721_v61  ;;  %v1654_v1 = vadd.f32 %v8089_v20, %v1653_v14  ;;  %v1727_v34 = vmul.f32 1.442695, %v1662_v39 }
 0x500   : > { %6554 = vpow2.f32 %v1725_v41 }
 0x501   : > { %v1723_v51 = vmul.f32 1.442695, %v1654_v1 }
 0x503   : > { %6556 = vpow2.f32 %v1723_v51 }
 0x504   : > { %v8214_v52 = vpop.eup %6544  ;;  %6558 = vpow2.f32 %v1727_v34 }
 0x505   : > { %v1801_v30 = vsel %vm476_vm0, %v8214_v52, 0.0  ;;  %v8218_v33 = vpop.eup %6546 }
 0x506   : > { %v1731_v24 = vpop.xlane.xlu1 %1730  ;;  %1802 = vadd.xlane.f32.xlu0 %v1801_v30  ;;  %v1807_v20 = vsel %vm476_vm0, %v8218_v33, 0.0 }
 0x507   : > { %6560 = vrcp.f32 %v1731_v24 }
 0x508   : > { %v8220_v63 = vpop.eup %6548 }
 0x509   : > { %v1804_v57 = vsel %vm476_vm0, %v8220_v63, 0.0  ;;  %v8226_v7 = vpop.eup %6550 }
 0x50a   : > { %v1740_v59 = vpop.xlane.xlu1 %1739  ;;  %1805 = vadd.xlane.f32.xlu1 %v1804_v57  ;;  %1808 = vadd.xlane.f32.xlu0 %v1807_v20  ;;  %v1734_v15 = vpop.xlane.xlu0 %1733  ;;  %v1810_v6 = vsel %vm476_vm0, %v8226_v7, 0.0 }
 0x50b   : > { %6562 = vrcp.f32 %v1734_v15 }
 0x50c   : > { %v8228_v35 = vpop.eup %6552  ;;  %6564 = vrcp.f32 %v1740_v59 }
 0x50d   : > { %v1813_v13 = vsel %vm476_vm0, %v8228_v35, 0.0  ;;  %v8234_v49 = vpop.eup %6554 }
 0x50e   : > { %1811 = vadd.xlane.f32.xlu1 %v1810_v6  ;;  %1814 = vadd.xlane.f32.xlu0 %v1813_v13  ;;  %v1737_v36 = vpop.xlane.xlu0 %1736  ;;  %v1819_v61 = vsel %vm476_vm0, %v8234_v49, 0.0 }
 0x50f   : > { %6566 = vrcp.f32 %v1737_v36 }
 0x510   : > { %v8236_v45 = vpop.eup %6556 }
 0x511   : > { %v1816_v41 = vsel %vm476_vm0, %v8236_v45, 0.0  ;;  %v8242_v39 = vpop.eup %6558 }
 0x512   : > { %v1746_v14 = vpop.xlane.xlu1 %1745  ;;  %1817 = vadd.xlane.f32.xlu1 %v1816_v41  ;;  %1820 = vadd.xlane.f32.xlu0 %v1819_v61  ;;  %v1743_v1 = vpop.xlane.xlu0 %1742  ;;  %v1822_v34 = vsel %vm476_vm0, %v8242_v39, 0.0  ;;  %v1159_v41 = vadd.f32 %v7853_v55, %v7913_v2 }
 0x513   : > { %6568 = vrcp.f32 %v1746_v14 }
 0x514   : > { %6570 = vrcp.f32 %v1743_v1  ;;  %v6561_v24 = vpop.eup %6560  ;;  %v1155_v1 = vadd.f32 %v7851_v47, %v7913_v2 }
 0x515   : > { %v1857_v59 = vmul.f32 %v6561_v24, %v8094_v40  ;;  %v1149_v24 = vadd.f32 %v7845_v37, %v7913_v2 }
 0x516   : > { %v1752_v51 = vpop.xlane.xlu1 %1751  ;;  %1823 = vadd.xlane.f32.xlu1 %v1822_v34  ;;  %v1749_v30 = vpop.xlane.xlu0 %1748  ;;  %v8257_v55 = vpack.c.bf16 %v1159_v41, %v1155_v1 }
 0x517   : > { %6572 = vrcp.f32 %v1752_v51 }
 0x518   : > { %6574 = vrcp.f32 %v1749_v30  ;;  %v6563_v57 = vpop.eup %6562 }
 0x519   : > { %v6565_v20 = vpop.eup %6564  ;;  %v1858_v15 = vmul.f32 %v6563_v57, %v8101_v50 }
 0x51a   : > { %v1860_v61 = vmul.f32 %v6565_v20, %v8098_v22 }
 0x51b   : > { %v1755_v6 = vpop.xlane.xlu0 %1754  ;;  %v1889_v36 = vpack.c.bf16 %v1858_v15, %v1857_v59 }
 0x51c   : > { %v6567_v13 = vpop.eup %6566  ;;  %6576 = vrcp.f32 %v1755_v6 }
 0x51d   : > { %v1859_v14 = vmul.f32 %v6567_v13, %v8108_v0  ;;  %6033 = vmatprep.mubr.msk.bf16.mxu0 %vm476_vm0, %v1889_v36  ;;  %v1145_v0 = vadd.f32 %v7841_v44, %v7913_v2  ;;  %v1139_v13 = vadd.f32 %v7839_v58, %v7913_v2 }
 0x51f   : > { %v1758_v34 = vpop.xlane.xlu1 %1757  ;;  %v1761_v40 = vpop.xlane.xlu0 %1760  ;;  %v1890_v51 = vpack.c.bf16 %v1860_v61, %v1859_v14  ;;  %v8266_v6 = vpack.c.bf16 %v1149_v24, %v1145_v0  ;;  %v1185_v0 = vadd.f32 %v7881_v27, %v7913_v2 }
 0x520   : > { %v6569_v50 = vpop.eup %6568  ;;  %6578 = vrcp.f32 %v1758_v34 }
 0x521   : > { %v6571_v30 = vpop.eup %6570  ;;  %6034 = vmatmul.mubr.msk.bf16.vlgmr.msra.gmra.mxu0 %vm476_vm0, %v1890_v51  ;;  %v1862_v22 = vmul.f32 %v6569_v50, %v8117_v48  ;;  %6580 = vrcp.f32 %v1761_v40  ;;  %v1199_v50 = vadd.f32 %v7904_v10, %v7913_v2  ;;  %v1189_v10 = vadd.f32 %v7883_v29, %v7913_v2 }
 0x522   : > { %6058 = vmatpush3.bf16.msra.mxu0 %v7977_v43  ;;  %v1861_v47 = vmul.f32 %v6571_v30, %v8114_v31 }
 0x523   : > { %6059 = vmatprep.subr.bf16.mxu0 %v8257_v55  ;;  %v1764_v57 = vpop.xlane.xlu1 %1763  ;;  %v1767_v20 = vpop.xlane.xlu0 %1766 }
 0x524   : > { %v6573_v59 = vpop.eup %6572  ;;  %6582 = vrcp.f32 %v1764_v57  ;;  %v1891_v37 = vpack.c.bf16 %v1862_v22, %v1861_v47  ;;  %v8328_v57 = vpack.c.bf16 %v1189_v10, %v1185_v0  ;;  %v10028_v10 = vld [vmem:[#allocation51_spill] sm:$0xff] }
 0x525   : > { %v6575_v15 = vpop.eup %6574  ;;  %v1864_v48 = vmul.f32 %v6573_v59, %v8126_v12  ;;  %6584 = vrcp.f32 %v1767_v20  ;;  %v1135_v12 = vadd.f32 %v7837_v19, %v7913_v2 }
 0x526   : > { %6037 = vmatprep.mubr.msk.bf16.mxu0 %vm476_vm0, %v1891_v37  ;;  %6060 = vmatpush3.bf16.msra.mxu0 %v8257_v55  ;;  %v1863_v31 = vmul.f32 %v6575_v15, %v8120_v16 }
 0x527   : > { %6061 = vmatprep.subr.bf16.mxu0 %v8266_v6  ;;  %v1770_v44 = vpop.xlane.xlu1 %1769  ;;  %2521 = vrot.lane.b32.xlu1 %v7768_v53, %s7092_s29  ;;  %v1773_v36 = vpop.xlane.xlu0 %1772  ;;  %v8281_v41 = vpack.c.bf16 %v1139_v13, %v1135_v12  ;;  %v10020_v13 = vld [vmem:[#allocation38_spill] sm:$0xff] }
 0x528   : > { %6586 = vrcp.f32 %v1770_v44  ;;  %2523 = vrot.lane.b32.xlu0 %v7774_v3, %s7092_s29  ;;  %v1892_v58 = vpack.c.bf16 %v1864_v48, %v1863_v31  ;;  %v10021_v31 = vld [vmem:[#allocation35_spill] sm:$0xff] }
 0x529   : > { %6588 = vrcp.f32 %v1773_v36  ;;  %v6577_v16 = vpop.eup %6576 }
 0x52a   : > { %6038 = vmatmul.mubr.msk.bf16.gmra.mxu0 %vm476_vm0, %v1892_v58  ;;  %v1865_v14 = vmul.f32 %v6577_v16, %v8134_v38  ;;  %v10022_v58 = vld [vmem:[#allocation47_spill] sm:$0xff] }
 0x52b   : > { %6062 = vmatpush3.bf16.msra.mxu0 %v8266_v6  ;;  %v1776_v61 = vpop.xlane.xlu1 %1775  ;;  %2519 = vrot.lane.b32.xlu1 %v7756_v26, %s7092_s29 }
 0x52c   : > { %6063 = vmatprep.subr.bf16.mxu0 %v8281_v41  ;;  %6590 = vrcp.f32 %v1776_v61  ;;  %2517 = vrot.lane.b32.xlu0 %v7788_v60, %s7092_s29 }
 0x52d   : > { %v6579_v19 = vpop.eup %6578 }
 0x52e   : > { %v1866_v1 = vmul.f32 %v6579_v19, %v8140_v28  ;;  %v6581_v34 = vpop.eup %6580 }
 0x52f   : > { %6064 = vmatpush3.bf16.msra.mxu0 %v8281_v41  ;;  %2509 = vrot.lane.b32.xlu1 %v7788_v60, %s7093_s28  ;;  %v1867_v30 = vmul.f32 %v6581_v34, %v8138_v21  ;;  %v1195_v60 = vadd.f32 %v7885_v9, %v7913_v2  ;;  %v8318_v9 = vld [vmem:[#allocation5 + $0x8] sm:$0xff]  }
 0x530   : > { %2511 = vrot.lane.b32.xlu0 %v7756_v26, %s7093_s28  ;;  %v1893_v40 = vpack.c.bf16 %v1866_v1, %v1865_v14  ;;  %6089 = vmatprep.subr.bf16.mxu0 %v8318_v9  ;;  %v10023_v1 = vld [vmem:[#allocation46_spill] sm:$0xff] }
 0x531   : > { %v6583_v51 = vpop.eup %6582  ;;  %v8310_v21 = vpack.c.bf16 %v1199_v50, %v1195_v60  ;;  %v10026_v60 = vld [vmem:[#allocation37_spill] sm:$0xff] }
 0x532   : > { %v1868_v38 = vmul.f32 %v6583_v51, %v8146_v54  ;;  %6049 = vmatprep.mubr.msk.bf16.mxu1 %vm476_vm0, %v1893_v40  ;;  %v6585_v28 = vpop.eup %6584  ;;  %v10024_v40 = vld [vmem:[#allocation48_spill] sm:$0xff] }
 0x533   : > { %2628 = vrot.lane.b32.xlu1 %v7824_v5, %s7092_s29  ;;  %v1869_v54 = vmul.f32 %v6585_v28, %v8148_v42  ;;  %v10025_v28 = vld [vmem:[#allocation39_spill] sm:$0xff] }
 0x534   : > { %2626 = vrot.lane.b32.xlu0 %v7805_v56, %s7092_s29  ;;  %v1894_v26 = vpack.c.bf16 %v1868_v38, %v1867_v30 }
 0x535   : > { %v6587_v24 = vpop.eup %6586 }
 0x536   : > { %6050 = vmatmul.mubr.msk.bf16.vlgmr.msra.gmra.mxu1 %vm476_vm0, %v1894_v26  ;;  %v1870_v22 = vmul.f32 %v6587_v24, %v8156_v11  ;;  %v6589_v47 = vpop.eup %6588  ;;  %v1179_v11 = vadd.f32 %v7879_v23, %v7913_v2  ;;  %v10027_v26 = vld [vmem:[#allocation49_spill] sm:$0xff] }
 0x537   : > { %6074 = vmatpush3.bf16.msra.mxu1 %v8054_v32  ;;  %2513 = vrot.lane.b32.xlu1 %v7768_v53, %s7093_s28  ;;  %v1871_v53 = vmul.f32 %v6589_v47, %v8154_v17 }
 0x538   : > { %6075 = vmatprep.subr.bf16.mxu1 %v8310_v21  ;;  %2515 = vrot.lane.b32.xlu0 %v7774_v3, %s7093_s28  ;;  %v1895_v29 = vpack.c.bf16 %v1870_v22, %v1869_v54  ;;  %v1175_v3 = vadd.f32 %v7873_v62, %v7913_v2  ;;  %v10015_v62 = vld [vmem:[#allocation32_spill] sm:$0xff]  ;;  %v10017_v2 = vld [vmem:[#allocation33_spill] sm:$0xff] }
 0x539   : > { %v6591_v42 = vpop.eup %6590 }
 0x53a   : > { %6053 = vmatprep.mubr.msk.bf16.mxu1 %vm476_vm0, %v1895_v29  ;;  %v1872_v27 = vmul.f32 %v6591_v42, %v8162_v8  ;;  %v8341_v20 = vpack.c.bf16 %v1179_v11, %v1175_v3  ;;  %v10029_v29 = vld [vmem:[#allocation43_spill] sm:$0xff]  ;;  %v10030_v42 = vld [vmem:[#allocation40_spill] sm:$0xff]  ;;  %v10031_v11 = vld [vmem:[#allocation50_spill] sm:$0xff] }
 0x53b   : > { %6076 = vmatpush3.bf16.msra.mxu1 %v8310_v21  ;;  %2624 = vrot.lane.b32.xlu1 %v7829_v4, %s7092_s29 }
 0x53c   : > { %6077 = vmatprep.subr.bf16.mxu1 %v8328_v57  ;;  %2622 = vrot.lane.b32.xlu0 %v7786_v18, %s7092_s29  ;;  %v1896_v23 = vpack.c.bf16 %v1872_v27, %v1871_v53  ;;  %v10032_v27 = vld [vmem:[#allocation52_spill] sm:$0xff] }
 0x53e   : > { %6054 = vmatmul.mubr.msk.bf16.gmra.mxu1 %vm476_vm0, %v1896_v23 }
 0x53f   : > { %6078 = vmatpush3.bf16.msra.mxu1 %v8328_v57  ;;  %2614 = vrot.lane.b32.xlu1 %v7786_v18, %s7093_s28  ;;  %v10016_v18 = vld [vmem:[#allocation31_spill] sm:$0xff] }
 0x540   : > { %6079 = vmatprep.subr.bf16.mxu1 %v8341_v20  ;;  %2616 = vrot.lane.b32.xlu0 %v7829_v4, %s7093_s28 }
 0x543   : > { %6080 = vmatpush3.bf16.msra.mxu1 %v8341_v20  ;;  %2733 = vrot.lane.b32.xlu1 %v7862_v46, %s7092_s29 }
 0x544   : > { %2731 = vrot.lane.b32.xlu0 %v10015_v62, %s7092_s29 }
 0x547   : > { %2618 = vrot.lane.b32.xlu1 %v7805_v56, %s7093_s28  ;;  %v10018_v56 = vld [vmem:[#allocation36_spill] sm:$0xff] }
 0x548   : > { %2620 = vrot.lane.b32.xlu0 %v7824_v5, %s7093_s28  ;;  %v10019_v5 = vld [vmem:[#allocation34_spill] sm:$0xff] }
 0x54b   : > { %2729 = vrot.lane.b32.xlu1 %v10016_v18, %s7092_s29 }
 0x54c   : > { %2727 = vrot.lane.b32.xlu0 %v10017_v2, %s7092_s29 }
 0x54d   : > { %v1779_v4 = vpop.xlane.xlu0 %1778 }
 0x54e   : > { %6592 = vrcp.f32 %v1779_v4 }
 0x54f   : > { %2719 = vrot.lane.b32.xlu1 %v10017_v2, %s7093_s28  ;;  %v10036_v2 = vld [vmem:[#allocation45_spill] sm:$0xff] }
 0x550   : > { %2721 = vrot.lane.b32.xlu0 %v10016_v18, %s7093_s28  ;;  %v10035_v18 = vld [vmem:[#allocation44_spill] sm:$0xff] }
 0x551   : > { %v1782_v17 = vpop.xlane.xlu1 %1781  ;;  %v1785_v8 = vpop.xlane.xlu0 %1784 }
 0x552   : > { %6594 = vrcp.f32 %v1782_v17 }
 0x553   : > { %2838 = vrot.lane.b32.xlu1 %v10018_v56, %s7092_s29  ;;  %6596 = vrcp.f32 %v1785_v8 }
 0x554   : > { %2836 = vrot.lane.b32.xlu0 %v10019_v5, %s7092_s29 }
 0x555   : > { %v1788_v59 = vpop.xlane.xlu1 %1787  ;;  %v1791_v37 = vpop.xlane.xlu0 %1790 }
 0x556   : > { %6598 = vrcp.f32 %v1788_v59 }
 0x557   : > { %2723 = vrot.lane.b32.xlu1 %v10015_v62, %s7093_s28  ;;  %6600 = vrcp.f32 %v1791_v37  ;;  %v10033_v62 = vld [vmem:[#allocation41_spill] sm:$0xff] }
 0x558   : > { %2725 = vrot.lane.b32.xlu0 %v7862_v46, %s7093_s28 }
 0x559   : > { %v1794_v15 = vpop.xlane.xlu1 %1793  ;;  %v1797_v48 = vpop.xlane.xlu0 %1796 }
 0x55a   : > { %6602 = vrcp.f32 %v1794_v15 }
 0x55b   : > { %2834 = vrot.lane.b32.xlu1 %v10020_v13, %s7092_s29  ;;  %6604 = vrcp.f32 %v1797_v48  ;;  %v6593_v44 = vpop.eup %6592 }
 0x55c   : > { %2832 = vrot.lane.b32.xlu0 %v10021_v31, %s7092_s29  ;;  %v1873_v46 = vmul.f32 %v6593_v44, %v8174_v25  ;;  %v6401_v25 = vld [vmem:[#allocation5] sm:$0xff]   ;;  %s7020_s29 = scalar_lea.vmem %s7019_s27, 4096 }
 0x55d   : > { %v1800_v36 = vpop.xlane.xlu1 %1799 }
 0x55e   : > { %6606 = vrcp.f32 %v1800_v36 }
 0x55f   : > { %v6595_v12 = vpop.eup %6594  ;;  %2824 = vrot.lane.b32.xlu1 %v10021_v31, %s7093_s28 }
 0x560   : > { %2826 = vrot.lane.b32.xlu0 %v10020_v13, %s7093_s28  ;;  %v1874_v16 = vmul.f32 %v6595_v12, %v10022_v58  ;;  %v6597_v61 = vpop.eup %6596 }
 0x561   : > { %v1875_v34 = vmul.f32 %v6597_v61, %v10023_v1 }
 0x562   : > { %v1897_v19 = vpack.c.bf16 %v1874_v16, %v1873_v46 }
 0x563   : > { %v6599_v14 = vpop.eup %6598  ;;  %2828 = vrot.lane.b32.xlu1 %v10019_v5, %s7093_s28 }
 0x564   : > { %v1876_v51 = vmul.f32 %v6599_v14, %v10024_v40  ;;  %2830 = vrot.lane.b32.xlu0 %v10018_v56, %s7093_s28  ;;  %6065 = vmatprep.mubr.msk.bf16.mxu0 %vm476_vm0, %v1897_v19  ;;  %v6601_v50 = vpop.eup %6600 }
 0x565   : > { %v1877_v24 = vmul.f32 %v6601_v50, %v10027_v26 }
 0x566   : > { %v1898_v30 = vpack.c.bf16 %v1876_v51, %v1875_v34 }
 0x567   : > { %v6603_v38 = vpop.eup %6602  ;;  %3177 = vrot.lane.b32.xlu1 %v10025_v28, %s7093_s28 }
 0x568   : > { %3179 = vrot.lane.b32.xlu0 %v10026_v60, %s7093_s28  ;;  %6066 = vmatmul.mubr.msk.bf16.vlgmr.msra.gmra.mxu0 %vm476_vm0, %v1898_v30  ;;  %v1878_v54 = vmul.f32 %v6603_v38, %v10028_v10  ;;  %v6605_v22 = vpop.eup %6604 }
 0x569   : > { %6090 = vmatpush3.bf16.msra.mxu0 %v8318_v9  ;;  %v1879_v53 = vmul.f32 %v6605_v22, %v10031_v11  ;;  %v10034_v9 = vld [vmem:[#allocation42_spill] sm:$0xff] }
 0x56a   : > { %v1899_v47 = vpack.c.bf16 %v1878_v54, %v1877_v24  ;;  %6091 = vmatprep.subr.bf16.mxu0 %v6401_v25 }
 0x56b   : > { %v6607_v0 = vpop.eup %6606  ;;  %3270 = vrot.lane.b32.xlu1 %v10029_v29, %s7093_s28 }
 0x56c   : > { %3175 = vrot.lane.b32.xlu0 %v10030_v42, %s7093_s28  ;;  %6069 = vmatprep.mubr.msk.bf16.mxu0 %vm476_vm0, %v1899_v47  ;;  %v1880_v3 = vmul.f32 %v6607_v0, %v10032_v27 }
 0x56d   : > { %6092 = vmatpush3.bf16.msra.mxu0 %v6401_v25 }
 0x56e   : > { %v1900_v23 = vpack.c.bf16 %v1880_v3, %v1879_v53 }
 0x570   : > { %3173 = vrot.lane.b32.xlu0 %v10033_v62, %s7093_s28  ;;  %6070 = vmatmul.mubr.msk.bf16.gmra.mxu0 %vm476_vm0, %v1900_v23 }
 0x574   : > { %3272 = vrot.lane.b32.xlu0 %v10034_v9, %s7093_s28 }
 0x578   : > { %3268 = vrot.lane.b32.xlu0 %v10035_v18, %s7093_s28 }
 0x57c   : > { %3266 = vrot.lane.b32.xlu0 %v10036_v2, %s7093_s28 }
 0x580   : > { %3365 = vrot.lane.b32.xlu0 %v7977_v43, %s7093_s28 }
 0x58f   : > { %v1803_v4 = vpop.xlane.xlu0 %1802 }
 0x590   : > { %6608 = vrcp.f32 %v1803_v4 }
 0x593   : > { %v1806_v17 = vpop.xlane.xlu1 %1805  ;;  %v1809_v8 = vpop.xlane.xlu0 %1808 }
 0x594   : > { %6610 = vrcp.f32 %v1806_v17 }
 0x595   : > { %6612 = vrcp.f32 %v1809_v8 }
 0x597   : > { %v1812_v56 = vpop.xlane.xlu1 %1811  ;;  %v1815_v5 = vpop.xlane.xlu0 %1814 }
 0x598   : > { %6614 = vrcp.f32 %v1812_v56 }
 0x599   : > { %6616 = vrcp.f32 %v1815_v5 }
 0x59b   : > { %v1818_v59 = vpop.xlane.xlu1 %1817  ;;  %v1821_v37 = vpop.xlane.xlu0 %1820 }
 0x59c   : > { %6618 = vrcp.f32 %v1818_v59 }
 0x59d   : > { %6620 = vrcp.f32 %v1821_v37  ;;  %v6609_v15 = vpop.eup %6608 }
 0x59e   : > { %v1881_v31 = vmul.f32 %v6609_v15, %v8214_v52 }
 0x59f   : > { %v1824_v48 = vpop.xlane.xlu1 %1823  ;;  %v2524_v13 = vpop.permute.xlu0 %2523 }
 0x5a0   : > { %6622 = vrcp.f32 %v1824_v48  ;;  %6305 = vmatprep.subr.msk.bf16.mxu1 %vm1272_vm1, %v2524_v13  ;;  %v2547_v52 = vsel %vm1272_vm1, %v2524_v13, 0 }
 0x5a1   : > { %v6611_v43 = vpop.eup %6610 }
 0x5a2   : > { %v1882_v44 = vmul.f32 %v6611_v43, %v8220_v63  ;;  %v6613_v36 = vpop.eup %6612 }
 0x5a3   : > { %v2522_v12 = vpop.permute.xlu1 %2521  ;;  %v2518_v46 = vpop.permute.xlu0 %2517  ;;  %v1883_v61 = vmul.f32 %v6613_v36, %v8218_v33 }
 0x5a4   : > { %v1901_v58 = vpack.c.bf16 %v1882_v44, %v1881_v31  ;;  %v2538_v11 = vsel %vm1272_vm1, %v2518_v46, 0 }
 0x5a5   : > { %v6615_v16 = vpop.eup %6614 }
 0x5a6   : > { %v1884_v19 = vmul.f32 %v6615_v16, %v8226_v7  ;;  %6081 = vmatprep.mubr.msk.bf16.mxu1 %vm476_vm0, %v1901_v58  ;;  %v6617_v14 = vpop.eup %6616 }
 0x5a7   : > { %v2520_v1 = vpop.permute.xlu1 %2519  ;;  %v2512_v34 = vpop.permute.xlu0 %2511  ;;  %v1885_v63 = vmul.f32 %v6617_v14, %v8228_v35  ;;  %v2544_v35 = vsel %vm1272_vm1, %v2522_v12, 0 }
 0x5a8   : > { %v1902_v40 = vpack.c.bf16 %v1884_v19, %v1883_v61 }
 0x5a9   : > { %v6619_v51 = vpop.eup %6618 }
 0x5aa   : > { %6082 = vmatmul.mubr.msk.bf16.vlgmr.msra.gmra.mxu1 %vm476_vm0, %v1902_v40  ;;  %v1886_v50 = vmul.f32 %v6619_v51, %v8236_v45  ;;  %v6621_v30 = vpop.eup %6620 }
 0x5ab   : > { %6126 = vmatpush3.bf16.xpose.msra.mxu1 %v2547_v52  ;;  %v2510_v33 = vpop.permute.xlu1 %2509  ;;  %v2627_v25 = vpop.permute.xlu0 %2626  ;;  %v1887_v28 = vmul.f32 %v6621_v30, %v8234_v49  ;;  %v2541_v49 = vsel %vm1272_vm1, %v2520_v1, 0 }
 0x5ac   : > { %6306 = vmatprep.subr.msk.bf16.mxu1 %vm1272_vm1, %v2522_v12  ;;  %v1903_v7 = vpack.c.bf16 %v1886_v50, %v1885_v63  ;;  %v2649_v18 = vsel %vm1272_vm1, %v2627_v25, 0 }
 0x5ad   : > { %v6623_v38 = vpop.eup %6622 }
 0x5ae   : > { %6085 = vmatprep.mubr.msk.bf16.mxu1 %vm476_vm0, %v1903_v7  ;;  %v1888_v60 = vmul.f32 %v6623_v38, %v8242_v39 }
 0x5af   : > { %v2629_v26 = vpop.permute.xlu1 %2628  ;;  %v2516_v24 = vpop.permute.xlu0 %2515 }
 0x5b0   : > { %v1904_v10 = vpack.c.bf16 %v1888_v60, %v1887_v28  ;;  %v2652_v3 = vsel %vm1272_vm1, %v2629_v26, 0 }
 0x5b2   : > { %6086 = vmatmul.mubr.msk.bf16.gmra.mxu1 %vm476_vm0, %v1904_v10 }
 0x5b3   : > { %6128 = vmatpush3.bf16.xpose.msra.mxu1 %v2544_v35  ;;  %v2514_v45 = vpop.permute.xlu1 %2513  ;;  %6133 = vmatprep.mubr.msk.bf16.mxu1 %vm1272_vm1, %v2510_v33  ;;  %v2623_v54 = vpop.permute.xlu0 %2622 }
 0x5b4   : > { %6307 = vmatprep.subr.msk.bf16.mxu1 %vm1272_vm1, %v2520_v1  ;;  %v2643_v48 = vsel %vm1272_vm1, %v2623_v54, 0 }
 0x5b7   : > { %v2625_v22 = vpop.permute.xlu1 %2624  ;;  %v2617_v47 = vpop.permute.xlu0 %2616 }
 0x5b8   : > { %v2646_v8 = vsel %vm1272_vm1, %v2625_v22, 0 }
 0x5bb   : > { %6130 = vmatpush3.bf16.xpose.msra.mxu1 %v2541_v49  ;;  %v2615_v39 = vpop.permute.xlu1 %2614  ;;  %v8437_v0 = vpop.permute.xlu0 %2731 }
 0x5bc   : > { %6308 = vmatprep.subr.msk.bf16.mxu1 %vm1272_vm1, %v2518_v46  ;;  %v2754_v33 = vsel %vm1272_vm1, %v8437_v0, 0 }
 0x5bf   : > { %v2734_v29 = vpop.permute.xlu1 %2733  ;;  %v2621_v42 = vpop.permute.xlu0 %2620 }
 0x5c0   : > { %6313 = vmatprep.subr.msk.bf16.mxu0 %vm1272_vm1, %v2734_v29  ;;  %v2757_v14 = vsel %vm1272_vm1, %v2734_v29, 0 }
 0x5c3   : > { %6132 = vmatpush3.bf16.xpose.msra.mxu1 %v2538_v11  ;;  %v8442_v53 = vpop.permute.xlu0 %2727  ;;  %v2619_v62 = vpop.permute.xlu1 %2618 }
 0x5c4   : > { %6309 = vmatprep.subr.msk.bf16.mxu1 %vm1272_vm1, %v2629_v26 }
 0x5c7   : > { %v8445_v27 = vpop.permute.xlu0 %2721  ;;  %v2730_v4 = vpop.permute.xlu1 %2729 }
 0x5c8   : > { %v2751_v26 = vsel %vm1272_vm1, %v2730_v4, 0 }
 0x5ca   : > { %6134 = vmatmul.mubr.msk.bf16.vlgmr.msra.gmra.mxu1 %vm1272_vm1, %v2512_v34 }
 0x5cb   : > { %6137 = vmatprep.mubr.msk.bf16.mxu1 %vm1272_vm1, %v2514_v45  ;;  %6142 = vmatpush3.bf16.xpose.msra.mxu1 %v2652_v3  ;;  %v2837_v23 = vpop.permute.xlu0 %2836  ;;  %v8462_v56 = vpop.permute.xlu1 %2719 }
 0x5cc   : > { %6310 = vmatprep.subr.msk.bf16.mxu1 %vm1272_vm1, %v2627_v25  ;;  %v2859_v50 = vsel %vm1272_vm1, %v2837_v23, 0 }
 0x5cf   : > { %v8451_v9 = vpop.permute.xlu0 %2725  ;;  %v2839_v37 = vpop.permute.xlu1 %2838 }
 0x5d0   : > { %v2862_v16 = vsel %vm1272_vm1, %v2839_v37, 0 }
 0x5d2   : > { %6138 = vmatmul.mubr.msk.bf16.gmra.mxu1 %vm1272_vm1, %v2516_v24 }
 0x5d3   : > { %6144 = vmatpush3.bf16.xpose.msra.mxu1 %v2649_v18  ;;  %6149 = vmatprep.mubr.msk.bf16.mxu1 %vm1272_vm1, %v2615_v39  ;;  %v8456_v2 = vpop.permute.xlu0 %2832  ;;  %v8473_v44 = vpop.permute.xlu1 %2723 }
 0x5d4   : > { %6311 = vmatprep.subr.msk.bf16.mxu1 %vm1272_vm1, %v2625_v22  ;;  %v2853_v49 = vsel %vm1272_vm1, %v8456_v2, 0 }
 0x5d7   : > { %v8459_v17 = vpop.permute.xlu0 %2826  ;;  %v2835_v1 = vpop.permute.xlu1 %2834 }
 0x5d8   : > { %v2856_v60 = vsel %vm1272_vm1, %v2835_v1, 0 }
 0x5db   : > { %6146 = vmatpush3.bf16.xpose.msra.mxu1 %v2646_v8  ;;  %v8464_v5 = vpop.permute.xlu0 %2830  ;;  %v2825_v30 = vpop.permute.xlu1 %2824 }
 0x5dc   : > { %6312 = vmatprep.subr.msk.bf16.mxu1 %vm1272_vm1, %v2623_v54 }
 0x5df   : > { %v8467_v59 = vpop.permute.xlu0 %3179  ;;  %v2829_v3 = vpop.permute.xlu1 %2828 }
 0x5e1   : > { %v6035_v15 = vpop.f32.mrf.mxu0 }
 0x5e3   : > { %6148 = vmatpush3.bf16.xpose.msra.mxu1 %v2643_v48  ;;  %v1951_v13 = vpop.f32.mrf.mxu0  ;;  %v8471_v43 = vpop.permute.xlu0 %3175 }
 0x5e4   : > { %6317 = vmatprep.subr.msk.bf16.mxu1 %vm1272_vm1, %v2839_v37 }
 0x5e5   : > { %v6036_v31 = vpop.f32.mrf.mxu0 }
 0x5e6   : > { %v2214_v46 = vpack.c.bf16 %v6036_v31, %v6035_v15 }
 0x5e7   : > { %v1954_v36 = vpop.f32.mrf.mxu0  ;;  %v8478_v61 = vpop.permute.xlu0 %3173 }
 0x5e8   : > { %v2213_v12 = vpack.c.bf16 %v1954_v36, %v1951_v13 }
 0x5ea   : > { %v6039_v58 = vpop.f32.mrf.mxu0  ;;  %6150 = vmatmul.mubr.msk.bf16.vlgmr.msra.gmra.mxu1 %vm1272_vm1, %v2617_v47  ;;  %6093 = vmatprep.mubr.msk.bf16.mxu0 %vm1272_vm1, %v2213_v12 }
 0x5eb   : > { %6153 = vmatprep.mubr.msk.bf16.mxu1 %vm1272_vm1, %v2619_v62  ;;  %6174 = vmatpush3.bf16.xpose.msra.mxu1 %v2862_v16  ;;  %v8486_v51 = vpop.permute.xlu0 %3272 }
 0x5ec   : > { %v1967_v19 = vpop.f32.mrf.mxu0  ;;  %6094 = vmatmul.mubr.msk.bf16.vlgmr.msra.gmra.mxu0 %vm1272_vm1, %v2214_v46  ;;  %6318 = vmatprep.subr.msk.bf16.mxu1 %vm1272_vm1, %v2837_v23 }
 0x5ed   : > { %6158 = vmatpush3.bf16.xpose.msra.mxu0 %v2757_v14 }
 0x5ee   : > { %6314 = vmatprep.subr.msk.bf16.mxu0 %vm1272_vm1, %v8437_v0  ;;  %v6040_v34 = vpop.f32.mrf.mxu0  ;;  %v2748_v0 = vsel %vm1272_vm1, %v8442_v53, 0 }
 0x5ef   : > { %v2216_v63 = vpack.c.bf16 %v6040_v34, %v6039_v58  ;;  %v8497_v7 = vpop.permute.xlu0 %3268 }
 0x5f0   : > { %v1970_v40 = vpop.f32.mrf.mxu0 }
 0x5f1   : > { %v2215_v52 = vpack.c.bf16 %v1970_v40, %v1967_v19 }
 0x5f2   : > { %6154 = vmatmul.mubr.msk.bf16.gmra.mxu1 %vm1272_vm1, %v2621_v42 }
 0x5f3   : > { %6097 = vmatprep.mubr.msk.bf16.mxu0 %vm1272_vm1, %v2215_v52  ;;  %6176 = vmatpush3.bf16.xpose.msra.mxu1 %v2859_v50  ;;  %v8503_v10 = vpop.permute.xlu0 %3266  ;;  %v5682_v52 = vld [vmem:[%s9881_s1 + $0x28] sm:$0xff]   ;;  %v5681_v50 = vld [vmem:[%s9881_s1 + $0x20] sm:$0xff]  }
 0x5f4   : > { %6181 = vmatprep.mubr.msk.bf16.mxu1 %vm1272_vm1, %v2825_v30  ;;  %6098 = vmatmul.mubr.msk.bf16.gmra.mxu0 %vm1272_vm1, %v2216_v63  ;;  %v3178_v63 = vpop.permute.xlu1 %3177  ;;  %v8542_v30 = vunpack.c.l.bf16 %v5682_v52 }
 0x5f5   : > { %6160 = vmatpush3.bf16.xpose.msra.mxu0 %v2754_v33  ;;  %6319 = vmatprep.subr.msk.bf16.mxu1 %vm1272_vm1, %v2835_v1 }
 0x5f6   : > { %6315 = vmatprep.subr.msk.bf16.mxu0 %vm1272_vm1, %v2730_v4  ;;  %v6051_v25 = vpop.f32.mrf.mxu1 }
 0x5f7   : > { %v3366_v39 = vpop.permute.xlu0 %3365 }
 0x5f8   : > { %v2028_v38 = vpop.f32.mrf.mxu1 }
 0x5fa   : > { %v6052_v28 = vpop.f32.mrf.mxu1 }
 0x5fb   : > { %6178 = vmatpush3.bf16.xpose.msra.mxu1 %v2856_v60  ;;  %v2218_v45 = vpack.c.bf16 %v6052_v28, %v6051_v25  ;;  %v8548_v25 = vunpack.c.h.bf16 %v5682_v52  ;;  %v8557_v60 = vunpack.c.h.bf16 %v5681_v50 }
 0x5fc   : > { %6320 = vmatprep.subr.msk.bf16.mxu1 %vm1272_vm1, %v8456_v2  ;;  %v2031_v24 = vpop.f32.mrf.mxu1 }
 0x5fd   : > { %6162 = vmatpush3.bf16.xpose.msra.mxu0 %v2751_v26  ;;  %v2217_v35 = vpack.c.bf16 %v2031_v24, %v2028_v38  ;;  %v5683_v24 = vld [vmem:[%s9881_s1 + $0x30] sm:$0xff]  }
 0x5fe   : > { %6316 = vmatprep.subr.msk.bf16.mxu0 %vm1272_vm1, %v8442_v53  ;;  %v6055_v54 = vpop.f32.mrf.mxu1 }
 0x5ff   : > { %6101 = vmatprep.mubr.msk.bf16.mxu0 %vm1272_vm1, %v2217_v35 }
 0x600   : > { %v2044_v22 = vpop.f32.mrf.mxu1  ;;  %6102 = vmatmul.mubr.msk.bf16.gmra.mxu0 %vm1272_vm1, %v2218_v45 }
 0x602   : > { %v6056_v47 = vpop.f32.mrf.mxu1 }
 0x603   : > { %6180 = vmatpush3.bf16.xpose.msra.mxu1 %v2853_v49  ;;  %v2220_v11 = vpack.c.bf16 %v6056_v47, %v6055_v54  ;;  %v8568_v47 = vunpack.c.l.bf16 %v5683_v24 }
 0x604   : > { %6221 = vmatprep.subr.bf16.mxu1 %v3366_v39  ;;  %v2047_v29 = vpop.f32.mrf.mxu1 }
 0x605   : > { %6164 = vmatpush3.bf16.xpose.msra.mxu0 %v2748_v0  ;;  %v2219_v42 = vpack.c.bf16 %v2047_v29, %v2044_v22 }
 0x606   : > { %6189 = vmatprep.subr.bf16.mxu0 %v8467_v59 }
 0x607   : > { %6105 = vmatprep.mubr.msk.bf16.mxu0 %vm1272_vm1, %v2219_v42 }
 0x608   : > { %6106 = vmatmul.mubr.msk.bf16.gmra.mxu0 %vm1272_vm1, %v2220_v11 }
 0x60a   : > { %6182 = vmatmul.mubr.msk.bf16.vlgmr.msra.gmra.mxu1 %vm1272_vm1, %v8459_v17 }
 0x60b   : > { %6185 = vmatprep.mubr.msk.bf16.mxu1 %vm1272_vm1, %v2829_v3  ;;  %6222 = vmatpush3.bf16.msra.mxu1 %v3366_v39 }
 0x612   : > { %6186 = vmatmul.mubr.msk.bf16.gmra.mxu1 %vm1272_vm1, %v8464_v5 }
 0x628   : > { %v6067_v53 = vpop.f32.mrf.mxu0 }
 0x62a   : > { %v2105_v23 = vpop.f32.mrf.mxu0 }
 0x62c   : > { %v6068_v62 = vpop.f32.mrf.mxu0 }
 0x62d   : > { %v2222_v4 = vpack.c.bf16 %v6068_v62, %v6067_v53  ;;  %v8576_v62 = vunpack.c.h.bf16 %v5683_v24 }
 0x62e   : > { %v2108_v18 = vpop.f32.mrf.mxu0 }
 0x62f   : > { %v2221_v2 = vpack.c.bf16 %v2108_v18, %v2105_v23 }
 0x630   : > { %v6071_v8 = vpop.f32.mrf.mxu0 }
 0x631   : > { %6109 = vmatprep.mubr.msk.bf16.mxu0 %vm1272_vm1, %v2221_v2 }
 0x632   : > { %v2121_v37 = vpop.f32.mrf.mxu0  ;;  %6110 = vmatmul.mubr.msk.bf16.gmra.mxu0 %vm1272_vm1, %v2222_v4 }
 0x634   : > { %v6072_v15 = vpop.f32.mrf.mxu0 }
 0x635   : > { %v2224_v13 = vpack.c.bf16 %v6072_v15, %v6071_v8 }
 0x636   : > { %v2124_v17 = vpop.f32.mrf.mxu0 }
 0x637   : > { %v2223_v48 = vpack.c.bf16 %v2124_v17, %v2121_v37 }
 0x639   : > { %6113 = vmatprep.mubr.msk.bf16.mxu0 %vm1272_vm1, %v2223_v48 }
 0x63a   : > { %6114 = vmatmul.mubr.msk.bf16.gmra.mxu0 %vm1272_vm1, %v2224_v13 }
 0x66a   : > { %v6083_v5 = vpop.f32.mrf.mxu1 }
 0x66c   : > { %v2182_v31 = vpop.f32.mrf.mxu1 }
 0x66e   : > { %v6084_v36 = vpop.f32.mrf.mxu1 }
 0x66f   : > { %v2226_v58 = vpack.c.bf16 %v6084_v36, %v6083_v5 }
 0x670   : > { %v2185_v12 = vpop.f32.mrf.mxu1 }
 0x671   : > { %v2225_v46 = vpack.c.bf16 %v2185_v12, %v2182_v31 }
 0x672   : > { %v6087_v16 = vpop.f32.mrf.mxu1 }
 0x673   : > { %6117 = vmatprep.mubr.msk.bf16.mxu0 %vm1272_vm1, %v2225_v46 }
 0x674   : > { %v2198_v19 = vpop.f32.mrf.mxu1  ;;  %6118 = vmatmul.mubr.msk.bf16.gmra.mxu0 %vm1272_vm1, %v2226_v58 }
 0x676   : > { %v6088_v14 = vpop.f32.mrf.mxu1 }
 0x677   : > { %v2228_v40 = vpack.c.bf16 %v6088_v14, %v6087_v16 }
 0x678   : > { %v2201_v1 = vpop.f32.mrf.mxu1 }
 0x679   : > { %v2227_v34 = vpack.c.bf16 %v2201_v1, %v2198_v19 }
 0x67b   : > { %6121 = vmatprep.mubr.msk.bf16.mxu0 %vm1272_vm1, %v2227_v34 }
 0x67c   : > { %6122 = vmatmul.mubr.msk.bf16.gmra.mxu0 %vm1272_vm1, %v2228_v40 }
 0x67d   : > { %6165 = vmatprep.mubr.msk.bf16.mxu0 %vm1272_vm1, %v8462_v56  ;;  %v8544_v56 = vunpack.c.l.bf16 %v5681_v50 }
 0x684   : > { %6166 = vmatmul.mubr.msk.bf16.vlgmr.msra.gmra.mxu0 %vm1272_vm1, %v8445_v27 }
 0x685   : > { %6190 = vmatpush3.bf16.msra.mxu0 %v8467_v59  ;;  %6169 = vmatprep.mubr.msk.bf16.mxu0 %vm1272_vm1, %v8473_v44  ;;  %v5684_v44 = vld [vmem:[%s9881_s1 + $0x38] sm:$0xff]  }
 0x686   : > { %6191 = vmatprep.subr.bf16.mxu0 %v3178_v63  ;;  %v8564_v45 = vunpack.c.l.bf16 %v5684_v44  ;;  %v8572_v29 = vunpack.c.h.bf16 %v5684_v44 }
 0x689   : > { %6192 = vmatpush3.bf16.msra.mxu0 %v3178_v63 }
 0x68a   : > { %v6135_v27 = vpop.f32.mrf.mxu1  ;;  %6193 = vmatprep.subr.bf16.mxu0 %v8471_v43 }
 0x68b   : > { %v2592_v33 = vadd.f32 %v6135_v27, %v8542_v30 }
 0x68c   : > { %v2583_v59 = vpop.f32.mrf.mxu1  ;;  %6170 = vmatmul.mubr.msk.bf16.gmra.mxu0 %vm1272_vm1, %v8451_v9 }
 0x68d   : > { %v2933_v38 = vmul.f32 1.442695, %v2592_v33  ;;  %v2584_v28 = vadd.f32 %v8544_v56, %v2583_v59  ;;  %6194 = vmatpush3.bf16.msra.mxu0 %v8471_v43 }
 0x68e   : > { %v6136_v26 = vpop.f32.mrf.mxu1  ;;  %6195 = vmatprep.subr.bf16.mxu0 %v8478_v61 }
 0x68f   : > { %6624 = vpow2.f32 %v2933_v38  ;;  %v2929_v9 = vmul.f32 1.442695, %v2584_v28  ;;  %v2595_v35 = vadd.f32 %v6136_v26, %v8548_v25 }
 0x690   : > { %v2586_v54 = vpop.f32.mrf.mxu1 }
 0x691   : > { %6626 = vpow2.f32 %v2929_v9  ;;  %v2935_v22 = vmul.f32 1.442695, %v2595_v35  ;;  %v2587_v43 = vadd.f32 %v8557_v60, %v2586_v54  ;;  %6196 = vmatpush3.bf16.msra.mxu0 %v8478_v61 }
 0x692   : > { %v6139_v49 = vpop.f32.mrf.mxu1  ;;  %6205 = vmatprep.subr.bf16.mxu0 %v8486_v51 }
 0x693   : > { %6628 = vpow2.f32 %v2935_v22  ;;  %v2931_v39 = vmul.f32 1.442695, %v2587_v43  ;;  %v2608_v0 = vadd.f32 %v6139_v49, %v8564_v45 }
 0x694   : > { %v2599_v42 = vpop.f32.mrf.mxu1 }
 0x695   : > { %6630 = vpow2.f32 %v2931_v39  ;;  %v2941_v11 = vmul.f32 1.442695, %v2608_v0  ;;  %v2600_v3 = vadd.f32 %v8568_v47, %v2599_v42 }
 0x696   : > { %v6140_v53 = vpop.f32.mrf.mxu1 }
 0x697   : > { %6632 = vpow2.f32 %v2941_v11  ;;  %v2937_v23 = vmul.f32 1.442695, %v2600_v3  ;;  %v2611_v61 = vadd.f32 %v6140_v53, %v8572_v29 }
 0x698   : > { %v2602_v18 = vpop.f32.mrf.mxu1 }
 0x699   : > { %6634 = vpow2.f32 %v2937_v23  ;;  %v2943_v2 = vmul.f32 1.442695, %v2611_v61  ;;  %v2603_v4 = vadd.f32 %v8576_v62, %v2602_v18 }
 0x69b   : > { %6636 = vpow2.f32 %v2943_v2  ;;  %v2939_v17 = vmul.f32 1.442695, %v2603_v4 }
 0x69c   : > { %v8579_v8 = vpop.eup %6624 }
 0x69d   : > { %v2999_v37 = vsel %vm476_vm0, %v8579_v8, 0.0  ;;  %6638 = vpow2.f32 %v2939_v17 }
 0x69e   : > { %v8583_v15 = vpop.eup %6626  ;;  %3000 = vadd.xlane.f32.xlu0 %v2999_v37 }
 0x69f   : > { %v2993_v48 = vsel %vm476_vm0, %v8583_v15, 0.0 }
 0x6a0   : > { %v8587_v13 = vpop.eup %6628  ;;  %2994 = vadd.xlane.f32.xlu1 %v2993_v48 }
 0x6a1   : > { %v3002_v36 = vsel %vm476_vm0, %v8587_v13, 0.0 }
 0x6a2   : > { %v8589_v5 = vpop.eup %6630 }
 0x6a3   : > { %v2996_v31 = vsel %vm476_vm0, %v8589_v5, 0.0 }
 0x6a4   : > { %v8595_v12 = vpop.eup %6632  ;;  %2997 = vadd.xlane.f32.xlu0 %v2996_v31  ;;  %3003 = vadd.xlane.f32.xlu1 %v3002_v36 }
 0x6a5   : > { %v3011_v46 = vsel %vm476_vm0, %v8595_v12, 0.0 }
 0x6a6   : > { %v8599_v58 = vpop.eup %6634 }
 0x6a7   : > { %v3005_v16 = vsel %vm476_vm0, %v8599_v58, 0.0 }
 0x6a8   : > { %3012 = vadd.xlane.f32.xlu1 %v3011_v46  ;;  %v8603_v19 = vpop.eup %6636 }
 0x6a9   : > { %v3014_v1 = vsel %vm476_vm0, %v8603_v19, 0.0 }
 0x6aa   : > { %v6151_v14 = vpop.f32.mrf.mxu1  ;;  %v8607_v34 = vpop.eup %6638 }
 0x6ab   : > { %v3008_v52 = vsel %vm476_vm0, %v8607_v34, 0.0  ;;  %v2697_v33 = vadd.f32 %v6151_v14, %v8542_v30 }
 0x6ac   : > { %3006 = vadd.xlane.f32.xlu1 %v3005_v16  ;;  %v2688_v40 = vpop.f32.mrf.mxu1  ;;  %v8633_v23 = vpop.f32.mrf.mxu0 }
 0x6ad   : > { %v2949_v44 = vmul.f32 1.442695, %v2697_v33  ;;  %v2689_v38 = vadd.f32 %v8544_v56, %v2688_v40 }
 0x6ae   : > { %v6152_v63 = vpop.f32.mrf.mxu1  ;;  %v8640_v17 = vpop.f32.mrf.mxu0 }
 0x6af   : > { %6640 = vpow2.f32 %v2949_v44  ;;  %v2945_v26 = vmul.f32 1.442695, %v2689_v38  ;;  %v2700_v24 = vadd.f32 %v6152_v63, %v8548_v25 }
 0x6b0   : > { %3015 = vadd.xlane.f32.xlu1 %v3014_v1  ;;  %v2691_v50 = vpop.f32.mrf.mxu1  ;;  %v8645_v16 = vpop.f32.mrf.mxu0 }
 0x6b1   : > { %6642 = vpow2.f32 %v2945_v26  ;;  %v2951_v35 = vmul.f32 1.442695, %v2700_v24  ;;  %v2692_v54 = vadd.f32 %v8557_v60, %v2691_v50 }
 0x6b2   : > { %v6155_v27 = vpop.f32.mrf.mxu1  ;;  %v8650_v63 = vpop.f32.mrf.mxu0 }
 0x6b3   : > { %6644 = vpow2.f32 %v2951_v35  ;;  %v2947_v43 = vmul.f32 1.442695, %v2692_v54  ;;  %v2713_v49 = vadd.f32 %v6155_v27, %v8564_v45 }
 0x6b4   : > { %3009 = vadd.xlane.f32.xlu1 %v3008_v52  ;;  %v2704_v59 = vpop.f32.mrf.mxu1  ;;  %v8657_v38 = vpop.f32.mrf.mxu0 }
 0x6b5   : > { %6646 = vpow2.f32 %v2947_v43  ;;  %v2957_v0 = vmul.f32 1.442695, %v2713_v49  ;;  %v2705_v42 = vadd.f32 %v8568_v47, %v2704_v59 }
 0x6b6   : > { %v6156_v28 = vpop.f32.mrf.mxu1  ;;  %v8664_v35 = vpop.f32.mrf.mxu0 }
 0x6b7   : > { %6648 = vpow2.f32 %v2957_v0  ;;  %v2953_v61 = vmul.f32 1.442695, %v2705_v42  ;;  %v2716_v18 = vadd.f32 %v6156_v28, %v8572_v29 }
 0x6b8   : > { %v2707_v9 = vpop.f32.mrf.mxu1  ;;  %v8671_v42 = vpop.f32.mrf.mxu0 }
 0x6b9   : > { %6650 = vpow2.f32 %v2953_v61  ;;  %v2959_v48 = vmul.f32 1.442695, %v2716_v18  ;;  %v2708_v31 = vadd.f32 %v8576_v62, %v2707_v9 }
 0x6ba   : > { %3361 = vrot.lane.b32.xlu0 %v8266_v6, %s7093_s28 }
 0x6bb   : > { %6652 = vpow2.f32 %v2959_v48  ;;  %v2955_v14 = vmul.f32 1.442695, %v2708_v31 }
 0x6bc   : > { %v8624_v39 = vpop.eup %6640 }
 0x6bd   : > { %v3023_v11 = vsel %vm476_vm0, %v8624_v39, 0.0  ;;  %6654 = vpow2.f32 %v2955_v14 }
 0x6be   : > { %v8631_v3 = vpop.eup %6642 }
 0x6bf   : > { %v3017_v2 = vsel %vm476_vm0, %v8631_v3, 0.0 }
 0x6c0   : > { %v8638_v4 = vpop.eup %6644 }
 0x6c1   : > { %v3026_v36 = vsel %vm476_vm0, %v8638_v4, 0.0 }
 0x6c2   : > { %v8648_v40 = vpop.eup %6646 }
 0x6c3   : > { %v3020_v33 = vsel %vm476_vm0, %v8648_v40, 0.0 }
 0x6c4   : > { %v8655_v59 = vpop.eup %6648 }
 0x6c5   : > { %3363 = vrot.lane.b32.xlu1 %v8257_v55, %s7093_s28  ;;  %v3035_v24 = vsel %vm476_vm0, %v8655_v59, 0.0 }
 0x6c6   : > { %v8662_v9 = vpop.eup %6650 }
 0x6c7   : > { %v3029_v49 = vsel %vm476_vm0, %v8662_v9, 0.0 }
 0x6c8   : > { %v8669_v0 = vpop.eup %6652 }
 0x6c9   : > { %v3038_v61 = vsel %vm476_vm0, %v8669_v0, 0.0 }
 0x6ca   : > { %v8618_v6 = vpop.f32.mrf.mxu1  ;;  %v8676_v18 = vpop.eup %6654 }
 0x6cb   : > { %v3032_v31 = vsel %vm476_vm0, %v8676_v18, 0.0 }
 0x6cc   : > { %v8621_v22 = vpop.f32.mrf.mxu1 }
 0x6ce   : > { %v8626_v55 = vpop.f32.mrf.mxu1 }
 0x6d0   : > { %v2901_v53 = vpop.f32.mrf.mxu1 }
 0x6d1   : > { %v2902_v1 = vadd.f32 %v8557_v60, %v2901_v53 }
 0x6d2   : > { %v6187_v37 = vpop.f32.mrf.mxu1 }
 0x6d3   : > { %v2979_v50 = vmul.f32 1.442695, %v2902_v1  ;;  %v2923_v54 = vadd.f32 %v6187_v37, %v8564_v45 }
 0x6d4   : > { %v2914_v46 = vpop.f32.mrf.mxu1 }
 0x6d5   : > { %v2915_v27 = vadd.f32 %v8568_v47, %v2914_v46  ;;  %6656 = vpow2.f32 %v2979_v50 }
 0x6d6   : > { %v6188_v52 = vpop.f32.mrf.mxu1 }
 0x6d7   : > { %v2985_v28 = vmul.f32 1.442695, %v2915_v27  ;;  %v2926_v53 = vadd.f32 %v6188_v52, %v8572_v29 }
 0x6d8   : > { %v2917_v44 = vpop.f32.mrf.mxu1 }
 0x6d9   : > { %3024 = vadd.xlane.f32.xlu0 %v3023_v11  ;;  %v2918_v26 = vadd.f32 %v8576_v62, %v2917_v44  ;;  %6658 = vpow2.f32 %v2985_v28  ;;  %v2989_v11 = vmul.f32 1.442695, %v2923_v54  ;;  %v2991_v48 = vmul.f32 1.442695, %v2926_v53 }
 0x6db   : > { %v2987_v43 = vmul.f32 1.442695, %v2918_v26 }
 0x6dd   : > { %3018 = vadd.xlane.f32.xlu0 %v3017_v2  ;;  %6660 = vpow2.f32 %v2987_v43  ;;  %v8678_v2 = vpop.f32.mrf.mxu0 }
 0x6de   : > { %10037 = vst [vmem:[#allocation32_spill] sm:$0xff] %v8678_v2  ;;  %6662 = vpow2.f32 %v2989_v11 }
 0x6df   : > { %v8680_v37 = vpop.f32.mrf.mxu0  ;;  %6664 = vpow2.f32 %v2991_v48 }
 0x6e0   : > { %10038 = vst [vmem:[#allocation31_spill] sm:$0xff] %v8680_v37 }
 0x6e1   : > { %3027 = vadd.xlane.f32.xlu0 %v3026_v36  ;;  %v8686_v46 = vpop.f32.mrf.mxu0 }
 0x6e2   : > { %v8684_v36 = vpop.eup %6656  ;;  %10039 = vst [vmem:[#allocation33_spill] sm:$0xff] %v8686_v46 }
 0x6e3   : > { %v3068_v14 = vsel %vm476_vm0, %v8684_v36, 0.0  ;;  %v8692_v52 = vpop.f32.mrf.mxu0 }
 0x6e4   : > { %10040 = vst [vmem:[#allocation36_spill] sm:$0xff] %v8692_v52 }
 0x6e6   : > { %v8690_v1 = vpop.eup %6658 }
 0x6e7   : > { %v3077_v50 = vsel %vm476_vm0, %v8690_v1, 0.0 }
 0x6e9   : > { %3021 = vadd.xlane.f32.xlu1 %v3020_v33  ;;  %v8698_v33 = vpop.f32.mrf.mxu0 }
 0x6ea   : > { %v8696_v27 = vpop.eup %6660  ;;  %10041 = vst [vmem:[#allocation34_spill] sm:$0xff] %v8698_v33 }
 0x6eb   : > { %v3080_v44 = vsel %vm476_vm0, %v8696_v27, 0.0  ;;  %v8702_v28 = vpop.eup %6662  ;;  %v8704_v26 = vpop.f32.mrf.mxu0 }
 0x6ec   : > { %10042 = vst [vmem:[#allocation38_spill] sm:$0xff] %v8704_v26  ;;  %v8708_v54 = vpop.eup %6664 }
 0x6ed   : > { %3036 = vadd.xlane.f32.xlu1 %v3035_v24  ;;  %v3083_v24 = vsel %vm476_vm0, %v8702_v28, 0.0  ;;  %v8710_v43 = vpop.f32.mrf.mxu0 }
 0x6ee   : > { %10043 = vst [vmem:[#allocation35_spill] sm:$0xff] %v8710_v43 }
 0x6ef   : > { %v8714_v11 = vpop.f32.mrf.mxu0 }
 0x6f0   : > { %10044 = vst [vmem:[#allocation47_spill] sm:$0xff] %v8714_v11 }
 0x6f1   : > { %3030 = vadd.xlane.f32.xlu1 %v3029_v49  ;;  %v3086_v49 = vsel %vm476_vm0, %v8708_v54, 0.0  ;;  %v8716_v53 = vpop.f32.mrf.mxu0 }
 0x6f2   : > { %10045 = vst [vmem:[#allocation46_spill] sm:$0xff] %v8716_v53 }
 0x6f5   : > { %3039 = vadd.xlane.f32.xlu1 %v3038_v61  ;;  %v8718_v61 = vpop.f32.mrf.mxu0 }
 0x6f6   : > { %10046 = vst [vmem:[#allocation48_spill] sm:$0xff] %v8718_v61 }
 0x6f7   : > { %v8720_v48 = vpop.f32.mrf.mxu0 }
 0x6f8   : > { %10047 = vst [vmem:[#allocation39_spill] sm:$0xff] %v8720_v48 }
 0x6f9   : > { %3033 = vadd.xlane.f32.xlu1 %v3032_v31  ;;  %v8722_v31 = vpop.f32.mrf.mxu0 }
 0x6fa   : > { %10048 = vst [vmem:[#allocation37_spill] sm:$0xff] %v8722_v31 }
 0x6fd   : > { %3069 = vadd.xlane.f32.xlu1 %v3068_v14  ;;  %v8724_v14 = vpop.f32.mrf.mxu0 }
 0x6fe   : > { %10049 = vst [vmem:[#allocation49_spill] sm:$0xff] %v8724_v14 }
 0x701   : > { %3078 = vadd.xlane.f32.xlu1 %v3077_v50  ;;  %v3271_v50 = vpop.permute.xlu1 %3270 }
 0x705   : > { %3081 = vadd.xlane.f32.xlu1 %v3080_v44  ;;  %v8726_v44 = vpop.f32.mrf.mxu0 }
 0x706   : > { %10050 = vst [vmem:[#allocation51_spill] sm:$0xff] %v8726_v44 }
 0x707   : > { %v8728_v26 = vpop.f32.mrf.mxu0 }
 0x708   : > { %10051 = vst [vmem:[#allocation43_spill] sm:$0xff] %v8728_v26 }
 0x709   : > { %3084 = vadd.xlane.f32.xlu1 %v3083_v24  ;;  %v8730_v53 = vpop.f32.mrf.mxu0 }
 0x70a   : > { %10052 = vst [vmem:[#allocation40_spill] sm:$0xff] %v8730_v53 }
 0x70b   : > { %v8732_v61 = vpop.f32.mrf.mxu0 }
 0x70c   : > { %10053 = vst [vmem:[#allocation50_spill] sm:$0xff] %v8732_v61 }
 0x70d   : > { %3087 = vadd.xlane.f32.xlu1 %v3086_v49 }
 0x727   : > { %v3001_v24 = vpop.xlane.xlu0 %3000 }
 0x728   : > { %6666 = vrcp.f32 %v3001_v24 }
 0x729   : > { %v2995_v43 = vpop.xlane.xlu1 %2994 }
 0x72a   : > { %6668 = vrcp.f32 %v2995_v43 }
 0x72d   : > { %v3004_v49 = vpop.xlane.xlu1 %3003  ;;  %v2998_v11 = vpop.xlane.xlu0 %2997 }
 0x72e   : > { %6670 = vrcp.f32 %v3004_v49 }
 0x72f   : > { %6672 = vrcp.f32 %v2998_v11 }
 0x731   : > { %v3013_v48 = vpop.xlane.xlu1 %3012 }
 0x734   : > { %v8734_v31 = vpop.f32.mrf.mxu0 }
 0x735   : > { %10054 = vst [vmem:[#allocation52_spill] sm:$0xff] %v8734_v31  ;;  %v3007_v14 = vpop.xlane.xlu1 %3006  ;;  %v6667_v52 = vpop.eup %6666 }
 0x736   : > { %v8736_v33 = vpop.f32.mrf.mxu0  ;;  %v3123_v11 = vmul.f32 %v6667_v52, %v8579_v8 }
 0x737   : > { %10055 = vst [vmem:[#allocation41_spill] sm:$0xff] %v8736_v33  ;;  %v6669_v24 = vpop.eup %6668 }
 0x738   : > { %v8738_v44 = vpop.f32.mrf.mxu0  ;;  %v3121_v33 = vmul.f32 %v6669_v24, %v8583_v15 }
 0x739   : > { %10056 = vst [vmem:[#allocation42_spill] sm:$0xff] %v8738_v44  ;;  %v3016_v26 = vpop.xlane.xlu1 %3015 }
 0x73a   : > { %v8740_v43 = vpop.f32.mrf.mxu0  ;;  %6674 = vrcp.f32 %v3016_v26 }
 0x73b   : > { %10057 = vst [vmem:[#allocation44_spill] sm:$0xff] %v8740_v43  ;;  %v6671_v46 = vpop.eup %6670  ;;  %6676 = vrcp.f32 %v3007_v14 }
 0x73c   : > { %v6673_v53 = vpop.eup %6672  ;;  %v3124_v49 = vmul.f32 %v6671_v46, %v8587_v13  ;;  %v8744_v61 = vpop.f32.mrf.mxu0  ;;  %6678 = vrcp.f32 %v3013_v48 }
 0x73d   : > { %v3010_v31 = vpop.xlane.xlu1 %3009  ;;  %v3122_v44 = vmul.f32 %v6673_v53, %v8589_v5  ;;  %v3362_v46 = vpop.permute.xlu0 %3361 }
 0x73e   : > { %v3154_v37 = vpack.c.bf16 %v3124_v49, %v3123_v11  ;;  %6680 = vrcp.f32 %v3010_v31  ;;  %v8748_v2 = vpop.f32.mrf.mxu0 }
 0x73f   : > { %v3153_v43 = vpack.c.bf16 %v3122_v44, %v3121_v33 }
 0x740   : > { %v8750_v26 = vpop.f32.mrf.mxu0 }
 0x741   : > { %6197 = vmatprep.mubr.msk.bf16.mxu0 %vm476_vm0, %v3153_v43  ;;  %v3364_v8 = vpop.permute.xlu1 %3363 }
 0x742   : > { %6198 = vmatmul.mubr.msk.bf16.vlgmr.msra.gmra.mxu0 %vm476_vm0, %v3154_v37  ;;  %6223 = vmatprep.subr.bf16.mxu1 %v3364_v8  ;;  %v8754_v13 = vpop.f32.mrf.mxu0 }
 0x743   : > { %6206 = vmatpush3.bf16.msra.mxu0 %v8486_v51  ;;  %6224 = vmatpush3.bf16.msra.mxu1 %v3364_v8 }
 0x744   : > { %6207 = vmatprep.subr.bf16.mxu0 %v3271_v50  ;;  %6225 = vmatprep.subr.bf16.mxu1 %v3362_v46  ;;  %v6167_v15 = vpop.f32.mrf.mxu0 }
 0x745   : > { %v2802_v5 = vadd.f32 %v6167_v15, %v8542_v30 }
 0x746   : > { %v2793_v52 = vpop.f32.mrf.mxu0 }
 0x747   : > { %v2965_v33 = vmul.f32 1.442695, %v2802_v5  ;;  %6208 = vmatpush3.bf16.msra.mxu0 %v3271_v50  ;;  %v2794_v53 = vadd.f32 %v8544_v56, %v2793_v52  ;;  %6226 = vmatpush3.bf16.msra.mxu1 %v3362_v46  ;;  %v6675_v48 = vpop.eup %6674 }
 0x748   : > { %6209 = vmatprep.subr.bf16.mxu0 %v8497_v7  ;;  %v6168_v37 = vpop.f32.mrf.mxu0  ;;  %v6677_v31 = vpop.eup %6676  ;;  %v3128_v49 = vmul.f32 %v6675_v48, %v8603_v19 }
 0x749   : > { %6682 = vpow2.f32 %v2965_v33  ;;  %v2961_v14 = vmul.f32 1.442695, %v2794_v53  ;;  %v2805_v51 = vadd.f32 %v6168_v37, %v8548_v25  ;;  %v6679_v44 = vpop.eup %6678  ;;  %v3125_v46 = vmul.f32 %v6677_v31, %v8599_v58 }
 0x74a   : > { %v2796_v24 = vpop.f32.mrf.mxu0  ;;  %v3127_v33 = vmul.f32 %v6679_v44, %v8595_v12 }
 0x74b   : > { %v6681_v43 = vpop.eup %6680  ;;  %6684 = vpow2.f32 %v2961_v14  ;;  %v2967_v11 = vmul.f32 1.442695, %v2805_v51  ;;  %6210 = vmatpush3.bf16.msra.mxu0 %v8497_v7  ;;  %v2797_v50 = vadd.f32 %v8557_v60, %v2796_v24 }
 0x74c   : > { %6211 = vmatprep.subr.bf16.mxu0 %v8503_v10  ;;  %v6171_v8 = vpop.f32.mrf.mxu0  ;;  %v3126_v15 = vmul.f32 %v6681_v43, %v8607_v34  ;;  %v3156_v19 = vpack.c.bf16 %v3128_v49, %v3127_v33 }
 0x74d   : > { %v2963_v5 = vmul.f32 1.442695, %v2797_v50  ;;  %v2818_v52 = vadd.f32 %v6171_v8, %v8564_v45  ;;  %6686 = vpow2.f32 %v2967_v11 }
 0x74e   : > { %v2809_v53 = vpop.f32.mrf.mxu0  ;;  %v3155_v37 = vpack.c.bf16 %v3126_v15, %v3125_v46 }
 0x74f   : > { %6688 = vpow2.f32 %v2963_v5  ;;  %v2973_v7 = vmul.f32 1.442695, %v2818_v52  ;;  %6212 = vmatpush3.bf16.msra.mxu0 %v8503_v10  ;;  %v2810_v60 = vadd.f32 %v8568_v47, %v2809_v53 }
 0x750   : > { %6201 = vmatprep.mubr.msk.bf16.mxu0 %vm476_vm0, %v3155_v37  ;;  %v6172_v58 = vpop.f32.mrf.mxu0 }
 0x751   : > { %6690 = vpow2.f32 %v2973_v7  ;;  %v2969_v34 = vmul.f32 1.442695, %v2810_v60  ;;  %v2821_v48 = vadd.f32 %v6172_v58, %v8572_v29  ;;  %6202 = vmatmul.mubr.msk.bf16.gmra.mxu0 %vm476_vm0, %v3156_v19  ;;  %v2899_v58 = vadd.f32 %v8544_v56, %v8621_v22 }
 0x752   : > { %v2812_v45 = vpop.f32.mrf.mxu0 }
 0x753   : > { %6692 = vpow2.f32 %v2969_v34  ;;  %v2975_v12 = vmul.f32 1.442695, %v2821_v48  ;;  %v2813_v31 = vadd.f32 %v8576_v62, %v2812_v45 }
 0x755   : > { %6694 = vpow2.f32 %v2975_v12  ;;  %v2971_v51 = vmul.f32 1.442695, %v2813_v31 }
 0x756   : > { %v8775_v14 = vpop.eup %6682 }
 0x757   : > { %v3047_v10 = vsel %vm476_vm0, %v8775_v14, 0.0  ;;  %6696 = vpow2.f32 %v2971_v51  ;;  %v2977_v51 = vmul.f32 1.442695, %v2899_v58 }
 0x758   : > { %v8779_v47 = vpop.eup %6684  ;;  %3048 = vadd.xlane.f32.xlu0 %v3047_v10  ;;  %v2907_v10 = vadd.f32 %v8618_v6, %v8542_v30  ;;  %v2910_v30 = vadd.f32 %v8626_v55, %v8548_v25 }
 0x759   : > { %v3041_v29 = vsel %vm476_vm0, %v8779_v47, 0.0 }
 0x75a   : > { %v8781_v44 = vpop.eup %6686 }
 0x75b   : > { %v3050_v11 = vsel %vm476_vm0, %v8781_v44, 0.0 }
 0x75c   : > { %v8785_v24 = vpop.eup %6688  ;;  %3042 = vadd.xlane.f32.xlu0 %v3041_v29 }
 0x75d   : > { %v3044_v62 = vsel %vm476_vm0, %v8785_v24, 0.0 }
 0x75e   : > { %v8789_v43 = vpop.eup %6690  ;;  %3045 = vadd.xlane.f32.xlu1 %v3044_v62 }
 0x75f   : > { %v3059_v50 = vsel %vm476_vm0, %v8789_v43, 0.0 }
 0x760   : > { %3051 = vadd.xlane.f32.xlu0 %v3050_v11  ;;  %v8795_v49 = vpop.eup %6692 }
 0x761   : > { %v3053_v46 = vsel %vm476_vm0, %v8795_v49, 0.0 }
 0x762   : > { %v3025_v8 = vpop.xlane.xlu0 %3024  ;;  %3060 = vadd.xlane.f32.xlu1 %v3059_v50  ;;  %v8799_v15 = vpop.eup %6694 }
 0x763   : > { %v3062_v52 = vsel %vm476_vm0, %v8799_v15, 0.0 }
 0x764   : > { %v8803_v33 = vpop.eup %6696 }
 0x765   : > { %v3056_v37 = vsel %vm476_vm0, %v8803_v33, 0.0 }
 0x766   : > { %3054 = vadd.xlane.f32.xlu1 %v3053_v46  ;;  %v3019_v5 = vpop.xlane.xlu0 %3018 }
 0x76a   : > { %3063 = vadd.xlane.f32.xlu1 %v3062_v52  ;;  %v3028_v53 = vpop.xlane.xlu0 %3027 }
 0x76b   : > { %6698 = vrcp.f32 %v3028_v53 }
 0x76c   : > { %6700 = vrcp.f32 %v3019_v5 }
 0x76d   : > { %6702 = vrcp.f32 %v3025_v8 }
 0x76e   : > { %3057 = vadd.xlane.f32.xlu1 %v3056_v37 }
 0x772   : > { %v3022_v7 = vpop.xlane.xlu1 %3021 }
 0x773   : > { %6704 = vrcp.f32 %v3022_v7 }
 0x776   : > { %v3037_v60 = vpop.xlane.xlu1 %3036  ;;  %3359 = vrot.lane.b32.xlu0 %v8281_v41, %s7093_s28 }
 0x778   : > { %v6699_v34 = vpop.eup %6698 }
 0x779   : > { %v6701_v48 = vpop.eup %6700  ;;  %v3132_v29 = vmul.f32 %v6699_v34, %v8638_v4 }
 0x77a   : > { %v3031_v19 = vpop.xlane.xlu1 %3030  ;;  %v6703_v12 = vpop.eup %6702  ;;  %v3129_v41 = vmul.f32 %v6701_v48, %v8631_v3  ;;  %v2983_v3 = vmul.f32 1.442695, %v2910_v30 }
 0x77b   : > { %v3131_v22 = vmul.f32 %v6703_v12, %v8624_v39 }
 0x77d   : > { %v3158_v6 = vpack.c.bf16 %v3132_v29, %v3131_v22 }
 0x77e   : > { %v3040_v45 = vpop.xlane.xlu1 %3039 }
 0x77f   : > { %3456 = vrot.lane.b32.xlu1 %v8310_v21, %s7093_s28  ;;  %6706 = vrcp.f32 %v3040_v45  ;;  %v2981_v21 = vmul.f32 1.442695, %v2907_v10 }
 0x780   : > { %v6705_v31 = vpop.eup %6704  ;;  %6708 = vrcp.f32 %v3031_v19 }
 0x781   : > { %v3130_v56 = vmul.f32 %v6705_v31, %v8648_v40  ;;  %6710 = vrcp.f32 %v3037_v60 }
 0x782   : > { %v3034_v62 = vpop.xlane.xlu1 %3033 }
 0x783   : > { %6712 = vrcp.f32 %v3034_v62  ;;  %v3157_v11 = vpack.c.bf16 %v3130_v56, %v3129_v41 }
 0x784   : > { %6714 = vpow2.f32 %v2977_v51 }
 0x785   : > { %6213 = vmatprep.mubr.msk.bf16.mxu0 %vm476_vm0, %v3157_v11  ;;  %6716 = vpow2.f32 %v2981_v21 }
 0x786   : > { %v8822_v4 = vpop.xlane.xlu1 %3069  ;;  %6214 = vmatmul.mubr.msk.bf16.vlgmr.msra.gmra.mxu0 %vm476_vm0, %v3158_v6  ;;  %6718 = vpow2.f32 %v2983_v3 }
 0x78a   : > { %v3079_v40 = vpop.xlane.xlu1 %3078 }
 0x78b   : > { %6720 = vrcp.f32 %v3079_v40 }
 0x78c   : > { %v6707_v39 = vpop.eup %6706 }
 0x78d   : > { %v6709_v50 = vpop.eup %6708  ;;  %v3136_v25 = vmul.f32 %v6707_v39, %v8669_v0 }
 0x78e   : > { %v3082_v8 = vpop.xlane.xlu1 %3081  ;;  %v6711_v46 = vpop.eup %6710  ;;  %v3133_v52 = vmul.f32 %v6709_v50, %v8662_v9 }
 0x78f   : > { %6722 = vrcp.f32 %v3082_v8  ;;  %v3135_v37 = vmul.f32 %v6711_v46, %v8655_v59  ;;  %v6403_v46 = vld [vmem:[#allocation5 + $0x10] sm:$0xff]  }
 0x790   : > { %v6713_v5 = vpop.eup %6712 }
 0x791   : > { %v8826_v55 = vpop.eup %6714  ;;  %v3134_v53 = vmul.f32 %v6713_v5, %v8676_v18  ;;  %v3160_v19 = vpack.c.bf16 %v3136_v25, %v3135_v37 }
 0x792   : > { %v3065_v60 = vsel %vm476_vm0, %v8826_v55, 0.0  ;;  %v8833_v58 = vpop.eup %6716  ;;  %v8857_v31 = vpop.xlane.xlu1 %3084 }
 0x793   : > { %v3159_v7 = vpack.c.bf16 %v3134_v53, %v3133_v52  ;;  %v3071_v0 = vsel %vm476_vm0, %v8833_v58, 0.0  ;;  %v8839_v9 = vpop.eup %6718 }
 0x794   : > { %v3074_v34 = vsel %vm476_vm0, %v8839_v9, 0.0 }
 0x795   : > { %6217 = vmatprep.mubr.msk.bf16.mxu0 %vm476_vm0, %v3159_v7  ;;  %3066 = vadd.xlane.f32.xlu0 %v3065_v60 }
 0x796   : > { %6218 = vmatmul.mubr.msk.bf16.gmra.mxu0 %vm476_vm0, %v3160_v19 }
 0x798   : > { %v6721_v18 = vpop.eup %6720 }
 0x799   : > { %3072 = vadd.xlane.f32.xlu0 %v3071_v0  ;;  %v8844_v48 = vmul.f32 %v6721_v18, %v8690_v1  ;;  %v8859_v1 = vpop.xlane.xlu1 %3087 }
 0x79c   : > { %v6723_v59 = vpop.eup %6722 }
 0x79d   : > { %3075 = vadd.xlane.f32.xlu0 %v3074_v34  ;;  %v8847_v45 = vmul.f32 %v6723_v59, %v8696_v27 }
 0x79f   : > { %v3167_v12 = vpack.c.bf16 %v8847_v45, %v8844_v48 }
 0x7b3   : > { %3458 = vrot.lane.b32.xlu0 %v8054_v32, %s7093_s28  ;;  %v6402_v32 = vld [vmem:[#allocation5 + $0x18] sm:$0xff]  }
 0x7b7   : > { %3454 = vrot.lane.b32.xlu0 %v8328_v57, %s7093_s28 }
 0x7bb   : > { %3452 = vrot.lane.b32.xlu0 %v8341_v20, %s7093_s28 }
 0x7e1   : > { %v3049_v10 = vpop.xlane.xlu0 %3048 }
 0x7e5   : > { %v3043_v51 = vpop.xlane.xlu0 %3042 }
 0x7e6   : > { %6724 = vrcp.f32 %v3043_v51 }
 0x7e7   : > { %6726 = vrcp.f32 %v3049_v10  ;;  %v3046_v27 = vpop.xlane.xlu1 %3045 }
 0x7e8   : > { %6728 = vrcp.f32 %v3046_v27 }
 0x7e9   : > { %v3052_v29 = vpop.xlane.xlu0 %3051 }
 0x7ea   : > { %6730 = vrcp.f32 %v3052_v29 }
 0x7eb   : > { %v3061_v41 = vpop.xlane.xlu1 %3060 }
 0x7ed   : > { %v3360_v56 = vpop.permute.xlu0 %3359 }
 0x7ee   : > { %6227 = vmatprep.subr.bf16.mxu1 %v3360_v56 }
 0x7ef   : > { %v3055_v57 = vpop.xlane.xlu1 %3054  ;;  %6228 = vmatpush3.bf16.msra.mxu1 %v3360_v56 }
 0x7f0   : > { %6253 = vmatprep.subr.bf16.mxu1 %v6402_v32 }
 0x7f3   : > { %v6725_v20 = vpop.eup %6724  ;;  %v3064_v22 = vpop.xlane.xlu1 %3063 }
 0x7f4   : > { %v6727_v62 = vpop.eup %6726  ;;  %6732 = vrcp.f32 %v3064_v22  ;;  %v3137_v21 = vmul.f32 %v6725_v20, %v8779_v47 }
 0x7f5   : > { %v6729_v11 = vpop.eup %6728  ;;  %6734 = vrcp.f32 %v3055_v57  ;;  %v3139_v40 = vmul.f32 %v6727_v62, %v8775_v14 }
 0x7f6   : > { %v3138_v30 = vmul.f32 %v6729_v11, %v8785_v24  ;;  %6736 = vrcp.f32 %v3061_v41 }
 0x7f7   : > { %v6731_v6 = vpop.eup %6730  ;;  %v3058_v3 = vpop.xlane.xlu1 %3057 }
 0x7f8   : > { %v3140_v39 = vmul.f32 %v6731_v6, %v8781_v44  ;;  %6738 = vrcp.f32 %v3058_v3  ;;  %v3161_v50 = vpack.c.bf16 %v3138_v30, %v3137_v21 }
 0x7f9   : > { %6740 = vrcp.f32 %v8822_v4 }
 0x7fa   : > { %v3162_v8 = vpack.c.bf16 %v3140_v39, %v3139_v40  ;;  %6229 = vmatprep.mubr.msk.bf16.mxu1 %vm476_vm0, %v3161_v50 }
 0x7fb   : > { %v3457_v20 = vpop.permute.xlu1 %3456 }
 0x7fc   : > { %6230 = vmatmul.mubr.msk.bf16.vlgmr.msra.gmra.mxu1 %vm476_vm0, %v3162_v8 }
 0x7fd   : > { %6254 = vmatpush3.bf16.msra.mxu1 %v6402_v32 }
 0x7fe   : > { %6255 = vmatprep.subr.bf16.mxu1 %v6403_v46 }
 0x801   : > { %6256 = vmatpush3.bf16.msra.mxu1 %v6403_v46  ;;  %v6733_v47 = vpop.eup %6732 }
 0x802   : > { %v6199_v24 = vpop.f32.mrf.mxu0  ;;  %v6735_v5 = vpop.eup %6734  ;;  %v3144_v14 = vmul.f32 %v6733_v47, %v8799_v15 }
 0x803   : > { %v6737_v25 = vpop.eup %6736  ;;  %v3141_v37 = vmul.f32 %v6735_v5, %v8795_v49 }
 0x804   : > { %v3231_v52 = vpop.f32.mrf.mxu0  ;;  %v3143_v60 = vmul.f32 %v6737_v25, %v8789_v43 }
 0x805   : > { %v6739_v53 = vpop.eup %6738 }
 0x806   : > { %v6200_v44 = vpop.f32.mrf.mxu0  ;;  %v3142_v7 = vmul.f32 %v6739_v53, %v8803_v33  ;;  %v3164_v18 = vpack.c.bf16 %v3144_v14, %v3143_v60  ;;  %v6741_v32 = vpop.eup %6740 }
 0x807   : > { %v3542_v34 = vpack.c.bf16 %v6200_v44, %v6199_v24  ;;  %v3146_v62 = vmul.f32 %v6741_v32, %v8684_v36 }
 0x808   : > { %v3234_v19 = vpop.f32.mrf.mxu0  ;;  %v3163_v0 = vpack.c.bf16 %v3142_v7, %v3141_v37 }
 0x809   : > { %v3541_v59 = vpack.c.bf16 %v3234_v19, %v3231_v52 }
 0x80a   : > { %6233 = vmatprep.mubr.msk.bf16.mxu1 %vm476_vm0, %v3163_v0 }
 0x80b   : > { %6234 = vmatmul.mubr.msk.bf16.gmra.mxu1 %vm476_vm0, %v3164_v18  ;;  %v8903_v18 = vld [vmem:[%s9885_s5] ss:$0 sm:$0xff] }
 0x80c   : > { %6257 = vmatprep.mubr.msk.bf16.mxu1 %vm1272_vm1, %v3541_v59  ;;  %v2461_v32 = vadd.f32 %v8903_v18, %v8650_v63 }
 0x811   : > { %v6203_v10 = vpop.f32.mrf.mxu0 }
 0x813   : > { %v3247_v15 = vpop.f32.mrf.mxu0  ;;  %6258 = vmatmul.mubr.msk.bf16.vlgmr.msra.gmra.mxu1 %vm1272_vm1, %v3542_v34 }
 0x815   : > { %v6204_v49 = vpop.f32.mrf.mxu0 }
 0x816   : > { %v3544_v27 = vpack.c.bf16 %v6204_v49, %v6203_v10  ;;  %v2462_v49 = vadd.f32 %v8633_v23, %v8903_v18  ;;  %v6944_v23 = vld [vmem:[%s7274_s24] sm:$0xff] }
 0x817   : > { %v3250_v51 = vpop.f32.mrf.mxu0 }
 0x818   : > { %v3543_v33 = vpack.c.bf16 %v3250_v51, %v3247_v15  ;;  %v2460_v51 = vadd.f32 %v8903_v18, %v8640_v17 }
 0x81a   : > { %6261 = vmatprep.mubr.msk.bf16.mxu1 %vm1272_vm1, %v3543_v33 }
 0x81b   : > { %6262 = vmatmul.mubr.msk.bf16.gmra.mxu1 %vm1272_vm1, %v3544_v27 }
 0x81e   : > { %v3067_v43 = vpop.xlane.xlu0 %3066 }
 0x81f   : > { %6742 = vrcp.f32 %v3067_v43 }
 0x822   : > { %v3073_v29 = vpop.xlane.xlu0 %3072 }
 0x823   : > { %6744 = vrcp.f32 %v3073_v29 }
 0x826   : > { %v3076_v41 = vpop.xlane.xlu0 %3075 }
 0x827   : > { %6746 = vrcp.f32 %v3076_v41  ;;  %v2463_v41 = vadd.f32 %v8645_v16, %v8903_v18  ;;  %v2464_v16 = vadd.f32 %v8903_v18, %v8664_v35 }
 0x828   : > { %6748 = vrcp.f32 %v8859_v1 }
 0x829   : > { %6750 = vrcp.f32 %v8857_v31 }
 0x82a   : > { %v3459_v56 = vpop.permute.xlu0 %3458 }
 0x82b   : > { %6237 = vmatprep.subr.bf16.mxu0 %v3459_v56 }
 0x82c   : > { %v6743_v57 = vpop.eup %6742  ;;  %6238 = vmatpush3.bf16.msra.mxu0 %v3459_v56 }
 0x82d   : > { %6239 = vmatprep.subr.bf16.mxu0 %v3457_v20  ;;  %v3145_v22 = vmul.f32 %v6743_v57, %v8826_v55  ;;  %v6945_v57 = vld [vmem:[%s7274_s24 + $0x10] sm:$0xff] }
 0x82e   : > { %v3455_v4 = vpop.permute.xlu0 %3454 }
 0x82f   : > { %v3165_v11 = vpack.c.bf16 %v3146_v62, %v3145_v22 }
 0x830   : > { %6240 = vmatpush3.bf16.msra.mxu0 %v3457_v20  ;;  %v6745_v21 = vpop.eup %6744 }
 0x831   : > { %6241 = vmatprep.subr.bf16.mxu0 %v3455_v4  ;;  %6245 = vmatprep.mubr.msk.bf16.mxu0 %vm476_vm0, %v3165_v11  ;;  %v3147_v1 = vmul.f32 %v6745_v21, %v8833_v58  ;;  %v6946_v21 = vld [vmem:[%s7274_s24 + $0x8] sm:$0xff] }
 0x832   : > { %v3453_v6 = vpop.permute.xlu0 %3452 }
 0x834   : > { %v6747_v30 = vpop.eup %6746  ;;  %6242 = vmatpush3.bf16.msra.mxu0 %v3455_v4 }
 0x835   : > { %v3148_v3 = vmul.f32 %v6747_v30, %v8839_v9  ;;  %6243 = vmatprep.subr.bf16.mxu0 %v3453_v6  ;;  %v6749_v36 = vpop.eup %6748  ;;  %v10058_v9 = vmov 0  }
 0x836   : > { %v6751_v31 = vpop.eup %6750  ;;  %v3152_v40 = vmul.f32 %v6749_v36, %v8708_v54 }
 0x837   : > { %v3166_v55 = vpack.c.bf16 %v3148_v3, %v3147_v1  ;;  %v3151_v39 = vmul.f32 %v6751_v31, %v8702_v28  ;;  %v2466_v31 = vadd.f32 %v8657_v38, %v8903_v18 }
 0x838   : > { %6244 = vmatpush3.bf16.msra.mxu0 %v3453_v6  ;;  %v6947_v6 = vld [vmem:[%s7274_s24 + $0x18] sm:$0xff] }
 0x839   : > { %v3168_v50 = vpack.c.bf16 %v3152_v40, %v3151_v39  ;;  %v2467_v40 = vadd.f32 %v8671_v42, %v8903_v18  ;;  %v10059_v39 = vld [vmem:[#allocation32_spill] sm:$0xff]  ;;  %v6951_v42 = vld [vmem:[%s7274_s24 + $0x38] sm:$0xff] }
 0x83b   : > { %6246 = vmatmul.mubr.msk.bf16.vlgmr.msra.gmra.mxu0 %vm476_vm0, %v3166_v55 }
 0x83c   : > { %6249 = vmatprep.mubr.msk.bf16.mxu0 %vm476_vm0, %v3167_v12 }
 0x843   : > { %6250 = vmatmul.mubr.msk.bf16.gmra.mxu0 %vm476_vm0, %v3168_v50  ;;  %v2465_v50 = vadd.f32 %v8903_v18, %v10059_v39  ;;  %v6955_v39 = vld [vmem:[%s7274_s24 + $0x58] sm:$0xff] }
 0x844   : > { %4419 = vmatprep.mubr.bf16.mxu0 %v10058_v9 }
 0x846   : > { %v6215_v58 = vpop.f32.mrf.mxu0 }
 0x848   : > { %v3324_v8 = vpop.f32.mrf.mxu0 }
 0x84a   : > { %v6216_v46 = vpop.f32.mrf.mxu0 }
 0x84b   : > { %v3546_v5 = vpack.c.bf16 %v6216_v46, %v6215_v58  ;;  %v6948_v46 = vld [vmem:[%s7274_s24 + $0x20] sm:$0xff] }
 0x84c   : > { %v3327_v47 = vpop.f32.mrf.mxu0 }
 0x84d   : > { %v3545_v24 = vpack.c.bf16 %v3327_v47, %v3324_v8 }
 0x84f   : > { %6265 = vmatprep.mubr.msk.bf16.mxu1 %vm1272_vm1, %v3545_v24 }
 0x850   : > { %6266 = vmatmul.mubr.msk.bf16.gmra.mxu1 %vm1272_vm1, %v3546_v5 }
 0x856   : > { %v6219_v48 = vpop.f32.mrf.mxu0 }
 0x858   : > { %v3340_v45 = vpop.f32.mrf.mxu0 }
 0x85a   : > { %v6220_v54 = vpop.f32.mrf.mxu0 }
 0x85b   : > { %v3548_v25 = vpack.c.bf16 %v6220_v54, %v6219_v48  ;;  %v6949_v48 = vld [vmem:[%s7274_s24 + $0x28] sm:$0xff]  ;;  %v6950_v54 = vld [vmem:[%s7274_s24 + $0x30] sm:$0xff] }
 0x85c   : > { %v3343_v12 = vpop.f32.mrf.mxu0 }
 0x85d   : > { %v3547_v28 = vpack.c.bf16 %v3343_v12, %v3340_v45 }
 0x85f   : > { %6269 = vmatprep.mubr.msk.bf16.mxu1 %vm1272_vm1, %v3547_v28 }
 0x860   : > { %6270 = vmatmul.mubr.msk.bf16.gmra.mxu1 %vm1272_vm1, %v3548_v25 }
 0x8bc   : > { %v6231_v52 = vpop.f32.mrf.mxu1 }
 0x8be   : > { %v3417_v53 = vpop.f32.mrf.mxu1 }
 0x8c0   : > { %v6232_v14 = vpop.f32.mrf.mxu1 }
 0x8c1   : > { %v3550_v7 = vpack.c.bf16 %v6232_v14, %v6231_v52 }
 0x8c2   : > { %v3420_v44 = vpop.f32.mrf.mxu1 }
 0x8c3   : > { %v3549_v37 = vpack.c.bf16 %v3420_v44, %v3417_v53 }
 0x8c5   : > { %6273 = vmatprep.mubr.msk.bf16.mxu1 %vm1272_vm1, %v3549_v37 }
 0x8c6   : > { %6274 = vmatmul.mubr.msk.bf16.gmra.mxu1 %vm1272_vm1, %v3550_v7 }
 0x8cb   : > { %v6235_v60 = vpop.f32.mrf.mxu1 }
 0x8cd   : > { %v3433_v19 = vpop.f32.mrf.mxu1 }
 0x8cf   : > { %v6236_v0 = vpop.f32.mrf.mxu1 }
 0x8d0   : > { %v3552_v10 = vpack.c.bf16 %v6236_v0, %v6235_v60 }
 0x8d1   : > { %v3436_v59 = vpop.f32.mrf.mxu1 }
 0x8d2   : > { %v3551_v34 = vpack.c.bf16 %v3436_v59, %v3433_v19 }
 0x8d3   : > { %v6259_v15 = vpop.f32.mrf.mxu1 }
 0x8d4   : > { %6277 = vmatprep.mubr.msk.bf16.mxu1 %vm1272_vm1, %v3551_v34  ;;  %v3785_v27 = vadd.f32 %v6259_v15, %v2462_v49 }
 0x8d5   : > { %v3656_v33 = vpop.f32.mrf.mxu1  ;;  %6278 = vmatmul.mubr.msk.bf16.gmra.mxu1 %vm1272_vm1, %v3552_v10 }
 0x8d6   : > { %v3783_v43 = vadd.f32 %v3656_v33, %v2460_v51  ;;  %v8919_v20 = vadd.f32 %v6945_v57, %v3785_v27  ;;  %v10060_v27 = vld [vmem:[#allocation31_spill] sm:$0xff] }
 0x8d7   : > { %v6260_v29 = vpop.f32.mrf.mxu1 }
 0x8d8   : > { %v8916_v56 = vadd.f32 %v6944_v23, %v3783_v43  ;;  %v3786_v22 = vadd.f32 %v6260_v29, %v2463_v41  ;;  %v3853_v55 = vsel %vm476_vm0, %v8919_v20, 0.0  ;;  %v2470_v43 = vadd.f32 %v10060_v27, %v8903_v18  ;;  %v10061_v29 = vld [vmem:[#allocation33_spill] sm:$0xff] }
 0x8d9   : > { %v3659_v17 = vpop.f32.mrf.mxu1  ;;  %v2468_v41 = vadd.f32 %v8903_v18, %v10061_v29  ;;  %v6959_v27 = vld [vmem:[%s7274_s24 + $0x78] sm:$0xff] }
 0x8da   : > { %v3784_v62 = vadd.f32 %v3659_v17, %v2461_v32  ;;  %v3847_v4 = vsel %vm476_vm0, %v8916_v56, 0.0  ;;  %v8929_v3 = vadd.f32 %v6947_v6, %v3786_v22  ;;  %v10062_v22 = vld [vmem:[#allocation36_spill] sm:$0xff] }
 0x8db   : > { %3848 = vadd.xlane.f32.xlu0 %v3847_v4  ;;  %v6263_v11 = vpop.f32.mrf.mxu1  ;;  %v10063_v4 = vld [vmem:[#allocation34_spill] sm:$0xff]  ;;  %v6953_v6 = vld [vmem:[%s7274_s24 + $0x50] sm:$0xff] }
 0x8dc   : > { %v8926_v63 = vadd.f32 %v6946_v21, %v3784_v62  ;;  %v3789_v58 = vadd.f32 %v6263_v11, %v2466_v31  ;;  %v3856_v38 = vsel %vm476_vm0, %v8929_v3, 0.0  ;;  %v2471_v62 = vadd.f32 %v10062_v22, %v8903_v18 }
 0x8dd   : > { %v3672_v30 = vpop.f32.mrf.mxu1  ;;  %v2469_v11 = vadd.f32 %v8903_v18, %v10063_v4 }
 0x8de   : > { %v3787_v1 = vadd.f32 %v3672_v30, %v2464_v16  ;;  %v3850_v36 = vsel %vm476_vm0, %v8926_v63, 0.0  ;;  %v8950_v12 = vadd.f32 %v6950_v54, %v3789_v58  ;;  %v6952_v16 = vld [vmem:[%s7274_s24 + $0x40] sm:$0xff] }
 0x8df   : > { %3854 = vadd.xlane.f32.xlu0 %v3853_v55  ;;  %3851 = vadd.xlane.f32.xlu1 %v3850_v36  ;;  %v6264_v35 = vpop.f32.mrf.mxu1 }
 0x8e0   : > { %v8942_v47 = vadd.f32 %v6948_v46, %v3787_v1  ;;  %v3790_v24 = vadd.f32 %v6264_v35, %v2467_v40  ;;  %v3865_v53 = vsel %vm476_vm0, %v8950_v12, 0.0  ;;  %v6954_v35 = vld [vmem:[%s7274_s24 + $0x48] sm:$0xff] }
 0x8e1   : > { %v3675_v8 = vpop.f32.mrf.mxu1 }
 0x8e2   : > { %v3788_v5 = vadd.f32 %v3675_v8, %v2465_v50  ;;  %v8953_v28 = vadd.f32 %v6951_v42, %v3790_v24  ;;  %v3859_v25 = vsel %vm476_vm0, %v8942_v47, 0.0 }
 0x8e3   : > { %3857 = vadd.xlane.f32.xlu0 %v3856_v38 }
 0x8e4   : > { %v8947_v45 = vadd.f32 %v6949_v48, %v3788_v5  ;;  %v3868_v14 = vsel %vm476_vm0, %v8953_v28, 0.0  ;;  %v10064_v5 = vld [vmem:[#allocation38_spill] sm:$0xff]  ;;  %v10065_v48 = vld [vmem:[#allocation35_spill] sm:$0xff] }
 0x8e5   : > { %v2474_v38 = vadd.f32 %v10064_v5, %v8903_v18  ;;  %v2472_v54 = vadd.f32 %v8903_v18, %v10065_v48 }
 0x8e6   : > { %v3862_v52 = vsel %vm476_vm0, %v8947_v45, 0.0 }
 0x8e7   : > { %3860 = vadd.xlane.f32.xlu0 %v3859_v25  ;;  %3863 = vadd.xlane.f32.xlu1 %v3862_v52 }
 0x8eb   : > { %3866 = vadd.xlane.f32.xlu0 %v3865_v53  ;;  %3869 = vadd.xlane.f32.xlu1 %v3868_v14  ;;  %v10066_v14 = vld [vmem:[#allocation47_spill] sm:$0xff] }
 0x8fb   : > { %v6247_v44 = vpop.f32.mrf.mxu0 }
 0x8fd   : > { %v3510_v37 = vpop.f32.mrf.mxu0 }
 0x8ff   : > { %v6248_v7 = vpop.f32.mrf.mxu0 }
 0x900   : > { %v3554_v0 = vpack.c.bf16 %v6248_v7, %v6247_v44  ;;  %v2475_v44 = vadd.f32 %v10066_v14, %v8903_v18  ;;  %v10077_v14 = vld [vmem:[#allocation15_spill] sm:$0xff] }
 0x901   : > { %v3513_v60 = vpop.f32.mrf.mxu0 }
 0x902   : > { %v3553_v19 = vpack.c.bf16 %v3513_v60, %v3510_v37  ;;  %v10067_v37 = vld [vmem:[#allocation46_spill] sm:$0xff] }
 0x903   : > { %v6251_v59 = vpop.f32.mrf.mxu0  ;;  %v2473_v7 = vadd.f32 %v8903_v18, %v10067_v37  ;;  %v6956_v60 = vld [vmem:[%s7274_s24 + $0x60] sm:$0xff] }
 0x904   : > { %6281 = vmatprep.mubr.msk.bf16.mxu1 %vm1272_vm1, %v3553_v19 }
 0x905   : > { %v3526_v34 = vpop.f32.mrf.mxu0  ;;  %6282 = vmatmul.mubr.msk.bf16.gmra.mxu1 %vm1272_vm1, %v3554_v0 }
 0x907   : > { %v6252_v10 = vpop.f32.mrf.mxu0 }
 0x908   : > { %v3556_v51 = vpack.c.bf16 %v6252_v10, %v6251_v59  ;;  %v6957_v59 = vld [vmem:[%s7274_s24 + $0x70] sm:$0xff] }
 0x909   : > { %v3529_v15 = vpop.f32.mrf.mxu0 }
 0x90a   : > { %v3555_v49 = vpack.c.bf16 %v3529_v15, %v3526_v34 }
 0x90c   : > { %6285 = vmatprep.mubr.msk.bf16.mxu1 %vm1272_vm1, %v3555_v49 }
 0x90d   : > { %6286 = vmatmul.mubr.msk.bf16.gmra.mxu1 %vm1272_vm1, %v3556_v51  ;;  %v6958_v51 = vld [vmem:[%s7274_s24 + $0x68] sm:$0xff] }
 0x910   : > { %v6267_v33 = vpop.f32.mrf.mxu1 }
 0x911   : > { %v3793_v23 = vadd.f32 %v6267_v33, %v2470_v43 }
 0x912   : > { %v3688_v32 = vpop.f32.mrf.mxu1 }
 0x913   : > { %v3791_v17 = vadd.f32 %v3688_v32, %v2468_v41  ;;  %v8979_v1 = vadd.f32 %v6953_v6, %v3793_v23 }
 0x914   : > { %v6268_v57 = vpop.f32.mrf.mxu1 }
 0x915   : > { %v8976_v21 = vadd.f32 %v6952_v16, %v3791_v17  ;;  %v3794_v55 = vadd.f32 %v6268_v57, %v2471_v62  ;;  %v3877_v58 = vsel %vm476_vm0, %v8979_v1, 0.0  ;;  %v10069_v57 = vld [vmem:[#allocation48_spill] sm:$0xff]  ;;  %v10070_v62 = vld [vmem:[#allocation39_spill] sm:$0xff] }
 0x916   : > { %v3691_v30 = vpop.f32.mrf.mxu1  ;;  %v2478_v22 = vadd.f32 %v10069_v57, %v8903_v18  ;;  %v2476_v4 = vadd.f32 %v8903_v18, %v10070_v62 }
 0x917   : > { %v3792_v36 = vadd.f32 %v3691_v30, %v2469_v11  ;;  %v3871_v31 = vsel %vm476_vm0, %v8976_v21, 0.0  ;;  %v8987_v50 = vadd.f32 %v6955_v39, %v3794_v55  ;;  %v10072_v39 = vld [vmem:[#allocation49_spill] sm:$0xff] }
 0x918   : > { %3872 = vadd.xlane.f32.xlu0 %v3871_v31  ;;  %v10071_v31 = vld [vmem:[#allocation37_spill] sm:$0xff] }
 0x919   : > { %v8984_v40 = vadd.f32 %v6954_v35, %v3792_v36  ;;  %v3880_v46 = vsel %vm476_vm0, %v8987_v50, 0.0  ;;  %v2479_v35 = vadd.f32 %v10071_v31, %v8903_v18  ;;  %v10084_v31 = vld [vmem:[#allocation18_spill] sm:$0xff] }
 0x91b   : > { %v3874_v8 = vsel %vm476_vm0, %v8984_v40, 0.0 }
 0x91c   : > { %3878 = vadd.xlane.f32.xlu0 %v3877_v58  ;;  %3875 = vadd.xlane.f32.xlu1 %v3874_v8  ;;  %v2477_v58 = vadd.f32 %v8903_v18, %v10072_v39  ;;  %v10073_v8 = vld [vmem:[#allocation14_spill] sm:$0xff] }
 0x920   : > { %3881 = vadd.xlane.f32.xlu1 %v3880_v46  ;;  %v6271_v24 = vpop.f32.mrf.mxu1 }
 0x921   : > { %v3797_v25 = vadd.f32 %v6271_v24, %v2474_v38 }
 0x922   : > { %v3704_v42 = vpop.f32.mrf.mxu1 }
 0x923   : > { %v3795_v52 = vadd.f32 %v3704_v42, %v2472_v54  ;;  %v9007_v34 = vadd.f32 %v6957_v59, %v3797_v25  ;;  %v10075_v54 = vld [vmem:[#allocation16_spill] sm:$0xff] }
 0x924   : > { %v6272_v53 = vpop.f32.mrf.mxu1 }
 0x925   : > { %v9004_v19 = vadd.f32 %v6956_v60, %v3795_v52  ;;  %v3798_v10 = vadd.f32 %v6272_v53, %v2475_v44  ;;  %v3889_v29 = vsel %vm476_vm0, %v9007_v34, 0.0  ;;  %v10079_v60 = vld [vmem:[#allocation17_spill] sm:$0xff] }
 0x926   : > { %v3707_v0 = vpop.f32.mrf.mxu1 }
 0x927   : > { %v3796_v15 = vadd.f32 %v3707_v0, %v2473_v7  ;;  %v3883_v49 = vsel %vm476_vm0, %v9004_v19, 0.0  ;;  %v9015_v43 = vadd.f32 %v6959_v27, %v3798_v10 }
 0x928   : > { %3884 = vadd.xlane.f32.xlu0 %v3883_v49 }
 0x929   : > { %v9012_v33 = vadd.f32 %v6958_v51, %v3796_v15  ;;  %10068 = vst [vmem:[#allocation45_spill] sm:$0xff] %v9015_v43  ;;  %v3892_v32 = vsel %vm476_vm0, %v9015_v43, 0.0 }
 0x92b   : > { %v3886_v41 = vsel %vm476_vm0, %v9012_v33, 0.0 }
 0x92c   : > { %3890 = vadd.xlane.f32.xlu0 %v3889_v29  ;;  %3887 = vadd.xlane.f32.xlu1 %v3886_v41 }
 0x930   : > { %3893 = vadd.xlane.f32.xlu1 %v3892_v32  ;;  %v10081_v32 = vld [vmem:[#allocation43_spill] sm:$0xff] }
 0x964   : > { %v3849_v23 = vpop.xlane.xlu0 %3848 }
 0x965   : > { %v3943_v11 = vmul.f32 0.015625, %v3849_v23  ;;  %v2480_v23 = vadd.f32 %v8903_v18, %v10081_v32  ;;  %v10091_v32 = vld [vmem:[#allocation21_spill] sm:$0xff] }
 0x967   : > { %v9035_v24 = vsub.f32 %v8916_v56, %v3943_v11 }
 0x968   : > { %v3852_v30 = vpop.xlane.xlu1 %3851  ;;  %v3855_v48 = vpop.xlane.xlu0 %3854 }
 0x969   : > { %v3944_v5 = vmul.f32 0.015625, %v3852_v30  ;;  %v4007_v37 = vmul.f32 %v9035_v24, %v9035_v24  ;;  %v3945_v15 = vmul.f32 0.015625, %v3855_v48  ;;  %v10082_v30 = vld [vmem:[#allocation51_spill] sm:$0xff] }
 0x96b   : > { %v9048_v7 = vsub.f32 %v8926_v63, %v3944_v5  ;;  %v4039_v29 = vsel %vm476_vm0, %v4007_v37, 0.0 }
 0x96c   : > { %v3858_v49 = vpop.xlane.xlu0 %3857 }
 0x96d   : > { %v4008_v41 = vmul.f32 %v9048_v7, %v9048_v7  ;;  %v3946_v57 = vmul.f32 0.015625, %v3858_v49  ;;  %v10089_v49 = vld [vmem:[#allocation20_spill] sm:$0xff] }
 0x96f   : > { %v9076_v39 = vsub.f32 %v8929_v3, %v3946_v57 }
 0x970   : > { %v3864_v5 = vpop.xlane.xlu1 %3863 }
 0x986   : > { %v6275_v17 = vpop.f32.mrf.mxu1 }
 0x987   : > { %v3801_v6 = vadd.f32 %v6275_v17, %v2478_v22  ;;  %v9065_v17 = vsub.f32 %v8919_v20, %v3945_v15 }
 0x988   : > { %v3720_v16 = vpop.f32.mrf.mxu1 }
 0x989   : > { %v3799_v55 = vadd.f32 %v3720_v16, %v2476_v4  ;;  %v9038_v42 = vadd.f32 %v3801_v6, %v10075_v54  ;;  %v3861_v4 = vpop.xlane.xlu0 %3860  ;;  %v4042_v16 = vsel %vm476_vm0, %v4008_v41, 0.0  ;;  %v2482_v6 = vadd.f32 %v10082_v30, %v8903_v18  ;;  %v6406_v30 = vld [vmem:[%s9886_s6 + $0x34] ss:$8 sps:$4 sm:$0xff]  }
 0x98a   : > { %v6276_v36 = vpop.f32.mrf.mxu1  ;;  %4395 = vmatprep.subr.bf16.mxu0 %v6406_v30 }
 0x98b   : > { %v9032_v46 = vadd.f32 %v3799_v55, %v10073_v8  ;;  %10076 = vst [vmem:[#allocation31_spill] sm:$0xff] %v9038_v42  ;;  %v3802_v25 = vadd.f32 %v6276_v36, %v2479_v35  ;;  %v3901_v59 = vsel %vm476_vm0, %v9038_v42, 0.0  ;;  %v10083_v55 = vld [vmem:[#allocation50_spill] sm:$0xff]  ;;  %v4009_v8 = vmul.f32 %v9065_v17, %v9065_v17 }
 0x98c   : > { %v3723_v38 = vpop.f32.mrf.mxu1  ;;  %v2481_v36 = vadd.f32 %v8903_v18, %v10083_v55  ;;  %v6404_v55 = vld [vmem:[%s9886_s6 + $0x30] ss:$8 sps:$4 sm:$0xff]  }
 0x98d   : > { %10074 = vst [vmem:[#allocation32_spill] sm:$0xff] %v9032_v46  ;;  %v3800_v52 = vadd.f32 %v3723_v38, %v2477_v58  ;;  %v3895_v53 = vsel %vm476_vm0, %v9032_v46, 0.0  ;;  %v9051_v0 = vadd.f32 %v3802_v25, %v10079_v60  ;;  %v3947_v38 = vmul.f32 0.015625, %v3861_v4  ;;  %4396 = vmatpush1.bf16.msra.mxu0 %v6404_v55 }
 0x98e   : > { %3896 = vadd.xlane.f32.xlu0 %v3895_v53  ;;  %v3948_v60 = vmul.f32 0.015625, %v3864_v5  ;;  %v6415_v5 = vld [vmem:[%s9886_s6 + $0x4] ss:$8 sps:$4 sm:$0xff]  }
 0x98f   : > { %v9043_v44 = vadd.f32 %v3800_v52, %v10077_v14  ;;  %10080 = vst [vmem:[#allocation36_spill] sm:$0xff] %v9051_v0  ;;  %v3904_v27 = vsel %vm476_vm0, %v9051_v0, 0.0  ;;  %v10086_v52 = vld [vmem:[#allocation40_spill] sm:$0xff]  ;;  %v10087_v14 = vld [vmem:[#allocation19_spill] sm:$0xff]  ;;  %v9091_v15 = vsub.f32 %v8942_v47, %v3947_v38 }
 0x990   : > { %v2483_v53 = vadd.f32 %v10086_v52, %v8903_v18  ;;  %v9099_v41 = vsub.f32 %v8947_v45, %v3948_v60  ;;  %v6413_v38 = vld [vmem:[%s9886_s6] ss:$8 sps:$4 sm:$0xff]  }
 0x991   : > { %10078 = vst [vmem:[#allocation33_spill] sm:$0xff] %v9043_v44  ;;  %v3898_v10 = vsel %vm476_vm0, %v9043_v44, 0.0 }
 0x992   : > { %3902 = vadd.xlane.f32.xlu0 %v3901_v59  ;;  %3899 = vadd.xlane.f32.xlu1 %v3898_v10  ;;  %v4045_v59 = vsel %vm476_vm0, %v4009_v8, 0.0  ;;  %v4010_v10 = vmul.f32 %v9076_v39, %v9076_v39  ;;  %v6410_v8 = vld [vmem:[%s9886_s6 + $0x10] ss:$8 sps:$4 sm:$0xff]  }
 0x995   : > { %v6279_v51 = vpop.f32.mrf.mxu1 }
 0x996   : > { %3905 = vadd.xlane.f32.xlu1 %v3904_v27  ;;  %4040 = vadd.xlane.f32.xlu0 %v4039_v29  ;;  %v3805_v48 = vadd.f32 %v6279_v51, %v2482_v6 }
 0x997   : > { %v3736_v22 = vpop.f32.mrf.mxu1 }
 0x998   : > { %v3803_v62 = vadd.f32 %v3736_v22, %v2480_v23  ;;  %v9094_v51 = vadd.f32 %v3805_v48, %v10089_v49  ;;  %v4048_v22 = vsel %vm476_vm0, %v4010_v10, 0.0  ;;  %v3867_v48 = vpop.xlane.xlu0 %3866 }
 0x999   : > { %v6280_v11 = vpop.f32.mrf.mxu1 }
 0x99a   : > { %v9073_v35 = vadd.f32 %v3803_v62, %v10084_v31  ;;  %4043 = vadd.xlane.f32.xlu1 %v4042_v16  ;;  %10090 = vst [vmem:[#allocation35_spill] sm:$0xff] %v9094_v51  ;;  %v3806_v27 = vadd.f32 %v6280_v11, %v2483_v53  ;;  %v3913_v57 = vsel %vm476_vm0, %v9094_v51, 0.0  ;;  %v4011_v62 = vmul.f32 %v9091_v15, %v9091_v15  ;;  %v6407_v31 = vld [vmem:[%s9886_s6 + $0x20] ss:$8 sps:$4 sm:$0xff]   ;;  %v10092_v53 = vld [vmem:[#allocation41_spill] sm:$0xff] }
 0x99b   : > { %v3739_v58 = vpop.f32.mrf.mxu1  ;;  %v4012_v16 = vmul.f32 %v9099_v41, %v9099_v41 }
 0x99c   : > { %10085 = vst [vmem:[#allocation34_spill] sm:$0xff] %v9073_v35  ;;  %v3804_v54 = vadd.f32 %v3739_v58, %v2481_v36  ;;  %v3907_v25 = vsel %vm476_vm0, %v9073_v35, 0.0  ;;  %v9102_v23 = vadd.f32 %v3806_v27, %v10091_v32  ;;  %v4051_v11 = vsel %vm476_vm0, %v4011_v62, 0.0  ;;  %v6409_v36 = vld [vmem:[%s9886_s6 + $0x24] ss:$8 sps:$4 sm:$0xff]   ;;  %v10093_v32 = vld [vmem:[#allocation52_spill] sm:$0xff] }
 0x99d   : > { %3908 = vadd.xlane.f32.xlu0 %v3907_v25  ;;  %v4054_v6 = vsel %vm476_vm0, %v4012_v16, 0.0  ;;  %4397 = vmatprep.subr.bf16.mxu0 %v6409_v36  ;;  %v6412_v58 = vld [vmem:[%s9886_s6 + $0x14] ss:$8 sps:$4 sm:$0xff]   ;;  %v3870_v25 = vpop.xlane.xlu1 %3869 }
 0x99e   : > { %v9085_v37 = vadd.f32 %v3804_v54, %v10087_v14  ;;  %v3916_v4 = vsel %vm476_vm0, %v9102_v23, 0.0  ;;  %4398 = vmatpush1.bf16.msra.mxu0 %v6407_v31  ;;  %v3949_v54 = vmul.f32 0.015625, %v3867_v48  ;;  %v2484_v14 = vadd.f32 %v8903_v18, %v10092_v53 }
 0x99f   : > { %4399 = vmatprep.subr.bf16.mxu0 %v6412_v58  ;;  %v3950_v60 = vmul.f32 0.015625, %v3870_v25 }
 0x9a0   : > { %10088 = vst [vmem:[#allocation38_spill] sm:$0xff] %v9085_v37  ;;  %v3910_v29 = vsel %vm476_vm0, %v9085_v37, 0.0 }
 0x9a1   : > { %3911 = vadd.xlane.f32.xlu1 %v3910_v29  ;;  %4046 = vadd.xlane.f32.xlu0 %v4045_v59  ;;  %v9142_v59 = vsub.f32 %v8950_v12, %v3949_v54  ;;  %v3873_v49 = vpop.xlane.xlu0 %3872  ;;  %v9152_v16 = vsub.f32 %v8953_v28, %v3950_v60  ;;  %v10097_v54 = vld [vmem:[#allocation23_spill] sm:$0xff] }
 0x9a2   : > { %4400 = vmatpush1.bf16.msra.mxu0 %v6410_v8  ;;  %v3951_v30 = vmul.f32 0.015625, %v3873_v49 }
 0x9a3   : > { %4401 = vmatprep.subr.bf16.mxu0 %v6415_v5  ;;  %v4013_v55 = vmul.f32 %v9142_v59, %v9142_v59 }
 0x9a4   : > { %v9164_v53 = vsub.f32 %v8976_v21, %v3951_v30 }
 0x9a5   : > { %3914 = vadd.xlane.f32.xlu0 %v3913_v57  ;;  %4049 = vadd.xlane.f32.xlu1 %v4048_v22  ;;  %v2486_v57 = vadd.f32 %v10093_v32, %v8903_v18  ;;  %v10094_v22 = vld [vmem:[#allocation44_spill] sm:$0xff]  ;;  %v3876_v8 = vpop.xlane.xlu1 %3875  ;;  %v4057_v60 = vsel %vm476_vm0, %v4013_v55, 0.0  ;;  %v3879_v49 = vpop.xlane.xlu0 %3878 }
 0x9a6   : > { %4402 = vmatpush1.bf16.msra.mxu0 %v6413_v38  ;;  %v2485_v62 = vadd.f32 %v8903_v18, %v10094_v22  ;;  %v10096_v38 = vld [vmem:[#allocation42_spill] sm:$0xff]  ;;  %v3953_v30 = vmul.f32 0.015625, %v3879_v49  ;;  %v4015_v55 = vmul.f32 %v9164_v53, %v9164_v53 }
 0x9a7   : > { %v2487_v48 = vadd.f32 %v10096_v38, %v8903_v18  ;;  %v10100_v49 = vld [vmem:[#allocation26_spill] sm:$0xff] }
 0x9a9   : > { %3917 = vadd.xlane.f32.xlu1 %v3916_v4  ;;  %4052 = vadd.xlane.f32.xlu0 %v4051_v11  ;;  %v10095_v4 = vld [vmem:[#allocation22_spill] sm:$0xff] }
 0x9ad   : > { %4055 = vadd.xlane.f32.xlu1 %v4054_v6 }
 0x9c5   : > { %v6283_v52 = vpop.f32.mrf.mxu1 }
 0x9c6   : > { %v3809_v36 = vadd.f32 %v6283_v52, %v2486_v57  ;;  %v4014_v52 = vmul.f32 %v9152_v16, %v9152_v16 }
 0x9c7   : > { %v3752_v10 = vpop.f32.mrf.mxu1 }
 0x9c8   : > { %v3807_v27 = vadd.f32 %v3752_v10, %v2484_v14  ;;  %v3952_v10 = vmul.f32 0.015625, %v3876_v8 }
 0x9c9   : > { %v6284_v29 = vpop.f32.mrf.mxu1 }
 0x9ca   : > { %v9149_v11 = vadd.f32 %v3807_v27, %v10095_v4  ;;  %v10098_v27 = vld [vmem:[#allocation24_spill] sm:$0xff]  ;;  %v3810_v57 = vadd.f32 %v6284_v29, %v2487_v48  ;;  %v2488_v4 = vadd.f32 %v8903_v18, %v8748_v2  ;;  %v10099_v29 = vld [vmem:[#allocation25_spill] sm:$0xff]  ;;  %v2489_v2 = vadd.f32 %v8903_v18, %v8754_v13 }
 0x9cb   : > { %v3755_v6 = vpop.f32.mrf.mxu1  ;;  %v9170_v32 = vadd.f32 %v3809_v36, %v10098_v27  ;;  %v3882_v36 = vpop.xlane.xlu1 %3881  ;;  %v2490_v13 = vadd.f32 %v8744_v61, %v8903_v18  ;;  %v2491_v61 = vadd.f32 %v8750_v26, %v8903_v18 }
 0x9cc   : > { %v3808_v31 = vadd.f32 %v3755_v6, %v2485_v62  ;;  %v3919_v58 = vsel %vm476_vm0, %v9149_v11, 0.0  ;;  %v4060_v6 = vsel %vm476_vm0, %v4014_v52, 0.0  ;;  %v3885_v52 = vpop.xlane.xlu0 %3884 }
 0x9cd   : > { %v6287_v5 = vpop.f32.mrf.mxu1  ;;  %3920 = vadd.xlane.f32.xlu0 %v3919_v58  ;;  %v9183_v58 = vadd.f32 %v3810_v57, %v10099_v29  ;;  %v3925_v38 = vsel %vm476_vm0, %v9170_v32, 0.0  ;;  %v10102_v29 = vld [vmem:[#allocation27_spill] sm:$0xff] }
 0x9ce   : > { %v9161_v25 = vadd.f32 %v3808_v31, %v10097_v54  ;;  %v9180_v31 = vsub.f32 %v8984_v40, %v3952_v10  ;;  %v9190_v54 = vsub.f32 %v8979_v1, %v3953_v30  ;;  %v4063_v10 = vsel %vm476_vm0, %v4015_v55, 0.0 }
 0x9cf   : > { %v3768_v14 = vpop.f32.mrf.mxu1  ;;  %v3928_v57 = vsel %vm476_vm0, %v9183_v58, 0.0  ;;  %v3955_v30 = vmul.f32 0.015625, %v3885_v52 }
 0x9d0   : > { %v3922_v22 = vsel %vm476_vm0, %v9161_v25, 0.0  ;;  %v3811_v8 = vadd.f32 %v3768_v14, %v2488_v4  ;;  %v4017_v55 = vmul.f32 %v9190_v54, %v9190_v54 }
 0x9d1   : > { %v6288_v62 = vpop.f32.mrf.mxu1  ;;  %3923 = vadd.xlane.f32.xlu1 %v3922_v22  ;;  %4058 = vadd.xlane.f32.xlu0 %v4057_v60  ;;  %v3954_v60 = vmul.f32 0.015625, %v3882_v36  ;;  %v4016_v22 = vmul.f32 %v9180_v31, %v9180_v31  ;;  %v3813_v36 = vadd.f32 %v6287_v5, %v2490_v13 }
 0x9d2   : > { %v9194_v27 = vadd.f32 %v3811_v8, %v10100_v49  ;;  %v4069_v5 = vsel %vm476_vm0, %v4017_v55, 0.0 }
 0x9d3   : > { %v3771_v48 = vpop.f32.mrf.mxu1  ;;  %v9203_v4 = vsub.f32 %v8987_v50, %v3954_v60  ;;  %v9216_v60 = vsub.f32 %v9004_v19, %v3955_v30 }
 0x9d4   : > { %10101 = vst [vmem:[#allocation47_spill] sm:$0xff] %v9194_v27  ;;  %v3812_v14 = vadd.f32 %v3771_v48, %v2489_v2  ;;  %v3931_v48 = vsel %vm476_vm0, %v9194_v27, 0.0  ;;  %v3891_v2 = vpop.xlane.xlu0 %3890 }
 0x9d5   : > { %4061 = vadd.xlane.f32.xlu1 %v4060_v6  ;;  %3926 = vadd.xlane.f32.xlu0 %v3925_v38  ;;  %v3888_v6 = vpop.xlane.xlu1 %3887  ;;  %v4066_v38 = vsel %vm476_vm0, %v4016_v22, 0.0  ;;  %v3957_v49 = vmul.f32 0.015625, %v3891_v2  ;;  %v3814_v22 = vadd.f32 %v6288_v62, %v2491_v61  ;;  %v4019_v30 = vmul.f32 %v9216_v60, %v9216_v60 }
 0x9d6   : > { %v9208_v8 = vadd.f32 %v3812_v14, %v10102_v29  ;;  %v3956_v52 = vmul.f32 0.015625, %v3888_v6  ;;  %v10104_v14 = vld [vmem:[#allocation28_spill] sm:$0xff] }
 0x9d7   : > { %v9233_v6 = vsub.f32 %v9007_v34, %v3957_v49 }
 0x9d8   : > { %10103 = vst [vmem:[#allocation46_spill] sm:$0xff] %v9208_v8  ;;  %v3934_v13 = vsel %vm476_vm0, %v9208_v8, 0.0  ;;  %v9227_v26 = vsub.f32 %v9012_v33, %v3956_v52 }
 0x9d9   : > { %3929 = vadd.xlane.f32.xlu1 %v3928_v57  ;;  %4064 = vadd.xlane.f32.xlu0 %v4063_v10  ;;  %v4018_v10 = vmul.f32 %v9203_v4, %v9203_v4  ;;  %v9222_v57 = vadd.f32 %v3813_v36, %v10104_v14  ;;  %v3894_v29 = vpop.xlane.xlu1 %3893  ;;  %v10105_v36 = vld [vmem:[#allocation29_spill] sm:$0xff] }
 0x9da   : > { %v3958_v55 = vmul.f32 0.015625, %v3894_v29  ;;  %v9236_v62 = vadd.f32 %v3814_v22, %v10105_v36  ;;  %v4020_v52 = vmul.f32 %v9227_v26, %v9227_v26 }
 0x9db   : > { %v4072_v18 = vsel %vm476_vm0, %v4018_v10, 0.0 }
 0x9dc   : > { %v9242_v2 = vsub.f32 %v9015_v43, %v3958_v55  ;;  %v3940_v61 = vsel %vm476_vm0, %v9236_v62, 0.0  ;;  %v4078_v10 = vsel %vm476_vm0, %v4020_v52, 0.0 }
 0x9dd   : > { %4067 = vadd.xlane.f32.xlu1 %v4066_v38  ;;  %3932 = vadd.xlane.f32.xlu0 %v3931_v48  ;;  %v3937_v38 = vsel %vm476_vm0, %v9222_v57, 0.0  ;;  %v4075_v48 = vsel %vm476_vm0, %v4019_v30, 0.0 }
 0x9de   : > { %v4022_v14 = vmul.f32 %v9242_v2, %v9242_v2 }
 0x9e0   : > { %v4084_v22 = vsel %vm476_vm0, %v4022_v14, 0.0 }
 0x9e1   : > { %3935 = vadd.xlane.f32.xlu1 %v3934_v13  ;;  %4070 = vadd.xlane.f32.xlu0 %v4069_v5  ;;  %v4021_v5 = vmul.f32 %v9233_v6, %v9233_v6 }
 0x9e3   : > { %v4081_v49 = vsel %vm476_vm0, %v4021_v5, 0.0 }
 0x9e5   : > { %4073 = vadd.xlane.f32.xlu1 %v4072_v18  ;;  %3938 = vadd.xlane.f32.xlu0 %v3937_v38 }
 0x9e9   : > { %3941 = vadd.xlane.f32.xlu1 %v3940_v61  ;;  %4076 = vadd.xlane.f32.xlu0 %v4075_v48 }
 0x9ed   : > { %4079 = vadd.xlane.f32.xlu1 %v4078_v10  ;;  %4082 = vadd.xlane.f32.xlu0 %v4081_v49 }
 0x9f1   : > { %4085 = vadd.xlane.f32.xlu1 %v4084_v22 }
 0xa17   : > { %v3897_v13 = vpop.xlane.xlu0 %3896 }
 0xa18   : > { %v3959_v29 = vmul.f32 0.015625, %v3897_v13 }
 0xa1a   : > { %v9256_v18 = vsub.f32 %v9032_v46, %v3959_v29 }
 0xa1b   : > { %v3900_v30 = vpop.xlane.xlu1 %3899  ;;  %v3903_v55 = vpop.xlane.xlu0 %3902 }
 0xa1c   : > { %v3960_v36 = vmul.f32 0.015625, %v3900_v30  ;;  %v3961_v38 = vmul.f32 0.015625, %v3903_v55  ;;  %v4023_v48 = vmul.f32 %v9256_v18, %v9256_v18 }
 0xa1e   : > { %v9261_v61 = vsub.f32 %v9043_v44, %v3960_v36  ;;  %v9264_v52 = vsub.f32 %v9038_v42, %v3961_v38  ;;  %v4087_v5 = vsel %vm476_vm0, %v4023_v48, 0.0 }
 0xa1f   : > { %v3906_v10 = vpop.xlane.xlu1 %3905  ;;  %4088 = vadd.xlane.f32.xlu0 %v4087_v5  ;;  %v4041_v49 = vpop.xlane.xlu0 %4040 }
 0xa20   : > { %v3962_v14 = vmul.f32 0.015625, %v3906_v10  ;;  %v4135_v22 = vmul.f32 0.015625, %v4041_v49  ;;  %v4024_v13 = vmul.f32 %v9261_v61, %v9261_v61  ;;  %v4025_v29 = vmul.f32 %v9264_v52, %v9264_v52 }
 0xa22   : > { %v9272_v30 = vsub.f32 %v9051_v0, %v3962_v14  ;;  %v4167_v55 = vadd.f32 1e-06, %v4135_v22  ;;  %v4090_v36 = vsel %vm476_vm0, %v4024_v13, 0.0  ;;  %v4093_v38 = vsel %vm476_vm0, %v4025_v29, 0.0 }
 0xa23   : > { %v4044_v48 = vpop.xlane.xlu1 %4043  ;;  %4091 = vadd.xlane.f32.xlu1 %v4090_v36  ;;  %4094 = vadd.xlane.f32.xlu0 %v4093_v38 }
 0xa24   : > { %v4136_v5 = vmul.f32 0.015625, %v4044_v48  ;;  %v4026_v10 = vmul.f32 %v9272_v30, %v9272_v30  ;;  %6752 = vrsqrt.f32 %v4167_v55 }
 0xa26   : > { %v4168_v49 = vadd.f32 1e-06, %v4136_v5  ;;  %v3909_v42 = vpop.xlane.xlu0 %3908  ;;  %v4096_v44 = vsel %vm476_vm0, %v4026_v10, 0.0 }
 0xa27   : > { %v3963_v46 = vmul.f32 0.015625, %v3909_v42  ;;  %4097 = vadd.xlane.f32.xlu1 %v4096_v44 }
 0xa28   : > { %6754 = vrsqrt.f32 %v4168_v49 }
 0xa29   : > { %v9280_v14 = vsub.f32 %v9073_v35, %v3963_v46 }
 0xa2a   : > { %v3912_v22 = vpop.xlane.xlu1 %3911  ;;  %v4047_v13 = vpop.xlane.xlu0 %4046 }
 0xa2b   : > { %v3964_v29 = vmul.f32 0.015625, %v3912_v22  ;;  %v4137_v36 = vmul.f32 0.015625, %v4047_v13  ;;  %v4027_v38 = vmul.f32 %v9280_v14, %v9280_v14 }
 0xa2d   : > { %v9285_v48 = vsub.f32 %v9085_v37, %v3964_v29  ;;  %v4169_v55 = vadd.f32 1e-06, %v4137_v36  ;;  %v4099_v5 = vsel %vm476_vm0, %v4027_v38, 0.0 }
 0xa2e   : > { %v4050_v10 = vpop.xlane.xlu1 %4049  ;;  %4100 = vadd.xlane.f32.xlu0 %v4099_v5  ;;  %v3915_v42 = vpop.xlane.xlu0 %3914 }
 0xa2f   : > { %v4138_v44 = vmul.f32 0.015625, %v4050_v10  ;;  %v3965_v49 = vmul.f32 0.015625, %v3915_v42  ;;  %v4028_v46 = vmul.f32 %v9285_v48, %v9285_v48  ;;  %6756 = vrsqrt.f32 %v4169_v55 }
 0xa31   : > { %v4170_v22 = vadd.f32 1e-06, %v4138_v44  ;;  %v9291_v13 = vsub.f32 %v9094_v51, %v3965_v49  ;;  %v4102_v35 = vsel %vm476_vm0, %v4028_v46, 0.0  ;;  %v6753_v37 = vpop.eup %6752 }
 0xa32   : > { %4103 = vadd.xlane.f32.xlu1 %v4102_v35  ;;  %v3918_v29 = vpop.xlane.xlu1 %3917  ;;  %v4053_v36 = vpop.xlane.xlu0 %4052  ;;  %v4231_v49 = vmul.f32 %v6753_v37, %v9035_v24 }
 0xa33   : > { %6758 = vrsqrt.f32 %v4170_v22  ;;  %v3966_v38 = vmul.f32 0.015625, %v3918_v29  ;;  %v4139_v5 = vmul.f32 0.015625, %v4053_v36  ;;  %v4029_v10 = vmul.f32 %v9291_v13, %v9291_v13 }
 0xa35   : > { %v6755_v42 = vpop.eup %6754  ;;  %v9297_v0 = vsub.f32 %v9102_v23, %v3966_v38  ;;  %v4171_v55 = vadd.f32 1e-06, %v4139_v5  ;;  %v4105_v44 = vsel %vm476_vm0, %v4029_v10, 0.0 }
 0xa36   : > { %v4232_v35 = vmul.f32 %v6755_v42, %v9048_v7  ;;  %v4056_v46 = vpop.xlane.xlu1 %4055  ;;  %4106 = vadd.xlane.f32.xlu0 %v4105_v44 }
 0xa37   : > { %v4140_v51 = vmul.f32 0.015625, %v4056_v46  ;;  %v4030_v22 = vmul.f32 %v9297_v0, %v9297_v0  ;;  %6760 = vrsqrt.f32 %v4171_v55 }
 0xa38   : > { %v4263_v29 = vpack.c.bf16 %v4232_v35, %v4231_v49 }
 0xa39   : > { %v4172_v36 = vadd.f32 1e-06, %v4140_v51  ;;  %v4108_v43 = vsel %vm476_vm0, %v4030_v22, 0.0 }
 0xa3a   : > { %4109 = vadd.xlane.f32.xlu1 %v4108_v43  ;;  %5606 = vmatmul.mubr.msk.bf16.vlgmr.msra.gmra.mxu0 %vm476_vm0, %v4263_v29 }
 0xa3b   : > { %6762 = vrsqrt.f32 %v4172_v36  ;;  %4429 = vmatprep.mubr.bf16.mxu0 %v10058_v9 }
 0xa3c   : > { %v6757_v24 = vpop.eup %6756 }
 0xa3d   : > { %v4233_v7 = vmul.f32 %v6757_v24, %v9065_v17 }
 0xa40   : > { %v6759_v37 = vpop.eup %6758 }
 0xa41   : > { %v4234_v38 = vmul.f32 %v6759_v37, %v9076_v39 }
 0xa43   : > { %v4264_v5 = vpack.c.bf16 %v4234_v38, %v4233_v7 }
 0xa44   : > { %v6761_v10 = vpop.eup %6760 }
 0xa45   : > { %5607 = vmatmul.mubr.msk.bf16.gmra.mxu0 %vm476_vm0, %v4264_v5  ;;  %v4235_v43 = vmul.f32 %v6761_v10, %v9091_v15 }
 0xa46   : > { %4439 = vmatprep.mubr.bf16.mxu0 %v10058_v9 }
 0xa48   : > { %v6763_v51 = vpop.eup %6762 }
 0xa49   : > { %v4236_v42 = vmul.f32 %v6763_v51, %v9099_v41 }
 0xa4b   : > { %v4265_v55 = vpack.c.bf16 %v4236_v42, %v4235_v43 }
 0xa4d   : > { %5608 = vmatmul.mubr.msk.bf16.gmra.mxu0 %vm476_vm0, %v4265_v55 }
 0xa4e   : > { %4449 = vmatprep.mubr.bf16.mxu0 %v10058_v9 }
 0xa56   : > { %v3921_v44 = vpop.xlane.xlu0 %3920 }
 0xa57   : > { %v3967_v17 = vmul.f32 0.015625, %v3921_v44 }
 0xa59   : > { %v9316_v39 = vsub.f32 %v9149_v11, %v3967_v17 }
 0xa5a   : > { %v3924_v49 = vpop.xlane.xlu1 %3923  ;;  %v4059_v35 = vpop.xlane.xlu0 %4058 }
 0xa5b   : > { %v3968_v46 = vmul.f32 0.015625, %v3924_v49  ;;  %v4141_v22 = vmul.f32 0.015625, %v4059_v35  ;;  %v4031_v29 = vmul.f32 %v9316_v39, %v9316_v39 }
 0xa5d   : > { %v9321_v15 = vsub.f32 %v9161_v25, %v3968_v46  ;;  %v4173_v41 = vadd.f32 1e-06, %v4141_v22  ;;  %v4111_v36 = vsel %vm476_vm0, %v4031_v29, 0.0 }
 0xa5e   : > { %v4062_v24 = vpop.xlane.xlu1 %4061  ;;  %4112 = vadd.xlane.f32.xlu0 %v4111_v36  ;;  %v3927_v37 = vpop.xlane.xlu0 %3926 }
 0xa5f   : > { %v4142_v7 = vmul.f32 0.015625, %v4062_v24  ;;  %v3969_v38 = vmul.f32 0.015625, %v3927_v37  ;;  %v4032_v5 = vmul.f32 %v9321_v15, %v9321_v15  ;;  %6764 = vrsqrt.f32 %v4173_v41 }
 0xa61   : > { %v4174_v10 = vadd.f32 1e-06, %v4142_v7  ;;  %v9327_v51 = vsub.f32 %v9170_v32, %v3969_v38  ;;  %v4114_v43 = vsel %vm476_vm0, %v4032_v5, 0.0 }
 0xa62   : > { %4115 = vadd.xlane.f32.xlu1 %v4114_v43  ;;  %v3930_v42 = vpop.xlane.xlu1 %3929  ;;  %v4065_v55 = vpop.xlane.xlu0 %4064 }
 0xa63   : > { %6766 = vrsqrt.f32 %v4174_v10  ;;  %v3970_v44 = vmul.f32 0.015625, %v3930_v42  ;;  %v4143_v17 = vmul.f32 0.015625, %v4065_v55  ;;  %v4033_v49 = vmul.f32 %v9327_v51, %v9327_v51 }
 0xa65   : > { %v9333_v35 = vsub.f32 %v9183_v58, %v3970_v44  ;;  %v4175_v46 = vadd.f32 1e-06, %v4143_v17  ;;  %v4117_v22 = vsel %vm476_vm0, %v4033_v49, 0.0 }
 0xa66   : > { %v4068_v29 = vpop.xlane.xlu1 %4067  ;;  %4118 = vadd.xlane.f32.xlu0 %v4117_v22  ;;  %v3933_v41 = vpop.xlane.xlu0 %3932 }
 0xa67   : > { %v4144_v36 = vmul.f32 0.015625, %v4068_v29  ;;  %v3971_v24 = vmul.f32 0.015625, %v3933_v41  ;;  %v4034_v37 = vmul.f32 %v9333_v35, %v9333_v35  ;;  %6768 = vrsqrt.f32 %v4175_v46 }
 0xa69   : > { %v4176_v7 = vadd.f32 1e-06, %v4144_v36  ;;  %v9339_v38 = vsub.f32 %v9194_v27, %v3971_v24  ;;  %v4120_v5 = vsel %vm476_vm0, %v4034_v37, 0.0 }
 0xa6a   : > { %4121 = vadd.xlane.f32.xlu1 %v4120_v5  ;;  %v3936_v10 = vpop.xlane.xlu1 %3935  ;;  %v4071_v43 = vpop.xlane.xlu0 %4070 }
 0xa6b   : > { %6770 = vrsqrt.f32 %v4176_v7  ;;  %v3972_v42 = vmul.f32 0.015625, %v3936_v10  ;;  %v4145_v55 = vmul.f32 0.015625, %v4071_v43  ;;  %v4035_v44 = vmul.f32 %v9339_v38, %v9339_v38 }
 0xa6c   : > { %v6765_v17 = vpop.eup %6764 }
 0xa6d   : > { %v9345_v49 = vsub.f32 %v9208_v8, %v3972_v42  ;;  %v4177_v46 = vadd.f32 1e-06, %v4145_v55  ;;  %v4123_v22 = vsel %vm476_vm0, %v4035_v44, 0.0  ;;  %v4237_v5 = vmul.f32 %v6765_v17, %v9142_v59 }
 0xa6e   : > { %v4074_v29 = vpop.xlane.xlu1 %4073  ;;  %4124 = vadd.xlane.f32.xlu0 %v4123_v22  ;;  %v3939_v41 = vpop.xlane.xlu0 %3938 }
 0xa6f   : > { %v4146_v36 = vmul.f32 0.015625, %v4074_v29  ;;  %v3973_v24 = vmul.f32 0.015625, %v3939_v41  ;;  %v4036_v37 = vmul.f32 %v9345_v49, %v9345_v49  ;;  %6772 = vrsqrt.f32 %v4177_v46 }
 0xa70   : > { %v6767_v7 = vpop.eup %6766 }
 0xa71   : > { %v4178_v10 = vadd.f32 1e-06, %v4146_v36  ;;  %v9352_v43 = vsub.f32 %v9222_v57, %v3973_v24  ;;  %v4126_v42 = vsel %vm476_vm0, %v4036_v37, 0.0  ;;  %v4238_v55 = vmul.f32 %v6767_v7, %v9152_v16 }
 0xa72   : > { %4127 = vadd.xlane.f32.xlu1 %v4126_v42  ;;  %v3942_v44 = vpop.xlane.xlu1 %3941  ;;  %v4077_v22 = vpop.xlane.xlu0 %4076 }
 0xa73   : > { %6774 = vrsqrt.f32 %v4178_v10  ;;  %v3974_v29 = vmul.f32 0.015625, %v3942_v44  ;;  %v4147_v41 = vmul.f32 0.015625, %v4077_v22  ;;  %v4266_v8 = vpack.c.bf16 %v4238_v55, %v4237_v5 }
 0xa74   : > { %v4037_v46 = vmul.f32 %v9352_v43, %v9352_v43  ;;  %v6769_v27 = vpop.eup %6768 }
 0xa75   : > { %v9359_v59 = vsub.f32 %v9236_v62, %v3974_v29  ;;  %v4179_v17 = vadd.f32 1e-06, %v4147_v41  ;;  %5609 = vmatmul.mubr.msk.bf16.gmra.mxu0 %vm476_vm0, %v4266_v8  ;;  %v4239_v10 = vmul.f32 %v6769_v27, %v9164_v53 }
 0xa76   : > { %v4080_v36 = vpop.xlane.xlu1 %4079  ;;  %v4129_v16 = vsel %vm476_vm0, %v4037_v46, 0.0  ;;  %v4083_v24 = vpop.xlane.xlu0 %4082  ;;  %4459 = vmatprep.mubr.bf16.mxu0 %v10058_v9  ;;  %v6416_v46 = vld [vmem:[%s9888_s8 + $0x78] sm:$0xff]  }
 0xa77   : > { %v4148_v37 = vmul.f32 0.015625, %v4080_v36  ;;  %4130 = vadd.xlane.f32.xlu0 %v4129_v16  ;;  %v4038_v7 = vmul.f32 %v9359_v59, %v9359_v59  ;;  %6776 = vrsqrt.f32 %v4179_v17  ;;  %v4149_v55 = vmul.f32 0.015625, %v4083_v24  ;;  %v6417_v17 = vld [vmem:[%s9888_s8 + $0x38] sm:$0xff]   ;;  %5849 = vmatprep.subr.bf16.mxu1 %v6416_v46  ;;  %v6419_v24 = vld [vmem:[%s9888_s8 + $0x30] sm:$0xff]  }
 0xa78   : > { %v6771_v5 = vpop.eup %6770  ;;  %5850 = vmatpush3.bf16.msra.mxu1 %v6417_v17  ;;  %v6425_v17 = vld [vmem:[%s9888_s8 + $0x18] sm:$0xff]  }
 0xa79   : > { %v4180_v42 = vadd.f32 1e-06, %v4148_v37  ;;  %v4132_v44 = vsel %vm476_vm0, %v4038_v7, 0.0  ;;  %v4240_v8 = vmul.f32 %v6771_v5, %v9180_v31  ;;  %v4181_v27 = vadd.f32 1e-06, %v4149_v55  ;;  %v6418_v31 = vld [vmem:[%s9888_s8 + $0x70] sm:$0xff]  }
 0xa7a   : > { %4133 = vadd.xlane.f32.xlu1 %v4132_v44  ;;  %v4086_v22 = vpop.xlane.xlu1 %4085  ;;  %5851 = vmatprep.subr.bf16.mxu1 %v6418_v31  ;;  %v6423_v44 = vld [vmem:[%s9888_s8 + $0x20] sm:$0xff]  }
 0xa7b   : > { %6778 = vrsqrt.f32 %v4180_v42  ;;  %v4150_v29 = vmul.f32 0.015625, %v4086_v22  ;;  %v4267_v41 = vpack.c.bf16 %v4240_v8, %v4239_v10  ;;  %v6420_v10 = vld [vmem:[%s9888_s8 + $0x68] sm:$0xff]  }
 0xa7c   : > { %v6773_v53 = vpop.eup %6772  ;;  %5852 = vmatpush3.bf16.msra.mxu1 %v6419_v24  ;;  %v6421_v42 = vld [vmem:[%s9888_s8 + $0x28] sm:$0xff]   ;;  %v6431_v24 = vld [vmem:[%s9888_s8] sm:$0xff]  }
 0xa7d   : > { %v4182_v36 = vadd.f32 1e-06, %v4150_v29  ;;  %5610 = vmatmul.mubr.msk.bf16.gmra.mxu0 %vm476_vm0, %v4267_v41  ;;  %v4241_v37 = vmul.f32 %v6773_v53, %v9190_v54  ;;  %5853 = vmatprep.subr.bf16.mxu1 %v6420_v10  ;;  %v6422_v54 = vld [vmem:[%s9888_s8 + $0x60] sm:$0xff]   ;;  %v6424_v41 = vld [vmem:[%s9888_s8 + $0x58] sm:$0xff]  }
 0xa7e   : > { %4469 = vmatprep.mubr.bf16.mxu0 %v10058_v9 }
 0xa7f   : > { %6780 = vrsqrt.f32 %v4182_v36 }
 0xa80   : > { %v6775_v16 = vpop.eup %6774  ;;  %6782 = vrsqrt.f32 %v4181_v27  ;;  %5854 = vmatpush3.bf16.msra.mxu1 %v6421_v42  ;;  %v6427_v27 = vld [vmem:[%s9888_s8 + $0x10] sm:$0xff]  }
 0xa81   : > { %v4242_v7 = vmul.f32 %v6775_v16, %v9203_v4  ;;  %5855 = vmatprep.subr.bf16.mxu1 %v6422_v54  ;;  %v6428_v16 = vld [vmem:[%s9888_s8 + $0x48] sm:$0xff]  }
 0xa83   : > { %v4268_v5 = vpack.c.bf16 %v4242_v7, %v4241_v37 }
 0xa84   : > { %v6777_v55 = vpop.eup %6776  ;;  %5856 = vmatpush3.bf16.msra.mxu1 %v6423_v44 }
 0xa85   : > { %5611 = vmatmul.mubr.msk.bf16.gmra.mxu0 %vm476_vm0, %v4268_v5  ;;  %v4243_v8 = vmul.f32 %v6777_v55, %v9216_v60  ;;  %5857 = vmatprep.subr.bf16.mxu1 %v6424_v41 }
 0xa86   : > { %4479 = vmatprep.mubr.bf16.mxu0 %v10058_v9 }
 0xa88   : > { %v6779_v4 = vpop.eup %6778  ;;  %5858 = vmatpush3.bf16.msra.mxu1 %v6425_v17 }
 0xa89   : > { %v4244_v22 = vmul.f32 %v6779_v4, %v9227_v26  ;;  %v6426_v26 = vld [vmem:[%s9888_s8 + $0x50] sm:$0xff]  }
 0xa8a   : > { %5859 = vmatprep.subr.bf16.mxu1 %v6426_v26 }
 0xa8b   : > { %v4269_v29 = vpack.c.bf16 %v4244_v22, %v4243_v8 }
 0xa8c   : > { %v6781_v46 = vpop.eup %6780  ;;  %5860 = vmatpush3.bf16.msra.mxu1 %v6427_v27 }
 0xa8d   : > { %5612 = vmatmul.mubr.msk.bf16.gmra.mxu0 %vm476_vm0, %v4269_v29  ;;  %v6783_v53 = vpop.eup %6782  ;;  %v4246_v60 = vmul.f32 %v6781_v46, %v9242_v2  ;;  %v6429_v2 = vld [vmem:[%s9888_s8 + $0x8] sm:$0xff]   ;;  %5861 = vmatprep.subr.bf16.mxu1 %v6428_v16 }
 0xa8e   : > { %4489 = vmatprep.mubr.bf16.mxu0 %v10058_v9  ;;  %v4245_v36 = vmul.f32 %v6783_v53, %v9233_v6  ;;  %v6430_v6 = vld [vmem:[%s9888_s8 + $0x40] sm:$0xff]  }
 0xa90   : > { %v4270_v31 = vpack.c.bf16 %v4246_v60, %v4245_v36  ;;  %5862 = vmatpush3.bf16.msra.mxu1 %v6429_v2 }
 0xa91   : > { %5863 = vmatprep.subr.bf16.mxu1 %v6430_v6 }
 0xa94   : > { %5864 = vmatpush3.bf16.msra.mxu1 %v6431_v24 }
 0xa95   : > { %5613 = vmatmul.mubr.msk.bf16.gmra.mxu0 %vm476_vm0, %v4270_v31 }
 0xa96   : > { %4499 = vmatprep.mubr.bf16.mxu0 %v10058_v9 }
 0xaa8   : > { %v4089_v37 = vpop.xlane.xlu0 %4088 }
 0xaa9   : > { %v4151_v7 = vmul.f32 0.015625, %v4089_v37 }
 0xaab   : > { %v4183_v5 = vadd.f32 1e-06, %v4151_v7 }
 0xaac   : > { %v4092_v10 = vpop.xlane.xlu1 %4091  ;;  %v4095_v42 = vpop.xlane.xlu0 %4094 }
 0xaad   : > { %v4152_v55 = vmul.f32 0.015625, %v4092_v10  ;;  %6784 = vrsqrt.f32 %v4183_v5  ;;  %v4153_v4 = vmul.f32 0.015625, %v4095_v42 }
 0xaaf   : > { %v4184_v54 = vadd.f32 1e-06, %v4152_v55  ;;  %v4185_v22 = vadd.f32 1e-06, %v4153_v4 }
 0xab0   : > { %v4098_v44 = vpop.xlane.xlu1 %4097 }
 0xab1   : > { %6786 = vrsqrt.f32 %v4184_v54  ;;  %v4154_v8 = vmul.f32 0.015625, %v4098_v44 }
 0xab3   : > { %v4186_v29 = vadd.f32 1e-06, %v4154_v8 }
 0xab5   : > { %6788 = vrsqrt.f32 %v4186_v29 }
 0xab6   : > { %6790 = vrsqrt.f32 %v4185_v22 }
 0xab7   : > { %v4101_v41 = vpop.xlane.xlu0 %4100 }
 0xab8   : > { %v4155_v46 = vmul.f32 0.015625, %v4101_v41 }
 0xaba   : > { %v4187_v17 = vadd.f32 1e-06, %v4155_v46  ;;  %v6785_v60 = vpop.eup %6784 }
 0xabb   : > { %v4104_v53 = vpop.xlane.xlu1 %4103  ;;  %v4247_v16 = vmul.f32 %v6785_v60, %v9256_v18 }
 0xabc   : > { %v4156_v26 = vmul.f32 0.015625, %v4104_v53  ;;  %6792 = vrsqrt.f32 %v4187_v17 }
 0xabe   : > { %v6787_v27 = vpop.eup %6786  ;;  %v4188_v36 = vadd.f32 1e-06, %v4156_v26 }
 0xabf   : > { %v4107_v31 = vpop.xlane.xlu0 %4106  ;;  %v4248_v2 = vmul.f32 %v6787_v27, %v9261_v61 }
 0xac0   : > { %6794 = vrsqrt.f32 %v4188_v36  ;;  %v4157_v6 = vmul.f32 0.015625, %v4107_v31 }
 0xac1   : > { %v4271_v24 = vpack.c.bf16 %v4248_v2, %v4247_v16 }
 0xac2   : > { %v6789_v37 = vpop.eup %6788  ;;  %v4189_v7 = vadd.f32 1e-06, %v4157_v6 }
 0xac3   : > { %v4110_v5 = vpop.xlane.xlu1 %4109  ;;  %5614 = vmatmul.mubr.msk.bf16.gmra.mxu0 %vm476_vm0, %v4271_v24  ;;  %v6791_v10 = vpop.eup %6790  ;;  %v4250_v55 = vmul.f32 %v6789_v37, %v9272_v30  ;;  %v10106_v37 = vld [vmem:[#allocation30_spill] sm:$0xff] }
 0xac4   : > { %v4158_v42 = vmul.f32 0.015625, %v4110_v5  ;;  %4509 = vmatprep.mubr.bf16.mxu0 %v10058_v9  ;;  %6796 = vrsqrt.f32 %v4189_v7  ;;  %v4249_v18 = vmul.f32 %v6791_v10, %v9264_v52  ;;  %v10107_v7 = vsub.s32 0, %v10106_v37 }
 0xac6   : > { %v4190_v54 = vadd.f32 1e-06, %v4158_v42  ;;  %v4272_v61 = vpack.c.bf16 %v4250_v55, %v4249_v18  ;;  %v10108_v42 = vsub.s32 1, %v10106_v37 }
 0xac8   : > { %6798 = vrsqrt.f32 %v4190_v54 }
 0xac9   : > { %v6793_v4 = vpop.eup %6792 }
 0xaca   : > { %v4251_v8 = vmul.f32 %v6793_v4, %v9280_v14 }
 0xacb   : > { %5615 = vmatmul.mubr.msk.bf16.gmra.mxu0 %vm476_vm0, %v4272_v61 }
 0xacc   : > { %4519 = vmatprep.mubr.bf16.mxu0 %v10058_v9 }
 0xacd   : > { %v6795_v44 = vpop.eup %6794 }
 0xace   : > { %v4252_v22 = vmul.f32 %v6795_v44, %v9285_v48 }
 0xad0   : > { %v4273_v29 = vpack.c.bf16 %v4252_v22, %v4251_v8 }
 0xad1   : > { %v6797_v41 = vpop.eup %6796 }
 0xad2   : > { %v4253_v52 = vmul.f32 %v6797_v41, %v9291_v13 }
 0xad3   : > { %5616 = vmatmul.mubr.msk.bf16.gmra.mxu0 %vm476_vm0, %v4273_v29 }
 0xad4   : > { %4529 = vmatprep.mubr.bf16.mxu0 %v10058_v9 }
 0xad5   : > { %v6799_v30 = vpop.eup %6798 }
 0xad6   : > { %v4254_v46 = vmul.f32 %v6799_v30, %v9297_v0  ;;  %v4287_v0 = vld [vmem:[%s9887_s7] sm:$0x3] }
 0xad7   : > { %v9452_v5 = vrot.slane %v4287_v0, %v10107_v7  ;;  %v9456_v55 = vrot.slane %v4287_v0, %v10108_v42 }
 0xad8   : > { %v4274_v17 = vpack.c.bf16 %v4254_v46, %v4253_v52 }
 0xadb   : > { %5617 = vmatmul.mubr.msk.bf16.gmra.mxu0 %vm476_vm0, %v4274_v17 }
 0xadc   : > { %4539 = vmatprep.mubr.bf16.mxu0 %v10058_v9 }
 0xae7   : > { %v4113_v53 = vpop.xlane.xlu0 %4112 }
 0xae8   : > { %v4159_v14 = vmul.f32 0.015625, %v4113_v53 }
 0xaea   : > { %v4191_v60 = vadd.f32 1e-06, %v4159_v14 }
 0xaeb   : > { %v4116_v48 = vpop.xlane.xlu1 %4115 }
 0xaec   : > { %v4160_v26 = vmul.f32 0.015625, %v4116_v48  ;;  %6800 = vrsqrt.f32 %v4191_v60 }
 0xaee   : > { %v4192_v27 = vadd.f32 1e-06, %v4160_v26 }
 0xaef   : > { %v4119_v36 = vpop.xlane.xlu0 %4118 }
 0xaf0   : > { %6802 = vrsqrt.f32 %v4192_v27  ;;  %v4161_v31 = vmul.f32 0.015625, %v4119_v36 }
 0xaf2   : > { %v4193_v16 = vadd.f32 1e-06, %v4161_v31 }
 0xaf3   : > { %v4122_v2 = vpop.xlane.xlu1 %4121 }
 0xaf4   : > { %v4162_v13 = vmul.f32 0.015625, %v4122_v2  ;;  %6804 = vrsqrt.f32 %v4193_v16 }
 0xaf6   : > { %v4194_v6 = vadd.f32 1e-06, %v4162_v13 }
 0xaf7   : > { %v4125_v24 = vpop.xlane.xlu0 %4124 }
 0xaf8   : > { %6806 = vrsqrt.f32 %v4194_v6  ;;  %v4163_v10 = vmul.f32 0.015625, %v4125_v24 }
 0xaf9   : > { %v6801_v18 = vpop.eup %6800 }
 0xafa   : > { %v4421_v54 = vpop.f32.mrf.mxu0  ;;  %v4195_v61 = vadd.f32 1e-06, %v4163_v10  ;;  %v4255_v17 = vmul.f32 %v6801_v18, %v9316_v39 }
 0xafb   : > { %v9459_v4 = vadd.f32 %v4421_v54, %v9452_v5  ;;  %v4128_v44 = vpop.xlane.xlu1 %4127 }
 0xafc   : > { %v4164_v8 = vmul.f32 0.015625, %v4128_v44  ;;  %v4423_v22 = vpop.f32.mrf.mxu0  ;;  %6808 = vrsqrt.f32 %v4195_v61 }
 0xafd   : > { %v6803_v29 = vpop.eup %6802  ;;  %v9462_v41 = vadd.f32 %v4423_v22, %v9456_v55  ;;  %v4644_v30 = vmul.f32 0.70710677, %v9459_v4 }
 0xafe   : > { %v4196_v52 = vadd.f32 1e-06, %v4164_v8  ;;  %v4425_v46 = vpop.f32.mrf.mxu0  ;;  %v4256_v53 = vmul.f32 %v6803_v29, %v9321_v15 }
 0xaff   : > { %v4645_v14 = vmul.f32 0.70710677, %v9462_v41  ;;  %v9469_v60 = vadd.f32 %v4425_v46, %v9452_v5 }
 0xb00   : > { %6810 = vrsqrt.f32 %v4196_v52  ;;  %v4131_v48 = vpop.xlane.xlu0 %4130  ;;  %v4427_v26 = vpop.f32.mrf.mxu0  ;;  %v4275_v27 = vpack.c.bf16 %v4256_v53, %v4255_v17 }
 0xb01   : > { %6812 = verf.f32 %v4645_v14  ;;  %v4646_v36 = vmul.f32 0.70710677, %v9469_v60  ;;  %v4165_v31 = vmul.f32 0.015625, %v4131_v48  ;;  %v4428_v16 = vadd.f32 %v4427_v26, %v9456_v55  ;;  %v6805_v2 = vpop.eup %6804 }
 0xb02   : > { %6814 = verf.f32 %v4644_v30  ;;  %5618 = vmatmul.mubr.msk.bf16.gmra.mxu0 %vm476_vm0, %v4275_v27  ;;  %v4257_v54 = vmul.f32 %v6805_v2, %v9327_v51 }
 0xb03   : > { %6816 = verf.f32 %v4646_v36  ;;  %v4197_v39 = vadd.f32 1e-06, %v4165_v31  ;;  %v4134_v15 = vpop.xlane.xlu1 %4133  ;;  %4549 = vmatprep.mubr.bf16.mxu0 %v10058_v9  ;;  %v4647_v13 = vmul.f32 0.70710677, %v4428_v16 }
 0xb04   : > { %v4166_v0 = vmul.f32 0.015625, %v4134_v15 }
 0xb05   : > { %v6807_v6 = vpop.eup %6806  ;;  %6818 = vrsqrt.f32 %v4197_v39  ;;  %v4431_v24 = vpop.f32.mrf.mxu0 }
 0xb06   : > { %6820 = verf.f32 %v4647_v13  ;;  %v4198_v37 = vadd.f32 1e-06, %v4166_v0  ;;  %v9476_v7 = vadd.f32 %v4431_v24, %v9452_v5  ;;  %v4258_v10 = vmul.f32 %v6807_v6, %v9333_v35 }
 0xb07   : > { %v4433_v42 = vpop.f32.mrf.mxu0 }
 0xb08   : > { %6822 = vrsqrt.f32 %v4198_v37  ;;  %v9481_v18 = vadd.f32 %v4433_v42, %v9456_v55  ;;  %v4648_v61 = vmul.f32 0.70710677, %v9476_v7  ;;  %v4276_v8 = vpack.c.bf16 %v4258_v10, %v4257_v54 }
 0xb09   : > { %v4435_v44 = vpop.f32.mrf.mxu0  ;;  %v6809_v35 = vpop.eup %6808 }
 0xb0a   : > { %v4649_v22 = vmul.f32 0.70710677, %v9481_v18  ;;  %v9486_v29 = vadd.f32 %v4435_v44, %v9452_v5  ;;  %5619 = vmatmul.mubr.msk.bf16.gmra.mxu0 %vm476_vm0, %v4276_v8  ;;  %v4259_v36 = vmul.f32 %v6809_v35, %v9339_v38  ;;  %v4580_v38 = vmul.f32 0.5, %v9459_v4 }
 0xb0b   : > { %v4437_v30 = vpop.f32.mrf.mxu0  ;;  %4559 = vmatprep.mubr.bf16.mxu0 %v10058_v9  ;;  %v4582_v44 = vmul.f32 0.5, %v9469_v60 }
 0xb0c   : > { %6824 = verf.f32 %v4649_v22  ;;  %v4650_v51 = vmul.f32 0.70710677, %v9486_v29  ;;  %v4438_v52 = vadd.f32 %v4437_v30, %v9456_v55  ;;  %v4583_v22 = vmul.f32 0.5, %v4428_v16 }
 0xb0d   : > { %v6811_v46 = vpop.eup %6810  ;;  %6826 = verf.f32 %v4648_v61  ;;  %v4441_v17 = vpop.f32.mrf.mxu0  ;;  %v4581_v61 = vmul.f32 0.5, %v9462_v41 }
 0xb0e   : > { %v6813_v53 = vpop.eup %6812  ;;  %6828 = verf.f32 %v4650_v51  ;;  %v4651_v14 = vmul.f32 0.70710677, %v4438_v52  ;;  %v9493_v48 = vadd.f32 %v4441_v17, %v9452_v5  ;;  %v4260_v31 = vmul.f32 %v6811_v46, %v9345_v49 }
 0xb0f   : > { %v6815_v26 = vpop.eup %6814  ;;  %v4443_v27 = vpop.f32.mrf.mxu0  ;;  %v4773_v13 = vadd.f32 1.0, %v6813_v53 }
 0xb10   : > { %v6817_v39 = vpop.eup %6816  ;;  %6830 = verf.f32 %v4651_v14  ;;  %v4652_v15 = vmul.f32 0.70710677, %v9493_v48  ;;  %v9499_v2 = vadd.f32 %v4443_v27, %v9456_v55  ;;  %v4277_v24 = vpack.c.bf16 %v4260_v31, %v4259_v36 }
 0xb11   : > { %v4774_v0 = vadd.f32 1.0, %v6817_v39  ;;  %v4445_v6 = vpop.f32.mrf.mxu0  ;;  %v4772_v49 = vadd.f32 1.0, %v6815_v26  ;;  %v4837_v46 = vmul.f32 %v4773_v13, %v4581_v61 }
 0xb12   : > { %v6819_v37 = vpop.eup %6818  ;;  %v4653_v10 = vmul.f32 0.70710677, %v9499_v2  ;;  %v4446_v42 = vadd.f32 %v4445_v6, %v9452_v5  ;;  %5620 = vmatmul.mubr.msk.bf16.gmra.mxu0 %vm476_vm0, %v4277_v24  ;;  %6832 = verf.f32 %v4652_v15  ;;  %v4587_v24 = vmul.f32 0.5, %v4438_v52 }
 0xb13   : > { %v6821_v54 = vpop.eup %6820  ;;  %v4447_v8 = vpop.f32.mrf.mxu0  ;;  %4569 = vmatprep.mubr.bf16.mxu0 %v10058_v9  ;;  %v4838_v17 = vmul.f32 %v4774_v0, %v4582_v44  ;;  %v4261_v41 = vmul.f32 %v6819_v37, %v9352_v43  ;;  %v4836_v14 = vmul.f32 %v4772_v49, %v4580_v38  ;;  %v4586_v43 = vmul.f32 0.5, %v9486_v29 }
 0xb14   : > { %v4775_v30 = vadd.f32 1.0, %v6821_v54  ;;  %v4654_v35 = vmul.f32 0.70710677, %v4446_v42  ;;  %6834 = verf.f32 %v4653_v10  ;;  %v4448_v4 = vadd.f32 %v4447_v8, %v9456_v55 }
 0xb15   : > { %v6823_v51 = vpop.eup %6822  ;;  %v4900_v31 = vpack.c.bf16 %v4838_v17, %v4836_v14  ;;  %v4584_v10 = vmul.f32 0.5, %v9476_v7  ;;  %v4589_v52 = vmul.f32 0.5, %v9499_v2 }
 0xb16   : > { %v4839_v53 = vmul.f32 %v4775_v30, %v4583_v22  ;;  %6836 = verf.f32 %v4654_v35  ;;  %v4262_v60 = vmul.f32 %v6823_v51, %v9359_v59  ;;  %v4655_v26 = vmul.f32 0.70710677, %v4448_v4 }
 0xb17   : > { %v4585_v59 = vmul.f32 0.5, %v9481_v18  ;;  %v4590_v18 = vmul.f32 0.5, %v4446_v42 }
 0xb18   : > { %v4901_v16 = vpack.c.bf16 %v4839_v53, %v4837_v46  ;;  %v4278_v27 = vpack.c.bf16 %v4262_v60, %v4261_v41  ;;  %6838 = verf.f32 %v4655_v26  ;;  %v4591_v53 = vmul.f32 0.5, %v4448_v4 }
 0xb19   : > { %v6825_v36 = vpop.eup %6824  ;;  %v4588_v41 = vmul.f32 0.5, %v9493_v48 }
 0xb1a   : > { %v6827_v9 = vpop.eup %6826  ;;  %5099 = vmatprep.mubr.bf16.mxu1 %v4901_v16  ;;  %5621 = vmatmul.mubr.msk.bf16.gmra.mxu0 %vm476_vm0, %v4278_v27  ;;  %v4777_v15 = vadd.f32 1.0, %v6825_v36 }
 0xb1b   : > { %v6829_v39 = vpop.eup %6828  ;;  %5100 = vmatmul.mubr.bf16.vlgmr.msra.gmra.mxu1 %v4900_v31  ;;  %v4776_v6 = vadd.f32 1.0, %v6827_v9 }
 0xb1c   : > { %v4778_v13 = vadd.f32 1.0, %v6829_v39  ;;  %v4841_v38 = vmul.f32 %v4777_v15, %v4585_v59 }
 0xb1d   : > { %v6831_v0 = vpop.eup %6830  ;;  %v4840_v44 = vmul.f32 %v4776_v6, %v4584_v10 }
 0xb1e   : > { %v4779_v37 = vadd.f32 1.0, %v6831_v0  ;;  %v4842_v54 = vmul.f32 %v4778_v13, %v4586_v43 }
 0xb1f   : > { %v6833_v61 = vpop.eup %6832 }
 0xb20   : > { %v4843_v49 = vmul.f32 %v4779_v37, %v4587_v24  ;;  %v4902_v35 = vpack.c.bf16 %v4842_v54, %v4840_v44  ;;  %v4780_v17 = vadd.f32 1.0, %v6833_v61 }
 0xb21   : > { %v6835_v8 = vpop.eup %6834 }
 0xb22   : > { %v4903_v22 = vpack.c.bf16 %v4843_v49, %v4841_v38  ;;  %v4781_v46 = vadd.f32 1.0, %v6835_v8  ;;  %v4844_v16 = vmul.f32 %v4780_v17, %v4588_v41 }
 0xb23   : > { %v6837_v30 = vpop.eup %6836 }
 0xb24   : > { %v4782_v51 = vadd.f32 1.0, %v6837_v30  ;;  %5107 = vmatprep.mubr.bf16.mxu1 %v4903_v22  ;;  %v4845_v14 = vmul.f32 %v4781_v46, %v4589_v52 }
 0xb25   : > { %5108 = vmatmul.mubr.bf16.gmra.mxu1 %v4902_v35  ;;  %v6839_v29 = vpop.eup %6838 }
 0xb26   : > { %v4783_v7 = vadd.f32 1.0, %v6839_v29  ;;  %v4846_v60 = vmul.f32 %v4782_v51, %v4590_v18 }
 0xb28   : > { %v4847_v26 = vmul.f32 %v4783_v7, %v4591_v53  ;;  %v4904_v36 = vpack.c.bf16 %v4846_v60, %v4844_v16 }
 0xb2a   : > { %v4905_v27 = vpack.c.bf16 %v4847_v26, %v4845_v14 }
 0xb2c   : > { %5115 = vmatprep.mubr.bf16.mxu1 %v4905_v27 }
 0xb2d   : > { %5116 = vmatmul.mubr.bf16.gmra.mxu1 %v4904_v36 }
 0xb35   : > { %v4451_v31 = vpop.f32.mrf.mxu0 }
 0xb36   : > { %v4452_v9 = vadd.f32 %v4451_v31, %v9452_v5 }
 0xb37   : > { %v4453_v39 = vpop.f32.mrf.mxu0 }
 0xb38   : > { %v4454_v42 = vadd.f32 %v4453_v39, %v9456_v55  ;;  %v4656_v15 = vmul.f32 0.70710677, %v4452_v9 }
 0xb39   : > { %v4455_v2 = vpop.f32.mrf.mxu0 }
 0xb3a   : > { %v4657_v4 = vmul.f32 0.70710677, %v4454_v42  ;;  %v4456_v13 = vadd.f32 %v4455_v2, %v9452_v5  ;;  %v4593_v60 = vmul.f32 0.5, %v4454_v42 }
 0xb3b   : > { %v4457_v48 = vpop.f32.mrf.mxu0 }
 0xb3c   : > { %6840 = verf.f32 %v4657_v4  ;;  %v4658_v0 = vmul.f32 0.70710677, %v4456_v13  ;;  %v4458_v6 = vadd.f32 %v4457_v48, %v9456_v55 }
 0xb3d   : > { %6842 = verf.f32 %v4656_v15  ;;  %v4461_v43 = vpop.f32.mrf.mxu0  ;;  %v4594_v15 = vmul.f32 0.5, %v4456_v13 }
 0xb3e   : > { %6844 = verf.f32 %v4658_v0  ;;  %v4659_v59 = vmul.f32 0.70710677, %v4458_v6  ;;  %v9522_v24 = vadd.f32 %v4461_v43, %v9452_v5  ;;  %v4595_v48 = vmul.f32 0.5, %v4458_v6 }
 0xb3f   : > { %v4463_v37 = vpop.f32.mrf.mxu0  ;;  %v4592_v43 = vmul.f32 0.5, %v4452_v9 }
 0xb40   : > { %6846 = verf.f32 %v4659_v59  ;;  %v4464_v10 = vadd.f32 %v4463_v37, %v9456_v55  ;;  %v4660_v54 = vmul.f32 0.70710677, %v9522_v24 }
 0xb41   : > { %v4465_v38 = vpop.f32.mrf.mxu0 }
 0xb42   : > { %v4661_v49 = vmul.f32 0.70710677, %v4464_v10  ;;  %v4466_v61 = vadd.f32 %v4465_v38, %v9452_v5 }
 0xb43   : > { %v4467_v44 = vpop.f32.mrf.mxu0 }
 0xb44   : > { %6848 = verf.f32 %v4661_v49  ;;  %v4662_v8 = vmul.f32 0.70710677, %v4466_v61  ;;  %v9528_v22 = vadd.f32 %v4467_v44, %v9456_v55 }
 0xb45   : > { %6850 = verf.f32 %v4660_v54  ;;  %v4471_v30 = vpop.f32.mrf.mxu0 }
 0xb46   : > { %6852 = verf.f32 %v4662_v8  ;;  %v4663_v35 = vmul.f32 0.70710677, %v9528_v22  ;;  %v9532_v51 = vadd.f32 %v4471_v30, %v9452_v5 }
 0xb47   : > { %v4473_v46 = vpop.f32.mrf.mxu0 }
 0xb48   : > { %6854 = verf.f32 %v4663_v35  ;;  %v4664_v29 = vmul.f32 0.70710677, %v9532_v51  ;;  %v9536_v18 = vadd.f32 %v4473_v46, %v9456_v55 }
 0xb49   : > { %v6841_v17 = vpop.eup %6840  ;;  %v4475_v52 = vpop.f32.mrf.mxu0 }
 0xb4a   : > { %v6843_v53 = vpop.eup %6842  ;;  %v9539_v7 = vadd.f32 %v4475_v52, %v9452_v5  ;;  %v4665_v14 = vmul.f32 0.70710677, %v9536_v18  ;;  %v4785_v16 = vadd.f32 1.0, %v6841_v17  ;;  %6856 = verf.f32 %v4664_v29 }
 0xb4b   : > { %v6845_v41 = vpop.eup %6844  ;;  %v4477_v26 = vpop.f32.mrf.mxu0  ;;  %v4784_v39 = vadd.f32 1.0, %v6843_v53  ;;  %v4597_v52 = vmul.f32 0.5, %v4464_v10 }
 0xb4c   : > { %v4786_v27 = vadd.f32 1.0, %v6845_v41  ;;  %v4666_v36 = vmul.f32 0.70710677, %v9539_v7  ;;  %6858 = verf.f32 %v4665_v14  ;;  %v9544_v2 = vadd.f32 %v4477_v26, %v9456_v55 }
 0xb4d   : > { %v6847_v31 = vpop.eup %6846  ;;  %v4481_v4 = vpop.f32.mrf.mxu0  ;;  %v4849_v38 = vmul.f32 %v4785_v16, %v4593_v60  ;;  %v4848_v13 = vmul.f32 %v4784_v39, %v4592_v43 }
 0xb4e   : > { %v4787_v0 = vadd.f32 1.0, %v6847_v31  ;;  %6860 = verf.f32 %v4666_v36  ;;  %v9547_v42 = vadd.f32 %v4481_v4, %v9452_v5  ;;  %v4850_v59 = vmul.f32 %v4786_v27, %v4594_v15 }
 0xb4f   : > { %v4667_v37 = vmul.f32 0.70710677, %v9544_v2  ;;  %v4483_v54 = vpop.f32.mrf.mxu0  ;;  %v4598_v36 = vmul.f32 0.5, %v4466_v61  ;;  %v4599_v15 = vmul.f32 0.5, %v9528_v22 }
 0xb50   : > { %v4851_v49 = vmul.f32 %v4787_v0, %v4595_v48  ;;  %v4668_v8 = vmul.f32 0.70710677, %v9547_v42  ;;  %v9552_v30 = vadd.f32 %v4483_v54, %v9456_v55  ;;  %v4906_v17 = vpack.c.bf16 %v4850_v59, %v4848_v13 }
 0xb51   : > { %v6849_v44 = vpop.eup %6848  ;;  %6862 = verf.f32 %v4667_v37  ;;  %v4485_v6 = vpop.f32.mrf.mxu0  ;;  %v4596_v48 = vmul.f32 0.5, %v9522_v24 }
 0xb52   : > { %v6851_v35 = vpop.eup %6850  ;;  %v9555_v46 = vadd.f32 %v4485_v6, %v9452_v5  ;;  %v4907_v9 = vpack.c.bf16 %v4851_v49, %v4849_v38  ;;  %v4669_v53 = vmul.f32 0.70710677, %v9552_v30  ;;  %v4789_v60 = vadd.f32 1.0, %v6849_v44 }
 0xb53   : > { %v6853_v29 = vpop.eup %6852  ;;  %v4487_v41 = vpop.f32.mrf.mxu0  ;;  %6864 = verf.f32 %v4668_v8  ;;  %v4788_v27 = vadd.f32 1.0, %v6851_v35 }
 0xb54   : > { %v4790_v14 = vadd.f32 1.0, %v6853_v29  ;;  %v4670_v26 = vmul.f32 0.70710677, %v9555_v46  ;;  %5123 = vmatprep.mubr.bf16.mxu1 %v4907_v9  ;;  %6866 = verf.f32 %v4669_v53  ;;  %v4488_v31 = vadd.f32 %v4487_v41, %v9456_v55 }
 0xb55   : > { %v6855_v16 = vpop.eup %6854  ;;  %v4491_v39 = vpop.f32.mrf.mxu0  ;;  %5124 = vmatmul.mubr.bf16.gmra.mxu1 %v4906_v17  ;;  %v4853_v37 = vmul.f32 %v4789_v60, %v4597_v52  ;;  %v4852_v38 = vmul.f32 %v4788_v27, %v4596_v48  ;;  %v4601_v27 = vmul.f32 0.5, %v9536_v18 }
 0xb56   : > { %v4791_v10 = vadd.f32 1.0, %v6855_v16  ;;  %6868 = verf.f32 %v4670_v26  ;;  %v9562_v4 = vadd.f32 %v4491_v39, %v9452_v5  ;;  %v4854_v0 = vmul.f32 %v4790_v14, %v4598_v36 }
 0xb57   : > { %v4671_v43 = vmul.f32 0.70710677, %v4488_v31  ;;  %v4493_v59 = vpop.f32.mrf.mxu0  ;;  %v6857_v61 = vpop.eup %6856  ;;  %v4602_v26 = vmul.f32 0.5, %v9539_v7  ;;  %v4603_v36 = vmul.f32 0.5, %v9544_v2  ;;  %v4606_v2 = vmul.f32 0.5, %v9555_v46 }
 0xb58   : > { %v4855_v54 = vmul.f32 %v4791_v10, %v4599_v15  ;;  %v4672_v49 = vmul.f32 0.70710677, %v9562_v4  ;;  %v4494_v44 = vadd.f32 %v4493_v59, %v9456_v55  ;;  %v4908_v9 = vpack.c.bf16 %v4854_v0, %v4852_v38 }
 0xb59   : > { %6870 = verf.f32 %v4671_v43  ;;  %v4495_v22 = vpop.f32.mrf.mxu0  ;;  %v6859_v13 = vpop.eup %6858  ;;  %v4792_v14 = vadd.f32 1.0, %v6857_v61  ;;  %v4600_v15 = vmul.f32 0.5, %v9532_v51  ;;  %v4605_v51 = vmul.f32 0.5, %v9552_v30 }
 0xb5a   : > { %v4496_v8 = vadd.f32 %v4495_v22, %v9452_v5  ;;  %v4909_v6 = vpack.c.bf16 %v4855_v54, %v4853_v37  ;;  %v4673_v24 = vmul.f32 0.70710677, %v4494_v44  ;;  %6872 = verf.f32 %v4672_v49 }
 0xb5b   : > { %v6861_v35 = vpop.eup %6860  ;;  %v4497_v29 = vpop.f32.mrf.mxu0  ;;  %v4793_v41 = vadd.f32 1.0, %v6859_v13  ;;  %v4856_v37 = vmul.f32 %v4792_v14, %v4600_v15  ;;  %v4607_v13 = vmul.f32 0.5, %v4488_v31  ;;  %v4609_v46 = vmul.f32 0.5, %v4494_v44 }
 0xb5c   : > { %v4794_v17 = vadd.f32 1.0, %v6861_v35  ;;  %v4674_v52 = vmul.f32 0.70710677, %v4496_v8  ;;  %v4498_v53 = vadd.f32 %v4497_v29, %v9456_v55  ;;  %5131 = vmatprep.mubr.bf16.mxu1 %v4909_v6  ;;  %6874 = verf.f32 %v4673_v24 }
 0xb5d   : > { %5132 = vmatmul.mubr.bf16.gmra.mxu1 %v4908_v9  ;;  %v4857_v0 = vmul.f32 %v4793_v41, %v4601_v27  ;;  %v4604_v35 = vmul.f32 0.5, %v9547_v42  ;;  %v4610_v30 = vmul.f32 0.5, %v4496_v8  ;;  %v4608_v42 = vmul.f32 0.5, %v9562_v4 }
 0xb5e   : > { %v6863_v60 = vpop.eup %6862  ;;  %6876 = verf.f32 %v4674_v52  ;;  %v4675_v16 = vmul.f32 0.70710677, %v4498_v53  ;;  %v4858_v10 = vmul.f32 %v4794_v17, %v4602_v26  ;;  %v4611_v31 = vmul.f32 0.5, %v4498_v53 }
 0xb5f   : > { %v4795_v39 = vadd.f32 1.0, %v6863_v60 }
 0xb60   : > { %6878 = verf.f32 %v4675_v16  ;;  %v6865_v48 = vpop.eup %6864  ;;  %v4910_v38 = vpack.c.bf16 %v4858_v10, %v4856_v37 }
 0xb61   : > { %v4859_v43 = vmul.f32 %v4795_v39, %v4603_v36  ;;  %v6867_v59 = vpop.eup %6866  ;;  %v4796_v18 = vadd.f32 1.0, %v6865_v48 }
 0xb62   : > { %v4797_v49 = vadd.f32 1.0, %v6867_v59 }
 0xb63   : > { %v6869_v54 = vpop.eup %6868  ;;  %v4911_v61 = vpack.c.bf16 %v4859_v43, %v4857_v0  ;;  %v4860_v41 = vmul.f32 %v4796_v18, %v4604_v35 }
 0xb64   : > { %v4798_v7 = vadd.f32 1.0, %v6869_v54  ;;  %v4861_v29 = vmul.f32 %v4797_v49, %v4605_v51 }
 0xb65   : > { %5139 = vmatprep.mubr.bf16.mxu1 %v4911_v61 }
 0xb66   : > { %v6871_v22 = vpop.eup %6870  ;;  %5140 = vmatmul.mubr.bf16.gmra.mxu1 %v4910_v38  ;;  %v4862_v9 = vmul.f32 %v4798_v7, %v4606_v2 }
 0xb67   : > { %v4799_v6 = vadd.f32 1.0, %v6871_v22  ;;  %v6873_v24 = vpop.eup %6872 }
 0xb68   : > { %v4912_v26 = vpack.c.bf16 %v4862_v9, %v4860_v41  ;;  %v4800_v39 = vadd.f32 1.0, %v6873_v24 }
 0xb69   : > { %v4863_v17 = vmul.f32 %v4799_v6, %v4607_v13  ;;  %v6875_v52 = vpop.eup %6874 }
 0xb6a   : > { %v4801_v16 = vadd.f32 1.0, %v6875_v52  ;;  %v4864_v43 = vmul.f32 %v4800_v39, %v4608_v42 }
 0xb6b   : > { %v6877_v60 = vpop.eup %6876  ;;  %v4913_v14 = vpack.c.bf16 %v4863_v17, %v4861_v29 }
 0xb6c   : > { %v4802_v27 = vadd.f32 1.0, %v6877_v60  ;;  %v4865_v10 = vmul.f32 %v4801_v16, %v4609_v46 }
 0xb6d   : > { %v6879_v36 = vpop.eup %6878  ;;  %5147 = vmatprep.mubr.bf16.mxu1 %v4913_v14 }
 0xb6e   : > { %v4803_v15 = vadd.f32 1.0, %v6879_v36  ;;  %5148 = vmatmul.mubr.bf16.gmra.mxu1 %v4912_v26  ;;  %v4866_v48 = vmul.f32 %v4802_v27, %v4610_v30 }
 0xb70   : > { %v4867_v0 = vmul.f32 %v4803_v15, %v4611_v31  ;;  %v4914_v37 = vpack.c.bf16 %v4866_v48, %v4864_v43 }
 0xb72   : > { %v4915_v59 = vpack.c.bf16 %v4867_v0, %v4865_v10 }
 0xb74   : > { %5155 = vmatprep.mubr.bf16.mxu1 %v4915_v59 }
 0xb76   : > { %5156 = vmatmul.mubr.bf16.gmra.mxu1 %v4914_v37 }
 0xb83   : > { %v4501_v54 = vpop.f32.mrf.mxu0 }
 0xb84   : > { %v4502_v61 = vadd.f32 %v4501_v54, %v9452_v5 }
 0xb85   : > { %v4503_v44 = vpop.f32.mrf.mxu0 }
 0xb86   : > { %v4504_v38 = vadd.f32 %v4503_v44, %v9456_v55  ;;  %v4676_v8 = vmul.f32 0.70710677, %v4502_v61 }
 0xb87   : > { %v4505_v53 = vpop.f32.mrf.mxu0 }
 0xb88   : > { %v4677_v7 = vmul.f32 0.70710677, %v4504_v38  ;;  %v4506_v49 = vadd.f32 %v4505_v53, %v9452_v5  ;;  %v4613_v10 = vmul.f32 0.5, %v4504_v38 }
 0xb89   : > { %v4507_v4 = vpop.f32.mrf.mxu0 }
 0xb8a   : > { %6880 = verf.f32 %v4677_v7  ;;  %v4678_v22 = vmul.f32 0.70710677, %v4506_v49  ;;  %v4508_v18 = vadd.f32 %v4507_v4, %v9456_v55 }
 0xb8b   : > { %6882 = verf.f32 %v4676_v8  ;;  %v4511_v2 = vpop.f32.mrf.mxu0  ;;  %v4614_v8 = vmul.f32 0.5, %v4506_v49 }
 0xb8c   : > { %6884 = verf.f32 %v4678_v22  ;;  %v4679_v51 = vmul.f32 0.70710677, %v4508_v18  ;;  %v9582_v13 = vadd.f32 %v4511_v2, %v9452_v5  ;;  %v4615_v4 = vmul.f32 0.5, %v4508_v18 }
 0xb8d   : > { %v4513_v6 = vpop.f32.mrf.mxu0  ;;  %v4612_v2 = vmul.f32 0.5, %v4502_v61 }
 0xb8e   : > { %6886 = verf.f32 %v4679_v51  ;;  %v9585_v35 = vadd.f32 %v4513_v6, %v9456_v55  ;;  %v4680_v9 = vmul.f32 0.70710677, %v9582_v13 }
 0xb8f   : > { %v4515_v24 = vpop.f32.mrf.mxu0 }
 0xb90   : > { %v4681_v29 = vmul.f32 0.70710677, %v9585_v35  ;;  %v4516_v17 = vadd.f32 %v4515_v24, %v9452_v5 }
 0xb91   : > { %v4517_v52 = vpop.f32.mrf.mxu0 }
 0xb92   : > { %6888 = verf.f32 %v4681_v29  ;;  %v4682_v41 = vmul.f32 0.70710677, %v4516_v17  ;;  %v4518_v60 = vadd.f32 %v4517_v52, %v9456_v55 }
 0xb93   : > { %6890 = verf.f32 %v4680_v9  ;;  %v4521_v14 = vpop.f32.mrf.mxu0 }
 0xb94   : > { %6892 = verf.f32 %v4682_v41  ;;  %v4683_v26 = vmul.f32 0.70710677, %v4518_v60  ;;  %v9592_v16 = vadd.f32 %v4521_v14, %v9452_v5 }
 0xb95   : > { %v4523_v27 = vpop.f32.mrf.mxu0 }
 0xb96   : > { %6894 = verf.f32 %v4683_v26  ;;  %v4684_v36 = vmul.f32 0.70710677, %v9592_v16  ;;  %v9596_v39 = vadd.f32 %v4523_v27, %v9456_v55 }
 0xb97   : > { %v6881_v46 = vpop.eup %6880  ;;  %v4525_v30 = vpop.f32.mrf.mxu0 }
 0xb98   : > { %v6883_v31 = vpop.eup %6882  ;;  %v9599_v15 = vadd.f32 %v4525_v30, %v9452_v5  ;;  %v4685_v48 = vmul.f32 0.70710677, %v9596_v39  ;;  %v4805_v43 = vadd.f32 1.0, %v6881_v46  ;;  %6896 = verf.f32 %v4684_v36 }
 0xb99   : > { %v6885_v42 = vpop.eup %6884  ;;  %v4527_v0 = vpop.f32.mrf.mxu0  ;;  %v4804_v44 = vadd.f32 1.0, %v6883_v31 }
 0xb9a   : > { %v4806_v59 = vadd.f32 1.0, %v6885_v42  ;;  %v4686_v37 = vmul.f32 0.70710677, %v9599_v15  ;;  %6898 = verf.f32 %v4685_v48  ;;  %v4528_v53 = vadd.f32 %v4527_v0, %v9456_v55 }
 0xb9b   : > { %v6887_v54 = vpop.eup %6886  ;;  %v4531_v7 = vpop.f32.mrf.mxu0  ;;  %v4869_v24 = vmul.f32 %v4805_v43, %v4613_v10  ;;  %v4868_v41 = vmul.f32 %v4804_v44, %v4612_v2  ;;  %v4619_v44 = vmul.f32 0.5, %v4518_v60 }
 0xb9c   : > { %v4807_v22 = vadd.f32 1.0, %v6887_v54  ;;  %6900 = verf.f32 %v4686_v37  ;;  %v9605_v38 = vadd.f32 %v4531_v7, %v9452_v5  ;;  %v4870_v51 = vmul.f32 %v4806_v59, %v4614_v8 }
 0xb9d   : > { %v4687_v6 = vmul.f32 0.70710677, %v4528_v53  ;;  %v4533_v9 = vpop.f32.mrf.mxu0  ;;  %v4618_v59 = vmul.f32 0.5, %v4516_v17  ;;  %v4617_v54 = vmul.f32 0.5, %v9585_v35  ;;  %v4616_v7 = vmul.f32 0.5, %v9582_v13 }
 0xb9e   : > { %v4871_v29 = vmul.f32 %v4807_v22, %v4615_v4  ;;  %v4688_v49 = vmul.f32 0.70710677, %v9605_v38  ;;  %v4534_v14 = vadd.f32 %v4533_v9, %v9456_v55  ;;  %v4916_v30 = vpack.c.bf16 %v4870_v51, %v4868_v41 }
 0xb9f   : > { %v6889_v52 = vpop.eup %6888  ;;  %6902 = verf.f32 %v4687_v6  ;;  %v4535_v26 = vpop.f32.mrf.mxu0  ;;  %v4621_v13 = vmul.f32 0.5, %v9596_v39 }
 0xba0   : > { %v6891_v18 = vpop.eup %6890  ;;  %v4536_v27 = vadd.f32 %v4535_v26, %v9452_v5  ;;  %v4917_v36 = vpack.c.bf16 %v4871_v29, %v4869_v24  ;;  %v4689_v61 = vmul.f32 0.70710677, %v4534_v14  ;;  %v4809_v42 = vadd.f32 1.0, %v6889_v52 }
 0xba1   : > { %v6893_v46 = vpop.eup %6892  ;;  %v4537_v31 = vpop.f32.mrf.mxu0  ;;  %6904 = verf.f32 %v4688_v49  ;;  %v4808_v43 = vadd.f32 1.0, %v6891_v18  ;;  %v4622_v26 = vmul.f32 0.5, %v9599_v15  ;;  %v4623_v18 = vmul.f32 0.5, %v4528_v53 }
 0xba2   : > { %v4810_v48 = vadd.f32 1.0, %v6893_v46  ;;  %v4690_v10 = vmul.f32 0.70710677, %v4536_v27  ;;  %5163 = vmatprep.mubr.bf16.mxu1 %v4917_v36  ;;  %6906 = verf.f32 %v4689_v61  ;;  %v4538_v37 = vadd.f32 %v4537_v31, %v9456_v55 }
 0xba3   : > { %v6895_v0 = vpop.eup %6894  ;;  %5164 = vmatmul.mubr.bf16.gmra.mxu1 %v4916_v30  ;;  %v4873_v2 = vmul.f32 %v4809_v42, %v4617_v54  ;;  %v4872_v9 = vmul.f32 %v4808_v43, %v4616_v7  ;;  %v4620_v46 = vmul.f32 0.5, %v9592_v16  ;;  %v4626_v7 = vmul.f32 0.5, %v4536_v27 }
 0xba4   : > { %v4811_v8 = vadd.f32 1.0, %v6895_v0  ;;  %6908 = verf.f32 %v4690_v10  ;;  %v4874_v4 = vmul.f32 %v4810_v48, %v4618_v59  ;;  %v4691_v22 = vmul.f32 0.70710677, %v4538_v37 }
 0xba5   : > { %v6897_v6 = vpop.eup %6896  ;;  %v4625_v39 = vmul.f32 0.5, %v4534_v14  ;;  %v4627_v53 = vmul.f32 0.5, %v4538_v37  ;;  %v4624_v16 = vmul.f32 0.5, %v9605_v38 }
 0xba6   : > { %v4875_v51 = vmul.f32 %v4811_v8, %v4619_v44  ;;  %6910 = verf.f32 %v4691_v22  ;;  %v4918_v52 = vpack.c.bf16 %v4874_v4, %v4872_v9  ;;  %v4812_v60 = vadd.f32 1.0, %v6897_v6 }
 0xba7   : > { %v6899_v24 = vpop.eup %6898 }
 0xba8   : > { %v4919_v17 = vpack.c.bf16 %v4875_v51, %v4873_v2  ;;  %v4813_v49 = vadd.f32 1.0, %v6899_v24  ;;  %v4876_v10 = vmul.f32 %v4812_v60, %v4620_v46 }
 0xba9   : > { %v6901_v29 = vpop.eup %6900 }
 0xbaa   : > { %v4814_v41 = vadd.f32 1.0, %v6901_v29  ;;  %5171 = vmatprep.mubr.bf16.mxu1 %v4919_v17  ;;  %v4877_v31 = vmul.f32 %v4813_v49, %v4621_v13 }
 0xbab   : > { %5172 = vmatmul.mubr.bf16.gmra.mxu1 %v4918_v52 }
 0xbac   : > { %v6903_v35 = vpop.eup %6902  ;;  %v4878_v30 = vmul.f32 %v4814_v41, %v4622_v26 }
 0xbad   : > { %v4815_v36 = vadd.f32 1.0, %v6903_v35 }
 0xbae   : > { %v6905_v61 = vpop.eup %6904  ;;  %v4920_v59 = vpack.c.bf16 %v4878_v30, %v4876_v10 }
 0xbaf   : > { %v4879_v42 = vmul.f32 %v4815_v36, %v4623_v18  ;;  %v6907_v48 = vpop.eup %6906  ;;  %v4816_v15 = vadd.f32 1.0, %v6905_v61 }
 0xbb0   : > { %v4817_v44 = vadd.f32 1.0, %v6907_v48 }
 0xbb1   : > { %v6909_v0 = vpop.eup %6908  ;;  %v4921_v43 = vpack.c.bf16 %v4879_v42, %v4877_v31  ;;  %v4880_v6 = vmul.f32 %v4816_v15, %v4624_v16 }
 0xbb2   : > { %v4818_v54 = vadd.f32 1.0, %v6909_v0  ;;  %v4881_v2 = vmul.f32 %v4817_v44, %v4625_v39 }
 0xbb3   : > { %5179 = vmatprep.mubr.bf16.mxu1 %v4921_v43  ;;  %v6911_v8 = vpop.eup %6910 }
 0xbb4   : > { %5180 = vmatmul.mubr.bf16.gmra.mxu1 %v4920_v59  ;;  %v4819_v4 = vadd.f32 1.0, %v6911_v8  ;;  %v4882_v22 = vmul.f32 %v4818_v54, %v4626_v7 }
 0xbb6   : > { %v4883_v51 = vmul.f32 %v4819_v4, %v4627_v53  ;;  %v4922_v24 = vpack.c.bf16 %v4882_v22, %v4880_v6 }
 0xbb8   : > { %v4923_v9 = vpack.c.bf16 %v4883_v51, %v4881_v2 }
 0xbba   : > { %5187 = vmatprep.mubr.bf16.mxu1 %v4923_v9 }
 0xbbc   : > { %5188 = vmatmul.mubr.bf16.gmra.mxu1 %v4922_v24 }
 0xbc2   : > { %v4541_v17 = vpop.f32.mrf.mxu0 }
 0xbc3   : > { %v4542_v29 = vadd.f32 %v4541_v17, %v9452_v5 }
 0xbc4   : > { %v4543_v52 = vpop.f32.mrf.mxu0 }
 0xbc5   : > { %v4544_v27 = vadd.f32 %v4543_v52, %v9456_v55  ;;  %v4692_v41 = vmul.f32 0.70710677, %v4542_v29  ;;  %v4628_v2 = vmul.f32 0.5, %v4542_v29 }
 0xbc6   : > { %v4545_v14 = vpop.f32.mrf.mxu0 }
 0xbc7   : > { %v4693_v37 = vmul.f32 0.70710677, %v4544_v27  ;;  %v4546_v49 = vadd.f32 %v4545_v14, %v9452_v5 }
 0xbc8   : > { %v4547_v38 = vpop.f32.mrf.mxu0 }
 0xbc9   : > { %6912 = verf.f32 %v4693_v37  ;;  %v4694_v35 = vmul.f32 0.70710677, %v4546_v49  ;;  %v4548_v60 = vadd.f32 %v4547_v38, %v9456_v55  ;;  %v4630_v6 = vmul.f32 0.5, %v4546_v49 }
 0xbca   : > { %6914 = verf.f32 %v4692_v41  ;;  %v4551_v13 = vpop.f32.mrf.mxu0  ;;  %v4629_v37 = vmul.f32 0.5, %v4544_v27 }
 0xbcb   : > { %6916 = verf.f32 %v4694_v35  ;;  %v4695_v26 = vmul.f32 0.70710677, %v4548_v60  ;;  %v9622_v18 = vadd.f32 %v4551_v13, %v9452_v5  ;;  %v4631_v38 = vmul.f32 0.5, %v4548_v60  ;;  %v9657_v60 = vld [vmem:[%s9889_s9] ss:$0 sm:$0xff] }
 0xbcc   : > { %v4553_v36 = vpop.f32.mrf.mxu0 }
 0xbcd   : > { %6918 = verf.f32 %v4695_v26  ;;  %v4696_v46 = vmul.f32 0.70710677, %v9622_v18  ;;  %v9626_v30 = vadd.f32 %v4553_v36, %v9456_v55 }
 0xbce   : > { %v4555_v61 = vpop.f32.mrf.mxu0 }
 0xbcf   : > { %v4697_v31 = vmul.f32 0.70710677, %v9626_v30  ;;  %v4556_v42 = vadd.f32 %v4555_v61, %v9452_v5  ;;  %6920 = verf.f32 %v4696_v46 }
 0xbd0   : > { %v4557_v48 = vpop.f32.mrf.mxu0 }
 0xbd1   : > { %6922 = verf.f32 %v4697_v31  ;;  %v4698_v10 = vmul.f32 0.70710677, %v4556_v42  ;;  %v9631_v0 = vadd.f32 %v4557_v48, %v9456_v55 }
 0xbd2   : > { %v4561_v43 = vpop.f32.mrf.mxu0 }
 0xbd3   : > { %6924 = verf.f32 %v4698_v10  ;;  %v4699_v59 = vmul.f32 0.70710677, %v9631_v0  ;;  %v9635_v54 = vadd.f32 %v4561_v43, %v9452_v5 }
 0xbd4   : > { %v4563_v44 = vpop.f32.mrf.mxu0 }
 0xbd5   : > { %6926 = verf.f32 %v4699_v59  ;;  %v9638_v15 = vadd.f32 %v4563_v44, %v9456_v55  ;;  %v4700_v39 = vmul.f32 0.70710677, %v9635_v54 }
 0xbd6   : > { %v6913_v8 = vpop.eup %6912  ;;  %v4565_v53 = vpop.f32.mrf.mxu0 }
 0xbd7   : > { %v6915_v7 = vpop.eup %6914  ;;  %v4701_v16 = vmul.f32 0.70710677, %v9638_v15  ;;  %v9643_v22 = vadd.f32 %v4565_v53, %v9452_v5  ;;  %v4821_v51 = vadd.f32 1.0, %v6913_v8 }
 0xbd8   : > { %v6917_v4 = vpop.eup %6916  ;;  %v4567_v24 = vpop.f32.mrf.mxu0  ;;  %v4820_v52 = vadd.f32 1.0, %v6915_v7 }
 0xbd9   : > { %v4822_v9 = vadd.f32 1.0, %v6917_v4  ;;  %6928 = verf.f32 %v4701_v16  ;;  %v4702_v41 = vmul.f32 0.70710677, %v9643_v22  ;;  %v9647_v14 = vadd.f32 %v4567_v24, %v9456_v55 }
 0xbda   : > { %v6919_v17 = vpop.eup %6918  ;;  %6930 = verf.f32 %v4700_v39  ;;  %v4571_v26 = vpop.f32.mrf.mxu0  ;;  %v4885_v46 = vmul.f32 %v4821_v51, %v4629_v37  ;;  %v4884_v43 = vmul.f32 %v4820_v52, %v4628_v2 }
 0xbdb   : > { %v4823_v35 = vadd.f32 1.0, %v6919_v17  ;;  %v5865_v13 = vpop.f32.mrf.mxu1  ;;  %v4886_v36 = vmul.f32 %v4822_v9, %v4630_v6  ;;  %6932 = verf.f32 %v4702_v41  ;;  %v4703_v29 = vmul.f32 0.70710677, %v9647_v14 }
 0xbdc   : > { %v9651_v49 = vadd.f32 %v4571_v26, %v9452_v5  ;;  %v4573_v31 = vpop.f32.mrf.mxu0  ;;  %v6921_v10 = vpop.eup %6920  ;;  %v4634_v6 = vmul.f32 0.5, %v4556_v42 }
 0xbdd   : > { %v4887_v61 = vmul.f32 %v4823_v35, %v4631_v38  ;;  %v5866_v48 = vpop.f32.mrf.mxu1  ;;  %6934 = verf.f32 %v4703_v29  ;;  %v9660_v44 = vadd.f32 %v4573_v31, %v9456_v55  ;;  %v4924_v4 = vpack.c.bf16 %v4886_v36, %v4884_v43 }
 0xbde   : > { %v4704_v27 = vmul.f32 0.70710677, %v9651_v49  ;;  %v6923_v59 = vpop.eup %6922  ;;  %v5867_v8 = vadd.f32 %v5866_v48, %v5865_v13  ;;  %v4575_v7 = vpop.f32.mrf.mxu0  ;;  %v4824_v51 = vadd.f32 1.0, %v6921_v10  ;;  %v4633_v13 = vmul.f32 0.5, %v9626_v30 }
 0xbdf   : > { %v5868_v39 = vpop.f32.mrf.mxu1  ;;  %v4925_v53 = vpack.c.bf16 %v4887_v61, %v4885_v46  ;;  %v9663_v16 = vadd.f32 %v4575_v7, %v9452_v5  ;;  %v4705_v9 = vmul.f32 0.70710677, %v9660_v44  ;;  %v4825_v41 = vadd.f32 1.0, %v6923_v59 }
 0xbe0   : > { %v6925_v2 = vpop.eup %6924  ;;  %v5102_v24 = vadd.f32 %v5867_v8, %v9657_v60  ;;  %v4577_v17 = vpop.f32.mrf.mxu0  ;;  %6936 = verf.f32 %v4704_v27  ;;  %v4635_v36 = vmul.f32 0.5, %v9631_v0  ;;  %v4632_v46 = vmul.f32 0.5, %v9622_v18 }
 0xbe1   : > { %v5869_v52 = vpop.f32.mrf.mxu1  ;;  %5195 = vmatprep.mubr.bf16.mxu1 %v4925_v53  ;;  %v4826_v37 = vadd.f32 1.0, %v6925_v2  ;;  %v4706_v38 = vmul.f32 0.70710677, %v9663_v16  ;;  %6938 = verf.f32 %v4705_v9  ;;  %v9670_v42 = vadd.f32 %v4577_v17, %v9456_v55 }
 0xbe2   : > { %5196 = vmatmul.mubr.bf16.gmra.mxu1 %v4924_v4  ;;  %v6927_v35 = vpop.eup %6926  ;;  %v5228_v5 = vadd.f32 %v5102_v24, %v8916_v56  ;;  %v5870_v26 = vadd.f32 %v5869_v52, %v5868_v39  ;;  %v4889_v56 = vmul.f32 %v4825_v41, %v4633_v13  ;;  %v4888_v0 = vmul.f32 %v4824_v51, %v4632_v46 }
 0xbe3   : > { %v4827_v29 = vadd.f32 1.0, %v6927_v35  ;;  %6940 = verf.f32 %v4706_v38  ;;  %v4890_v61 = vmul.f32 %v4826_v37, %v4634_v6  ;;  %v4707_v31 = vmul.f32 0.70710677, %v9670_v42 }
 0xbe4   : > { %v5105_v48 = vadd.f32 %v5870_v26, %v9657_v60  ;;  %5260 = vst.msk [vmem:[%s9679_s30] sm:$0xff] %vm476_vm0, %v5228_v5  ;;  %v4637_v24 = vmul.f32 0.5, %v9638_v15  ;;  %v4639_v52 = vmul.f32 0.5, %v9647_v14  ;;  %v4636_v35 = vmul.f32 0.5, %v9635_v54 }
 0xbe5   : > { %v5871_v10 = vpop.f32.mrf.mxu1  ;;  %v4891_v55 = vmul.f32 %v4827_v29, %v4635_v36  ;;  %6942 = verf.f32 %v4707_v31  ;;  %v4926_v39 = vpack.c.bf16 %v4890_v61, %v4888_v0 }
 0xbe6   : > { %v6929_v30 = vpop.eup %6928  ;;  %v5229_v18 = vadd.f32 %v5105_v48, %v8926_v63  ;;  %v4638_v63 = vmul.f32 0.5, %v9643_v22 }
 0xbe7   : > { %v5872_v43 = vpop.f32.mrf.mxu1  ;;  %v6931_v27 = vpop.eup %6930  ;;  %v4927_v8 = vpack.c.bf16 %v4891_v55, %v4889_v56  ;;  %v4829_v4 = vadd.f32 1.0, %v6929_v30 }
 0xbe8   : > { %v5873_v59 = vadd.f32 %v5872_v43, %v5871_v10  ;;  %v6933_v7 = vpop.eup %6932  ;;  %5261 = vst.msk [vmem:[%s9679_s30 + $0x8] sm:$0xff] %vm476_vm0, %v5229_v18  ;;  %v4828_v51 = vadd.f32 1.0, %v6931_v27  ;;  %v4641_v43 = vmul.f32 0.5, %v9660_v44 }
 0xbe9   : > { %v5874_v53 = vpop.f32.mrf.mxu1  ;;  %v4830_v2 = vadd.f32 1.0, %v6933_v7  ;;  %5203 = vmatprep.mubr.bf16.mxu1 %v4927_v8  ;;  %v4893_v26 = vmul.f32 %v4829_v4, %v4637_v24 }
 0xbea   : > { %v5110_v6 = vadd.f32 %v5873_v59, %v9657_v60  ;;  %v6935_v9 = vpop.eup %6934  ;;  %5204 = vmatmul.mubr.bf16.gmra.mxu1 %v4926_v39  ;;  %v4892_v22 = vmul.f32 %v4828_v51, %v4636_v35  ;;  %v4643_v59 = vmul.f32 0.5, %v9670_v42 }
 0xbeb   : > { %v5875_v17 = vpop.f32.mrf.mxu1  ;;  %v4831_v41 = vadd.f32 1.0, %v6935_v9  ;;  %v4894_v5 = vmul.f32 %v4830_v2, %v4638_v63 }
 0xbec   : > { %v5230_v37 = vadd.f32 %v5110_v6, %v8919_v20  ;;  %v5876_v38 = vadd.f32 %v5875_v17, %v5874_v53  ;;  %v4640_v53 = vmul.f32 0.5, %v9651_v49 }
 0xbed   : > { %v4895_v13 = vmul.f32 %v4831_v41, %v4639_v52  ;;  %v5877_v29 = vpop.f32.mrf.mxu1  ;;  %v6937_v15 = vpop.eup %6936  ;;  %v4928_v48 = vpack.c.bf16 %v4894_v5, %v4892_v22 }
 0xbee   : > { %v5113_v36 = vadd.f32 %v5876_v38, %v9657_v60  ;;  %5262 = vst.msk [vmem:[%s9679_s30 + $0x10] sm:$0xff] %vm476_vm0, %v5230_v37  ;;  %v6939_v46 = vpop.eup %6938  ;;  %v4832_v18 = vadd.f32 1.0, %v6937_v15 }
 0xbef   : > { %v5878_v61 = vpop.f32.mrf.mxu1  ;;  %v4929_v31 = vpack.c.bf16 %v4895_v13, %v4893_v26  ;;  %v4833_v55 = vadd.f32 1.0, %v6939_v46 }
 0xbf0   : > { %v5231_v14 = vadd.f32 %v5113_v36, %v8929_v3  ;;  %v6941_v20 = vpop.eup %6940  ;;  %v5879_v10 = vadd.f32 %v5878_v61, %v5877_v29  ;;  %v4642_v3 = vmul.f32 0.5, %v9663_v16  ;;  %v4896_v44 = vmul.f32 %v4832_v18, %v4640_v53 }
 0xbf1   : > { %v4834_v54 = vadd.f32 1.0, %v6941_v20  ;;  %v5880_v56 = vpop.f32.mrf.mxu1  ;;  %5211 = vmatprep.mubr.bf16.mxu1 %v4929_v31  ;;  %v4897_v2 = vmul.f32 %v4833_v55, %v4641_v43 }
 0xbf2   : > { %5263 = vst.msk [vmem:[%s9679_s30 + $0x18] sm:$0xff] %vm476_vm0, %v5231_v14  ;;  %v5118_v30 = vadd.f32 %v5879_v10, %v9657_v60  ;;  %5212 = vmatmul.mubr.bf16.gmra.mxu1 %v4928_v48  ;;  %v6943_v0 = vpop.eup %6942 }
 0xbf3   : > { %v5881_v27 = vpop.f32.mrf.mxu1  ;;  %v4835_v8 = vadd.f32 1.0, %v6943_v0  ;;  %v4898_v4 = vmul.f32 %v4834_v54, %v4642_v3 }
 0xbf4   : > { %v5232_v7 = vadd.f32 %v5118_v30, %v8942_v47  ;;  %v5882_v39 = vadd.f32 %v5881_v27, %v5880_v56 }
 0xbf5   : > { %v4899_v6 = vmul.f32 %v4835_v8, %v4643_v59  ;;  %v4930_v24 = vpack.c.bf16 %v4898_v4, %v4896_v44 }
 0xbf6   : > { %v5121_v9 = vadd.f32 %v5882_v39, %v9657_v60  ;;  %5264 = vst.msk [vmem:[%s9679_s30 + $0x20] sm:$0xff] %vm476_vm0, %v5232_v7 }
 0xbf7   : > { %v4931_v51 = vpack.c.bf16 %v4899_v6, %v4897_v2 }
 0xbf8   : > { %v5233_v16 = vadd.f32 %v5121_v9, %v8947_v45  ;;  %v10109_v9 = vld [vmem:[#allocation45_spill] sm:$0xff] }
 0xbf9   : > { %5219 = vmatprep.mubr.bf16.mxu1 %v4931_v51 }
 0xbfa   : > { %5265 = vst.msk [vmem:[%s9679_s30 + $0x28] sm:$0xff] %vm476_vm0, %v5233_v16  ;;  %5220 = vmatmul.mubr.bf16.gmra.mxu1 %v4930_v24 }
 0xc15   : > { %v5883_v47 = vpop.f32.mrf.mxu1 }
 0xc17   : > { %v5884_v49 = vpop.f32.mrf.mxu1 }
 0xc18   : > { %v5885_v42 = vadd.f32 %v5884_v49, %v5883_v47 }
 0xc19   : > { %v5886_v63 = vpop.f32.mrf.mxu1 }
 0xc1a   : > { %v5126_v17 = vadd.f32 %v5885_v42, %v9657_v60  ;;  %v10110_v42 = vld [vmem:[#allocation32_spill] sm:$0xff] }
 0xc1b   : > { %v5887_v52 = vpop.f32.mrf.mxu1 }
 0xc1c   : > { %v5234_v41 = vadd.f32 %v5126_v17, %v8950_v12  ;;  %v5888_v37 = vadd.f32 %v5887_v52, %v5886_v63 }
 0xc1d   : > { %v5889_v45 = vpop.f32.mrf.mxu1 }
 0xc1e   : > { %v5129_v38 = vadd.f32 %v5888_v37, %v9657_v60  ;;  %5266 = vst.msk [vmem:[%s9679_s30 + $0x30] sm:$0xff] %vm476_vm0, %v5234_v41  ;;  %v10111_v37 = vld [vmem:[#allocation33_spill] sm:$0xff] }
 0xc1f   : > { %v5890_v35 = vpop.f32.mrf.mxu1 }
 0xc20   : > { %v5235_v5 = vadd.f32 %v5129_v38, %v8953_v28  ;;  %v5891_v26 = vadd.f32 %v5890_v35, %v5889_v45 }
 0xc21   : > { %v5892_v13 = vpop.f32.mrf.mxu1 }
 0xc22   : > { %v5134_v36 = vadd.f32 %v5891_v26, %v9657_v60  ;;  %5267 = vst.msk [vmem:[%s9679_s30 + $0x38] sm:$0xff] %vm476_vm0, %v5235_v5 }
 0xc23   : > { %v5893_v29 = vpop.f32.mrf.mxu1 }
 0xc24   : > { %v5236_v12 = vadd.f32 %v5134_v36, %v8976_v21  ;;  %v5894_v15 = vadd.f32 %v5893_v29, %v5892_v13  ;;  %v10112_v13 = vld [vmem:[#allocation31_spill] sm:$0xff] }
 0xc26   : > { %v5137_v22 = vadd.f32 %v5894_v15, %v9657_v60  ;;  %v5895_v46 = vpop.f32.mrf.mxu1  ;;  %5268 = vst.msk [vmem:[%s9679_s30 + $0x40] sm:$0xff] %vm476_vm0, %v5236_v12 }
 0xc28   : > { %v5237_v14 = vadd.f32 %v5137_v22, %v8984_v40  ;;  %v5896_v61 = vpop.f32.mrf.mxu1  ;;  %v10113_v22 = vld [vmem:[#allocation36_spill] sm:$0xff] }
 0xc29   : > { %v5897_v28 = vadd.f32 %v5896_v61, %v5895_v46 }
 0xc2a   : > { %v5898_v31 = vpop.f32.mrf.mxu1  ;;  %5269 = vst.msk [vmem:[%s9679_s30 + $0x48] sm:$0xff] %vm476_vm0, %v5237_v14 }
 0xc2b   : > { %v5142_v20 = vadd.f32 %v5897_v28, %v9657_v60 }
 0xc2c   : > { %v5899_v48 = vpop.f32.mrf.mxu1 }
 0xc2d   : > { %v5238_v21 = vadd.f32 %v5142_v20, %v8979_v1  ;;  %v5900_v10 = vadd.f32 %v5899_v48, %v5898_v31  ;;  %v10114_v48 = vld [vmem:[#allocation34_spill] sm:$0xff] }
 0xc2e   : > { %v5901_v54 = vpop.f32.mrf.mxu1 }
 0xc2f   : > { %v5145_v56 = vadd.f32 %v5900_v10, %v9657_v60  ;;  %5270 = vst.msk [vmem:[%s9679_s30 + $0x50] sm:$0xff] %vm476_vm0, %v5238_v21 }
 0xc30   : > { %v5902_v55 = vpop.f32.mrf.mxu1 }
 0xc31   : > { %v5239_v40 = vadd.f32 %v5145_v56, %v8987_v50  ;;  %v5903_v30 = vadd.f32 %v5902_v55, %v5901_v54 }
 0xc32   : > { %v5904_v0 = vpop.f32.mrf.mxu1 }
 0xc33   : > { %v5150_v18 = vadd.f32 %v5903_v30, %v9657_v60  ;;  %5271 = vst.msk [vmem:[%s9679_s30 + $0x58] sm:$0xff] %vm476_vm0, %v5239_v40  ;;  %v10115_v40 = vld [vmem:[#allocation38_spill] sm:$0xff] }
 0xc34   : > { %v5905_v43 = vpop.f32.mrf.mxu1 }
 0xc35   : > { %v5240_v1 = vadd.f32 %v5150_v18, %v9004_v19  ;;  %v5906_v3 = vadd.f32 %v5905_v43, %v5904_v0 }
 0xc36   : > { %v5907_v27 = vpop.f32.mrf.mxu1 }
 0xc37   : > { %v5153_v59 = vadd.f32 %v5906_v3, %v9657_v60  ;;  %5272 = vst.msk [vmem:[%s9679_s30 + $0x60] sm:$0xff] %vm476_vm0, %v5240_v1  ;;  %v10116_v3 = vld [vmem:[#allocation35_spill] sm:$0xff] }
 0xc38   : > { %v5908_v8 = vpop.f32.mrf.mxu1 }
 0xc39   : > { %v5241_v50 = vadd.f32 %v5153_v59, %v9012_v33  ;;  %v5909_v7 = vadd.f32 %v5908_v8, %v5907_v27 }
 0xc3a   : > { %v5910_v39 = vpop.f32.mrf.mxu1 }
 0xc3b   : > { %v5158_v53 = vadd.f32 %v5909_v7, %v9657_v60  ;;  %5273 = vst.msk [vmem:[%s9679_s30 + $0x68] sm:$0xff] %vm476_vm0, %v5241_v50 }
 0xc3c   : > { %v5911_v4 = vpop.f32.mrf.mxu1 }
 0xc3d   : > { %v5242_v2 = vadd.f32 %v5158_v53, %v9007_v34  ;;  %v5912_v19 = vadd.f32 %v5911_v4, %v5910_v39 }
 0xc3f   : > { %v5161_v6 = vadd.f32 %v5912_v19, %v9657_v60  ;;  %5274 = vst.msk [vmem:[%s9679_s30 + $0x70] sm:$0xff] %vm476_vm0, %v5242_v2 }
 0xc41   : > { %v5243_v44 = vadd.f32 %v5161_v6, %v10109_v9 }
 0xc43   : > { %5275 = vst.msk [vmem:[%s9679_s30 + $0x78] sm:$0xff] %vm476_vm0, %v5243_v44 }
 0xc63   : > { %v5913_v16 = vpop.f32.mrf.mxu1 }
 0xc65   : > { %v5914_v33 = vpop.f32.mrf.mxu1 }
 0xc66   : > { %v5915_v51 = vadd.f32 %v5914_v33, %v5913_v16 }
 0xc67   : > { %v5916_v24 = vpop.f32.mrf.mxu1 }
 0xc68   : > { %v5166_v47 = vadd.f32 %v5915_v51, %v9657_v60 }
 0xc69   : > { %v5917_v49 = vpop.f32.mrf.mxu1 }
 0xc6a   : > { %v5244_v63 = vadd.f32 %v5166_v47, %v10110_v42  ;;  %v5918_v17 = vadd.f32 %v5917_v49, %v5916_v24 }
 0xc6b   : > { %v5919_v34 = vpop.f32.mrf.mxu1 }
 0xc6c   : > { %v5169_v52 = vadd.f32 %v5918_v17, %v9657_v60  ;;  %5292 = vrot.lane.b32.xlu0 %v5244_v63, %s7090_s21 }
 0xc6d   : > { %v5920_v41 = vpop.f32.mrf.mxu1 }
 0xc6e   : > { %v5245_v45 = vadd.f32 %v5169_v52, %v10111_v37  ;;  %v5921_v38 = vadd.f32 %v5920_v41, %v5919_v34 }
 0xc6f   : > { %v5922_v35 = vpop.f32.mrf.mxu1 }
 0xc70   : > { %v5174_v5 = vadd.f32 %v5921_v38, %v9657_v60  ;;  %5294 = vrot.lane.b32.xlu1 %v5245_v45, %s7090_s21  ;;  %v10117_v38 = vld [vmem:[#allocation47_spill] sm:$0xff] }
 0xc71   : > { %v5923_v26 = vpop.f32.mrf.mxu1 }
 0xc72   : > { %v5246_v36 = vadd.f32 %v5174_v5, %v10112_v13  ;;  %v5924_v29 = vadd.f32 %v5923_v26, %v5922_v35  ;;  %v10118_v13 = vld [vmem:[#allocation46_spill] sm:$0xff] }
 0xc74   : > { %v5177_v12 = vadd.f32 %v5924_v29, %v9657_v60  ;;  %v5925_v15 = vpop.f32.mrf.mxu1  ;;  %5296 = vrot.lane.b32.xlu1 %v5246_v36, %s7090_s21 }
 0xc76   : > { %v5247_v46 = vadd.f32 %v5177_v12, %v10113_v22  ;;  %v5926_v14 = vpop.f32.mrf.mxu1 }
 0xc77   : > { %v5927_v61 = vadd.f32 %v5926_v14, %v5925_v15 }
 0xc78   : > { %v5928_v28 = vpop.f32.mrf.mxu1  ;;  %5298 = vrot.lane.b32.xlu0 %v5247_v46, %s7090_s21 }
 0xc79   : > { %v5182_v31 = vadd.f32 %v5927_v61, %v9657_v60 }
 0xc7a   : > { %v5929_v20 = vpop.f32.mrf.mxu1 }
 0xc7b   : > { %v5248_v21 = vadd.f32 %v5182_v31, %v10114_v48  ;;  %v5930_v10 = vadd.f32 %v5929_v20, %v5928_v28 }
 0xc7c   : > { %v5931_v54 = vpop.f32.mrf.mxu1 }
 0xc7d   : > { %v5185_v56 = vadd.f32 %v5930_v10, %v9657_v60  ;;  %5300 = vrot.lane.b32.xlu1 %v5248_v21, %s7090_s21 }
 0xc7e   : > { %v5932_v55 = vpop.f32.mrf.mxu1 }
 0xc7f   : > { %v5249_v30 = vadd.f32 %v5185_v56, %v10115_v40  ;;  %v5933_v0 = vadd.f32 %v5932_v55, %v5931_v54 }
 0xc80   : > { %v5934_v18 = vpop.f32.mrf.mxu1 }
 0xc81   : > { %v5190_v43 = vadd.f32 %v5933_v0, %v9657_v60  ;;  %5302 = vrot.lane.b32.xlu0 %v5249_v30, %s7090_s21 }
 0xc82   : > { %v5935_v1 = vpop.f32.mrf.mxu1 }
 0xc83   : > { %v5250_v27 = vadd.f32 %v5190_v43, %v10116_v3  ;;  %v5936_v59 = vadd.f32 %v5935_v1, %v5934_v18 }
 0xc85   : > { %v5193_v8 = vadd.f32 %v5936_v59, %v9657_v60  ;;  %5304 = vrot.lane.b32.xlu1 %v5250_v27, %s7090_s21 }
 0xc87   : > { %v5251_v50 = vadd.f32 %v5193_v8, %v9102_v23 }
 0xc89   : > { %5306 = vrot.lane.b32.xlu0 %v5251_v50, %s7090_s21 }
 0xca2   : > { %v5937_v7 = vpop.f32.mrf.mxu1 }
 0xca4   : > { %v5938_v39 = vpop.f32.mrf.mxu1 }
 0xca5   : > { %v5939_v53 = vadd.f32 %v5938_v39, %v5937_v7 }
 0xca6   : > { %v5940_v4 = vpop.f32.mrf.mxu1 }
 0xca7   : > { %v5198_v2 = vadd.f32 %v5939_v53, %v9657_v60 }
 0xca8   : > { %v5941_v19 = vpop.f32.mrf.mxu1 }
 0xca9   : > { %v5252_v6 = vadd.f32 %v5198_v2, %v9149_v11  ;;  %v5942_v9 = vadd.f32 %v5941_v19, %v5940_v4 }
 0xcaa   : > { %v5943_v16 = vpop.f32.mrf.mxu1 }
 0xcab   : > { %v5201_v44 = vadd.f32 %v5942_v9, %v9657_v60  ;;  %5308 = vrot.lane.b32.xlu1 %v5252_v6, %s7090_s21 }
 0xcac   : > { %v5944_v23 = vpop.f32.mrf.mxu1 }
 0xcad   : > { %v5253_v33 = vadd.f32 %v5201_v44, %v9161_v25  ;;  %v5945_v51 = vadd.f32 %v5944_v23, %v5943_v16 }
 0xcae   : > { %v5946_v24 = vpop.f32.mrf.mxu1 }
 0xcaf   : > { %5310 = vrot.lane.b32.xlu0 %v5253_v33, %s7090_s21  ;;  %v5206_v47 = vadd.f32 %v5945_v51, %v9657_v60 }
 0xcb0   : > { %v5947_v49 = vpop.f32.mrf.mxu1 }
 0xcb1   : > { %v5254_v42 = vadd.f32 %v5206_v47, %v9170_v32  ;;  %v5948_v63 = vadd.f32 %v5947_v49, %v5946_v24 }
 0xcb2   : > { %v5949_v11 = vpop.f32.mrf.mxu1 }
 0xcb3   : > { %v5209_v17 = vadd.f32 %v5948_v63, %v9657_v60  ;;  %5312 = vrot.lane.b32.xlu1 %v5254_v42, %s7090_s21 }
 0xcb4   : > { %v5950_v34 = vpop.f32.mrf.mxu1 }
 0xcb5   : > { %v5255_v52 = vadd.f32 %v5209_v17, %v9183_v58  ;;  %v5951_v25 = vadd.f32 %v5950_v34, %v5949_v11 }
 0xcb6   : > { %v5952_v41 = vpop.f32.mrf.mxu1 }
 0xcb7   : > { %v5214_v37 = vadd.f32 %v5951_v25, %v9657_v60  ;;  %5314 = vrot.lane.b32.xlu0 %v5255_v52, %s7090_s21 }
 0xcb8   : > { %v5953_v45 = vpop.f32.mrf.mxu1 }
 0xcb9   : > { %v5256_v35 = vadd.f32 %v5214_v37, %v10117_v38  ;;  %v5954_v5 = vadd.f32 %v5953_v45, %v5952_v41 }
 0xcba   : > { %v5955_v26 = vpop.f32.mrf.mxu1 }
 0xcbb   : > { %v5217_v32 = vadd.f32 %v5954_v5, %v9657_v60  ;;  %5316 = vrot.lane.b32.xlu1 %v5256_v35, %s7090_s21 }
 0xcbc   : > { %v5956_v29 = vpop.f32.mrf.mxu1 }
 0xcbd   : > { %v5257_v36 = vadd.f32 %v5217_v32, %v10118_v13  ;;  %v5957_v58 = vadd.f32 %v5956_v29, %v5955_v26 }
 0xcbe   : > { %v5958_v12 = vpop.f32.mrf.mxu1 }
 0xcbf   : > { %5318 = vrot.lane.b32.xlu0 %v5257_v36, %s7090_s21  ;;  %v5222_v15 = vadd.f32 %v5957_v58, %v9657_v60 }
 0xcc0   : > { %v5959_v22 = vpop.f32.mrf.mxu1 }
 0xcc1   : > { %v5258_v46 = vadd.f32 %v5222_v15, %v9222_v57  ;;  %v5960_v14 = vadd.f32 %v5959_v22, %v5958_v12 }
 0xcc3   : > { %v5225_v61 = vadd.f32 %v5960_v14, %v9657_v60  ;;  %5320 = vrot.lane.b32.xlu1 %v5258_v46, %s7090_s21 }
 0xcc5   : > { %v5259_v28 = vadd.f32 %v5225_v61, %v9236_v62 }
 0xcc7   : > { %5322 = vrot.lane.b32.xlu0 %v5259_v28, %s7090_s21  ;;  %s5371_s21 = sshll.u32 %s9679_s30, 4  ;;  %s9835_s21 = int_to_ptr.vmem [resolvable:$true] %s5371_s21 }
 0xcc8   : > { %s7014_s26 = scalar_lea.vmem %s9835_s21, 2048  ;;  %p7021_p10 = scmp.lt.s32.totalorder %s9835_s21, %s7019_s27 }
 0xcc9   : > { %p7015_p3 = scmp.ne.s32.totalorder %s9835_s21, %s7014_s26  ;;  %p7022_p2 = scmp.lt.s32.totalorder %s7020_s29, %s7014_s26 }
 0xccb   : > { %p7016_p7 = pnand %p7015_p3, %p10119_p11  ;;  %p7023_p13 = por %p7022_p2, %p7021_p10 }
 0xccd   : > { %p7017_p12 = pneg %p7016_p7 }
 0xccf   : > { %p7024_p0 = pnand %p7023_p13, %p7017_p12 }
 0xcde   : > { %v5293_v31 = vpop.permute.xlu0 %5292 }
 0xcdf   : > { %5341 = vst.msk [vmem:[%s9679_s30] sm:$0xff] %vm5340_vm2, %v5293_v31 }
 0xce2   : > { %v5295_v20 = vpop.permute.xlu1 %5294 }
 0xce3   : > { %5342 = vst.msk [vmem:[%s9679_s30 + $0x8] sm:$0xff] %vm5340_vm2, %v5295_v20 }
 0xce6   : > { %v5297_v57 = vpop.permute.xlu1 %5296 }
 0xce7   : > { %5343 = vst.msk [vmem:[%s9679_s30 + $0x10] sm:$0xff] %vm5340_vm2, %v5297_v57 }
 0xcea   : > { %v5299_v60 = vpop.permute.xlu0 %5298 }
 0xceb   : > { %5344 = vst.msk [vmem:[%s9679_s30 + $0x18] sm:$0xff] %vm5340_vm2, %v5299_v60 }
 0xcef   : > { %v5301_v62 = vpop.permute.xlu1 %5300 }
 0xcf0   : > { %5345 = vst.msk [vmem:[%s9679_s30 + $0x20] sm:$0xff] %vm5340_vm2, %v5301_v62 }
 0xcf3   : > { %v5303_v48 = vpop.permute.xlu0 %5302 }
 0xcf4   : > { %5346 = vst.msk [vmem:[%s9679_s30 + $0x28] sm:$0xff] %vm5340_vm2, %v5303_v48 }
 0xcf7   : > { %v5305_v21 = vpop.permute.xlu1 %5304 }
 0xcf8   : > { %5347 = vst.msk [vmem:[%s9679_s30 + $0x30] sm:$0xff] %vm5340_vm2, %v5305_v21 }
 0xcfb   : > { %v5307_v10 = vpop.permute.xlu0 %5306 }
 0xcfc   : > { %5348 = vst.msk [vmem:[%s9679_s30 + $0x38] sm:$0xff] %vm5340_vm2, %v5307_v10 }
 0xd1d   : > { %v5309_v54 = vpop.permute.xlu1 %5308 }
 0xd1e   : > { %5349 = vst.msk [vmem:[%s9679_s30 + $0x40] sm:$0xff] %vm5340_vm2, %v5309_v54 }
 0xd21   : > { %v5311_v56 = vpop.permute.xlu0 %5310 }
 0xd22   : > { %5350 = vst.msk [vmem:[%s9679_s30 + $0x48] sm:$0xff] %vm5340_vm2, %v5311_v56 }
 0xd25   : > { %v5313_v55 = vpop.permute.xlu1 %5312 }
 0xd26   : > { %5351 = vst.msk [vmem:[%s9679_s30 + $0x50] sm:$0xff] %vm5340_vm2, %v5313_v55 }
 0xd29   : > { %v5315_v40 = vpop.permute.xlu0 %5314 }
 0xd2a   : > { %5352 = vst.msk [vmem:[%s9679_s30 + $0x58] sm:$0xff] %vm5340_vm2, %v5315_v40 }
 0xd2d   : > { %v5317_v30 = vpop.permute.xlu1 %5316 }
 0xd2e   : > { %5353 = vst.msk [vmem:[%s9679_s30 + $0x60] sm:$0xff] %vm5340_vm2, %v5317_v30 }
 0xd31   : > { %v5319_v0 = vpop.permute.xlu0 %5318 }
 0xd32   : > { %5354 = vst.msk [vmem:[%s9679_s30 + $0x68] sm:$0xff] %vm5340_vm2, %v5319_v0 }
 0xd35   : > { %v5321_v18 = vpop.permute.xlu1 %5320 }
 0xd36   : > { %5355 = vst.msk [vmem:[%s9679_s30 + $0x70] sm:$0xff] %vm5340_vm2, %v5321_v18 }
 0xd39   : > { %v5323_v43 = vpop.permute.xlu0 %5322 }
 0xd3a   : > { %5356 = vst.msk [vmem:[%s9679_s30 + $0x78] sm:$0xff] %vm5340_vm2, %v5323_v43 }
 0xd3b   : > { %7027 = shalt.err (!%p7024_p0)
}
 0xd3c   : > { %s7028_s24 = scalar_lea.hbm %s9833_s19, 2048  ;;  %s7032_s13 = scalar_lea.hbm %s9890_s10, 4096 }
 0xd3d   : > { %p7029_p5 = scmp.ne.s32.totalorder %s9833_s19, %s7028_s24  ;;  %p7033_p4 = scmp.lt.s32.totalorder %s9833_s19, %s9890_s10 }
 0xd3e   : > { %p7034_p6 = scmp.lt.s32.totalorder %s7032_s13, %s7028_s24 }
 0xd3f   : > { %p7030_p9 = pnand %p7029_p5, %p10119_p11 }
 0xd40   : > { %p7035_p8 = por %p7034_p6, %p7033_p4 }
 0xd41   : > { %p7031_p1 = pneg %p7030_p9 }
 0xd43   : > { %p7036_p3 = pnand %p7035_p8, %p7031_p1 }
 0xd45   : > { %7039 = shalt.err (!%p7036_p3)
}
 0xd46   : > { %s7095_s25 = smov 128   ;;  %s7096_s12 = smov 8  }
 0xd47   : > { %6327 = dma.vmem_to_hbm [thread:$0]  (%p10119_p11), %s9835_s21, 2048, %s9833_s19, %s5358_s11, %s7095_s25, %s7095_s25, %s7096_s12  }
 0xd48 PF: > { %s10120_s26 = sld [smem:[#allocation11_spill]]  ;;  %p10123_p12 = scmp.ge.s32.totalorder %s7082_s16, 2 }
 0xd49   : > { %s10121_s17 = sld [smem:[#allocation12_spill]] }
 0xd4e   : > { %s5386_s27 = sand.u32 1, %s10120_s26  }
 0xd4f   : > { %p10122_p7 = scmp.ne.s32.totalorder %s10121_s17, 0  ;;  %s5387_s29 = scalar_lea.sflag [#allocation4], %s5386_s27 }
 0xd51   : > { %p6338_p10 = pnand %p10123_p12, %p10122_p7 }
 0xd53   : > { %p6339_p2 = pneg %p6338_p10 }
 0xd55   : > { %7065 = dma.done.wait (%p6339_p2), %s5387_s29, 2048  }
 0xd56   : > { %7067 = vsyncadd (%p6339_p2), %s5387_s29, 4294965248  ;;  %s10124_s16 = sld [smem:[#allocation13_spill]]  ;;  %s10125_s13 = smov %s7074_s14 }
 0xd57   : > { %s10126_s14 = smov %s7078_s15  ;;  %s10127_s15 = smov %s7223_s18 }
 0xd5c   : > { %p24_p13 = scmp.ge.s32.totalorder %s10124_s16, 4  }
 0xd5e   :  { %26 = sbr.rel (!%p24_p13) target bundleno = 8 (0x8), region = 111 }
 0xd63   :  { %5392 = vsyncpa [#allocation3], 1 }
 0xd64   :  { %5394 = vsyncpa [#allocation3 + $0x1], 1 }
 0xd65   :  { %5395 = vsyncpa [#allocation6], 1 }
 0xd66   :  { %5396 = vsyncpa [#allocation4], 1 }
 0xd67   :  { %5398 = vsyncpa [#allocation4 + $0x1], 1 }

</bundles_post_ra>
